<compile_context>
chip_gen: v7x
topology: tpu7x:2x2x1
jax: 0.10.0
libtpu: 0.0.40
codegen_flags: <defaults>
</compile_context>

<pallas_src>
import functools
from math import ceil

import jax
import jax.numpy as jnp
from jax import lax
from jax.experimental import pallas as pl
from jax.experimental.pallas import tpu as pltpu

F32 = jnp.float32
MXU_DTYPE = jnp.bfloat16      # MXU operand dtype; accumulation stays f32.


# ----------------------------- in-kernel helpers -----------------------------

def _im2col(x, ksize):
    """'same'-padded im2col along the sequence (sublane) axis.

    (L, C) -> (L, ksize*C) in MXU dtype via zero-pad + ksize static sublane
    slices (no O(L^2) shift matrices).
    """
    L, C = x.shape
    pad = ksize // 2
    xb = x.astype(MXU_DTYPE)
    z = jnp.zeros((pad, C), MXU_DTYPE)
    xp = jnp.concatenate([z, xb, z], axis=0)               # (L + 2*pad, C)
    taps = [lax.slice_in_dim(xp, t, t + L, axis=0) for t in range(ksize)]
    return jnp.concatenate(taps, axis=-1)                  # (L, ksize*C)


def _conv_bn_relu(x, w, b, s, h, ksize):
    """Conv1d('same') -> +bias -> ReLU -> eval-mode BN affine."""
    cols = _im2col(x, ksize)
    y = jnp.dot(cols, w.astype(MXU_DTYPE), preferred_element_type=F32)
    y = jnp.maximum(y + b, 0.0)
    return y * s + h


def _double_conv(x, p, ksize):
    """Down-style block from packed slabs: w=[w1;w2], aff=[b1,s1,h1,b2,s2,h2]."""
    w = p["w"][...]
    aff = p["aff"][...]
    cin = x.shape[-1]
    cout = aff.shape[-1]
    w1 = w[:ksize * cin]
    w2 = w[ksize * cin:ksize * (cin + cout)]
    x = _conv_bn_relu(x, w1, aff[0:1], aff[1:2], aff[2:3], ksize)
    x = _conv_bn_relu(x, w2, aff[3:4], aff[4:5], aff[5:6], ksize)
    return x


def _maxpool2(x):
    """MaxPool1d(kernel=2, stride=2) along the sequence axis (pure VPU)."""
    L, C = x.shape
    xr = x.reshape(L // 2, 2, C)
    return jnp.maximum(xr[:, 0], xr[:, 1])


def _up_block(x, skip, p, ksize):
    """ConvTranspose1d(2, stride=2) + (skip-concat -> double conv).

    Packed slabs: w = [wt0; wt1; w1a; w1b; w2], aff = [bt,b1,s1,h1,b2,s2,h2].
    The channel concat is replaced by split weights (w1a: upsampled, w1b: skip).
    """
    w = p["w"][...]
    aff = p["aff"][...]
    L, pnum = x.shape
    num = aff.shape[-1]
    wt0 = w[:pnum]
    wt1 = w[pnum:2 * pnum]
    o = 2 * pnum
    w1a = w[o:o + ksize * num]
    w1b = w[o + ksize * num:o + 2 * ksize * num]
    w2 = w[o + 2 * ksize * num:o + 3 * ksize * num]
    bt, b1, s1, h1, b2, s2, h2 = (aff[i:i + 1] for i in range(7))

    # ConvTranspose1d(k=2, stride=2): out[2l + t] = x[l] @ wt[t] + bt.
    xb = x.astype(MXU_DTYPE)
    y0 = jnp.dot(xb, wt0.astype(MXU_DTYPE), preferred_element_type=F32)
    y1 = jnp.dot(xb, wt1.astype(MXU_DTYPE), preferred_element_type=F32)
    up = jnp.stack([y0, y1], axis=1).reshape(2 * L, num) + bt   # row interleave

    cols_u = _im2col(up, ksize)
    cols_s = _im2col(skip, ksize)
    y = (jnp.dot(cols_u, w1a.astype(MXU_DTYPE), preferred_element_type=F32)
         + jnp.dot(cols_s, w1b.astype(MXU_DTYPE), preferred_element_type=F32))
    y = jnp.maximum(y + b1, 0.0) * s1 + h1
    return _conv_bn_relu(y, w2, b2, s2, h2, ksize)


# --------------------------------- the kernel ---------------------------------

def _unet_kernel(x_ref, *refs, treedef, ksize, num_blocks):
    out_ref = refs[-1]
    params = jax.tree_util.tree_unflatten(treedef, refs[:-1])

    x = x_ref[0]                                   # (L, Cin) for this batch row
    x = _double_conv(x, params["down0"], ksize)
    skips = [x]
    for i in range(num_blocks):                    # encoder (pcc blocks)
        x = _maxpool2(x)
        x = _double_conv(x, params["down"][i], ksize)
        skips.append(x)
    for i in range(num_blocks):                    # decoder (ucc blocks)
        x = _up_block(x, skips[num_blocks - i - 1], params["up"][i], ksize)

    # convn: 1x1 conv epilogue, emitted channels-first (num_class, L) so the
    # store is lane-dense (L on the 128-lane axis); broadcast-multiply + lane
    # reduce avoids any in-kernel transpose.
    wnT = params["convn"]["w"][...]                # (num_class, num)
    bnb = params["convn"]["b"][...]                # (num_class, 1)
    y = jnp.sum(x[None, :, :] * wnT[:, None, :], axis=-1) + bnb   # (num_class, L)
    out_ref[0] = y.astype(out_ref.dtype)


# --------------------------------- the wrapper ---------------------------------

def leopard_unet_forward(params, x):
    """x: (N, L, num_channel) channels-last -> (N, L, num_class)."""
    n, L, cin = x.shape
    num_blocks = len(params["up"])
    num_class = params["convn"]["w"].shape[0]
    cout0 = params["down0"]["aff"].shape[1]
    ksize = params["down0"]["w"].shape[0] // (cin + cout0)
    if ksize % 2 != 1:
        raise ValueError("size_kernel must be odd for 'same' padding semantics")
    if L % (2 ** num_blocks) != 0:
        raise ValueError("L must be divisible by 2**num_blocks")

    leaves, treedef = jax.tree_util.tree_flatten(params)
    kern = functools.partial(_unet_kernel, treedef=treedef, ksize=ksize,
                             num_blocks=num_blocks)
    param_specs = [
        pl.BlockSpec(leaf.shape, lambda i, nd=leaf.ndim: (0,) * nd)
        for leaf in leaves
    ]
    out_cf = pl.pallas_call(
        kern,
        out_shape=jax.ShapeDtypeStruct((n, num_class, L), F32),
        grid=(n,),
        in_specs=[pl.BlockSpec((1, L, cin), lambda i: (i, 0, 0))] + param_specs,
        out_specs=pl.BlockSpec((1, num_class, L), lambda i: (i, 0, 0)),
        compiler_params=pltpu.CompilerParams(
            dimension_semantics=("parallel",),
            vmem_limit_bytes=32 * 1024 * 1024),
    )(x, *leaves)
    return jnp.transpose(out_cf, (0, 2, 1))        # back to PyTorch (N, L, C_out)


# --------------------------- parameter initialization ---------------------------

def _bn_affine(key, c, eps=1e-5):
    k1, k2, k3, k4 = jax.random.split(key, 4)
    gamma = 1.0 + 0.1 * jax.random.normal(k1, (c,), F32)
    beta = 0.1 * jax.random.normal(k2, (c,), F32)
    mean = 0.1 * jax.random.normal(k3, (c,), F32)
    var = jax.random.uniform(k4, (c,), F32, 0.5, 1.5)
    scale = gamma / jnp.sqrt(var + eps)
    shift = beta - mean * scale
    return scale, shift


def _conv_w(key, k, cin, cout, fan_in=None):
    kw, kb = jax.random.split(key)
    bound = 1.0 / float(fan_in if fan_in is not None else cin * k) ** 0.5
    w = jax.random.uniform(kw, (k * cin, cout), F32, -bound, bound)
    b = jax.random.uniform(kb, (cout,), F32, -bound, bound)
    return w, b


def _init_double_conv(key, cin, cout, k):
    k1, k2, k3, k4 = jax.random.split(key, 4)
    w1, b1 = _conv_w(k1, k, cin, cout)
    s1, h1 = _bn_affine(k2, cout)
    w2, b2 = _conv_w(k3, k, cout, cout)
    s2, h2 = _bn_affine(k4, cout)
    return dict(w=jnp.concatenate([w1, w2], axis=0),
                aff=jnp.stack([b1, s1, h1, b2, s2, h2], axis=0))


def _init_up_block(key, pnum, num, k):
    kt0, kt1, kbt, k1a, k1b, kb1, kbn1, k2, kbn2 = jax.random.split(key, 9)
    bound_t = 1.0 / float(2 * pnum) ** 0.5
    wt0 = jax.random.uniform(kt0, (pnum, num), F32, -bound_t, bound_t)
    wt1 = jax.random.uniform(kt1, (pnum, num), F32, -bound_t, bound_t)
    bt = jax.random.uniform(kbt, (num,), F32, -bound_t, bound_t)
    bound1 = 1.0 / float(2 * num * k) ** 0.5        # concat-conv fan_in = 2*num*k
    w1a = jax.random.uniform(k1a, (k * num, num), F32, -bound1, bound1)
    w1b = jax.random.uniform(k1b, (k * num, num), F32, -bound1, bound1)
    b1 = jax.random.uniform(kb1, (num,), F32, -bound1, bound1)
    s1, h1 = _bn_affine(kbn1, num)
    w2, b2 = _conv_w(k2, k, num, num)
    s2, h2 = _bn_affine(kbn2, num)
    return dict(w=jnp.concatenate([wt0, wt1, w1a, w1b, w2], axis=0),
                aff=jnp.stack([bt, b1, s1, h1, b2, s2, h2], axis=0))


def init_leopard_unet(key, num_class=1, num_channel=5, num_blocks=2,
                      initial_filter=15, size_kernel=7, scale_filter=1.5):
    params = {}
    keys = list(jax.random.split(key, 2 * num_blocks + 2))
    ki = iter(keys)
    params["down0"] = _init_double_conv(next(ki), num_channel, initial_filter,
                                        size_kernel)
    num = initial_filter
    params["down"] = []
    for _ in range(num_blocks):                     # pcc blocks
        pnum, num = num, int(num * scale_filter)
        params["down"].append(_init_double_conv(next(ki), pnum, num, size_kernel))
    params["up"] = []
    for _ in range(num_blocks):                     # ucc blocks
        pnum, num = num, ceil(num / scale_filter)
        params["up"].append(_init_up_block(next(ki), pnum, num, size_kernel))
    kw, kb = jax.random.split(next(ki))
    bound = 1.0 / float(num) ** 0.5
    wnT = jax.random.uniform(kw, (num_class, num), F32, -bound, bound)   # stored transposed
    bnb = jax.random.uniform(kb, (num_class, 1), F32, -bound, bound)
    params["convn"] = dict(w=wnT, b=bnb)
    return params


# ----------------------------------- main -----------------------------------

if __name__ == "__main__":
    key = jax.random.PRNGKey(0)
    kparam, kx = jax.random.split(key)

    N, L, C = 2, 16, 5          # batch, sequence length, input channels
    NUM_BLOCKS = 2              # default -5 degenerates (range(-5) empty); use 2

    params = init_leopard_unet(kparam, num_class=1, num_channel=C,
                               num_blocks=NUM_BLOCKS, initial_filter=15,
                               size_kernel=7, scale_filter=1.5)
    x = jax.random.normal(kx, (N, L, C), F32)

    fwd = jax.jit(leopard_unet_forward)
    y = jax.block_until_ready(fwd(params, x))

    assert y.shape == (N, L, 1), y.shape
    assert bool(jnp.all(jnp.isfinite(y)))
    print("KERNEL_OK")
</pallas_src>

<mosaic_0001>
module attributes {stable_mosaic.version = 11 : i64} {
  func.func @_unet_kernel(%arg0: i32, %arg1: memref<1x16x5xf32, #tpu.memory_space<vmem>>, %arg2: memref<1x1xf32, #tpu.memory_space<vmem>>, %arg3: memref<1x15xf32, #tpu.memory_space<vmem>>, %arg4: memref<6x22xf32, #tpu.memory_space<vmem>>, %arg5: memref<259x22xf32, #tpu.memory_space<vmem>>, %arg6: memref<6x33xf32, #tpu.memory_space<vmem>>, %arg7: memref<385x33xf32, #tpu.memory_space<vmem>>, %arg8: memref<6x15xf32, #tpu.memory_space<vmem>>, %arg9: memref<140x15xf32, #tpu.memory_space<vmem>>, %arg10: memref<7x22xf32, #tpu.memory_space<vmem>>, %arg11: memref<528x22xf32, #tpu.memory_space<vmem>>, %arg12: memref<7x15xf32, #tpu.memory_space<vmem>>, %arg13: memref<359x15xf32, #tpu.memory_space<vmem>>, %arg14: memref<1x1x16xf32, #tpu.memory_space<vmem>>) attributes {dimension_semantics = [#tpu.dimension_semantics<parallel>], iteration_bounds = array<i64: 2>, scalar_prefetch = 0 : i64, scratch_operands = 0 : i64, tpu.core_type = #tpu.core_type<tc>, window_params = [{transform_indices = @transform_0, window_bounds = array<i64: 1, 16, 5>}, {pipeline_mode = #tpu.pipeline_mode<synchronous>, transform_indices = @transform_1, window_bounds = array<i64: 1, 1>}, {pipeline_mode = #tpu.pipeline_mode<synchronous>, transform_indices = @transform_2, window_bounds = array<i64: 1, 15>}, {pipeline_mode = #tpu.pipeline_mode<synchronous>, transform_indices = @transform_3, window_bounds = array<i64: 6, 22>}, {pipeline_mode = #tpu.pipeline_mode<synchronous>, transform_indices = @transform_4, window_bounds = array<i64: 259, 22>}, {pipeline_mode = #tpu.pipeline_mode<synchronous>, transform_indices = @transform_5, window_bounds = array<i64: 6, 33>}, {pipeline_mode = #tpu.pipeline_mode<synchronous>, transform_indices = @transform_6, window_bounds = array<i64: 385, 33>}, {pipeline_mode = #tpu.pipeline_mode<synchronous>, transform_indices = @transform_7, window_bounds = array<i64: 6, 15>}, {pipeline_mode = #tpu.pipeline_mode<synchronous>, transform_indices = @transform_8, window_bounds = array<i64: 140, 15>}, {pipeline_mode = #tpu.pipeline_mode<synchronous>, transform_indices = @transform_9, window_bounds = array<i64: 7, 22>}, {pipeline_mode = #tpu.pipeline_mode<synchronous>, transform_indices = @transform_10, window_bounds = array<i64: 528, 22>}, {pipeline_mode = #tpu.pipeline_mode<synchronous>, transform_indices = @transform_11, window_bounds = array<i64: 7, 15>}, {pipeline_mode = #tpu.pipeline_mode<synchronous>, transform_indices = @transform_12, window_bounds = array<i64: 359, 15>}, {transform_indices = @transform_13, window_bounds = array<i64: 1, 1, 16>}]} {
    %c0 = arith.constant 0 : index
    %c0_0 = arith.constant 0 : index
    %c0_1 = arith.constant 0 : index
    %0 = vector.load %arg1[%c0, %c0_0, %c0_1] : memref<1x16x5xf32, #tpu.memory_space<vmem>>, vector<1x16x5xf32>
    %1 = vector.shape_cast %0 : vector<1x16x5xf32> to vector<16x5xf32>
    %c0_2 = arith.constant 0 : index
    %c0_3 = arith.constant 0 : index
    %2 = vector.load %arg9[%c0_2, %c0_3] : memref<140x15xf32, #tpu.memory_space<vmem>>, vector<140x15xf32>
    %c0_4 = arith.constant 0 : index
    %c0_5 = arith.constant 0 : index
    %3 = vector.load %arg8[%c0_4, %c0_5] : memref<6x15xf32, #tpu.memory_space<vmem>>, vector<6x15xf32>
    %4 = vector.extract_strided_slice %2 {offsets = [0, 0], sizes = [35, 15], strides = [1, 1]} : vector<140x15xf32> to vector<35x15xf32>
    %5 = vector.extract_strided_slice %2 {offsets = [35, 0], sizes = [105, 15], strides = [1, 1]} : vector<140x15xf32> to vector<105x15xf32>
    %6 = vector.extract_strided_slice %3 {offsets = [0, 0], sizes = [1, 15], strides = [1, 1]} : vector<6x15xf32> to vector<1x15xf32>
    %7 = vector.extract_strided_slice %3 {offsets = [1, 0], sizes = [1, 15], strides = [1, 1]} : vector<6x15xf32> to vector<1x15xf32>
    %8 = vector.extract_strided_slice %3 {offsets = [2, 0], sizes = [1, 15], strides = [1, 1]} : vector<6x15xf32> to vector<1x15xf32>
    %9 = arith.truncf %1 : vector<16x5xf32> to vector<16x5xbf16>
    %cst = arith.constant 0.000000e+00 : bf16
    %10 = vector.broadcast %cst : bf16 to vector<3x5xbf16>
    %11 = tpu.concatenate %10, %9, %10 in 0 : vector<3x5xbf16>, vector<16x5xbf16>, vector<3x5xbf16> -> vector<22x5xbf16>
    %12 = vector.extract_strided_slice %11 {offsets = [0, 0], sizes = [16, 5], strides = [1, 1]} : vector<22x5xbf16> to vector<16x5xbf16>
    %13 = vector.extract_strided_slice %11 {offsets = [1, 0], sizes = [16, 5], strides = [1, 1]} : vector<22x5xbf16> to vector<16x5xbf16>
    %14 = vector.extract_strided_slice %11 {offsets = [2, 0], sizes = [16, 5], strides = [1, 1]} : vector<22x5xbf16> to vector<16x5xbf16>
    %15 = vector.extract_strided_slice %11 {offsets = [3, 0], sizes = [16, 5], strides = [1, 1]} : vector<22x5xbf16> to vector<16x5xbf16>
    %16 = vector.extract_strided_slice %11 {offsets = [4, 0], sizes = [16, 5], strides = [1, 1]} : vector<22x5xbf16> to vector<16x5xbf16>
    %17 = vector.extract_strided_slice %11 {offsets = [5, 0], sizes = [16, 5], strides = [1, 1]} : vector<22x5xbf16> to vector<16x5xbf16>
    %18 = vector.extract_strided_slice %11 {offsets = [6, 0], sizes = [16, 5], strides = [1, 1]} : vector<22x5xbf16> to vector<16x5xbf16>
    %19 = tpu.concatenate %12, %13, %14, %15, %16, %17, %18 in 1 : vector<16x5xbf16>, vector<16x5xbf16>, vector<16x5xbf16>, vector<16x5xbf16>, vector<16x5xbf16>, vector<16x5xbf16>, vector<16x5xbf16> -> vector<16x35xbf16>
    %20 = arith.truncf %4 : vector<35x15xf32> to vector<35x15xbf16>
    %cst_6 = arith.constant dense<0.000000e+00> : vector<16x15xf32>
    %21 = tpu.matmul %19, %20, %cst_6 {dimension_numbers = #tpu.dot_dimension_numbers<[1], [0], [0], [1], [0, 0, 1, 1], [], []>} : vector<16x35xbf16>, vector<35x15xbf16>, vector<16x15xf32> -> vector<16x15xf32>
    %22 = vector.broadcast %6 : vector<1x15xf32> to vector<16x15xf32>
    %23 = arith.addf %21, %22 : vector<16x15xf32>
    %cst_7 = arith.constant 0.000000e+00 : f32
    %24 = vector.broadcast %cst_7 : f32 to vector<16x15xf32>
    %25 = arith.maximumf %23, %24 : vector<16x15xf32>
    %26 = vector.broadcast %7 : vector<1x15xf32> to vector<16x15xf32>
    %27 = arith.mulf %25, %26 : vector<16x15xf32>
    %28 = vector.broadcast %8 : vector<1x15xf32> to vector<16x15xf32>
    %29 = arith.addf %27, %28 : vector<16x15xf32>
    %30 = vector.extract_strided_slice %3 {offsets = [3, 0], sizes = [1, 15], strides = [1, 1]} : vector<6x15xf32> to vector<1x15xf32>
    %31 = vector.extract_strided_slice %3 {offsets = [4, 0], sizes = [1, 15], strides = [1, 1]} : vector<6x15xf32> to vector<1x15xf32>
    %32 = vector.extract_strided_slice %3 {offsets = [5, 0], sizes = [1, 15], strides = [1, 1]} : vector<6x15xf32> to vector<1x15xf32>
    %33 = arith.truncf %29 : vector<16x15xf32> to vector<16x15xbf16>
    %cst_8 = arith.constant 0.000000e+00 : bf16
    %34 = vector.broadcast %cst_8 : bf16 to vector<3x15xbf16>
    %35 = tpu.concatenate %34, %33, %34 in 0 : vector<3x15xbf16>, vector<16x15xbf16>, vector<3x15xbf16> -> vector<22x15xbf16>
    %36 = vector.extract_strided_slice %35 {offsets = [0, 0], sizes = [16, 15], strides = [1, 1]} : vector<22x15xbf16> to vector<16x15xbf16>
    %37 = vector.extract_strided_slice %35 {offsets = [1, 0], sizes = [16, 15], strides = [1, 1]} : vector<22x15xbf16> to vector<16x15xbf16>
    %38 = vector.extract_strided_slice %35 {offsets = [2, 0], sizes = [16, 15], strides = [1, 1]} : vector<22x15xbf16> to vector<16x15xbf16>
    %39 = vector.extract_strided_slice %35 {offsets = [3, 0], sizes = [16, 15], strides = [1, 1]} : vector<22x15xbf16> to vector<16x15xbf16>
    %40 = vector.extract_strided_slice %35 {offsets = [4, 0], sizes = [16, 15], strides = [1, 1]} : vector<22x15xbf16> to vector<16x15xbf16>
    %41 = vector.extract_strided_slice %35 {offsets = [5, 0], sizes = [16, 15], strides = [1, 1]} : vector<22x15xbf16> to vector<16x15xbf16>
    %42 = vector.extract_strided_slice %35 {offsets = [6, 0], sizes = [16, 15], strides = [1, 1]} : vector<22x15xbf16> to vector<16x15xbf16>
    %43 = tpu.concatenate %36, %37, %38, %39, %40, %41, %42 in 1 : vector<16x15xbf16>, vector<16x15xbf16>, vector<16x15xbf16>, vector<16x15xbf16>, vector<16x15xbf16>, vector<16x15xbf16>, vector<16x15xbf16> -> vector<16x105xbf16>
    %44 = arith.truncf %5 : vector<105x15xf32> to vector<105x15xbf16>
    %cst_9 = arith.constant dense<0.000000e+00> : vector<16x15xf32>
    %45 = tpu.matmul %43, %44, %cst_9 {dimension_numbers = #tpu.dot_dimension_numbers<[1], [0], [0], [1], [0, 0, 1, 1], [], []>} : vector<16x105xbf16>, vector<105x15xbf16>, vector<16x15xf32> -> vector<16x15xf32>
    %46 = vector.broadcast %30 : vector<1x15xf32> to vector<16x15xf32>
    %47 = arith.addf %45, %46 : vector<16x15xf32>
    %cst_10 = arith.constant 0.000000e+00 : f32
    %48 = vector.broadcast %cst_10 : f32 to vector<16x15xf32>
    %49 = arith.maximumf %47, %48 : vector<16x15xf32>
    %50 = vector.broadcast %31 : vector<1x15xf32> to vector<16x15xf32>
    %51 = arith.mulf %49, %50 : vector<16x15xf32>
    %52 = vector.broadcast %32 : vector<1x15xf32> to vector<16x15xf32>
    %53 = arith.addf %51, %52 : vector<16x15xf32>
    %54 = vector.shape_cast %53 : vector<16x15xf32> to vector<8x2x15xf32>
    %55 = vector.extract_strided_slice %54 {offsets = [0, 0, 0], sizes = [8, 1, 15], strides = [1, 1, 1]} : vector<8x2x15xf32> to vector<8x1x15xf32>
    %56 = vector.shape_cast %55 : vector<8x1x15xf32> to vector<8x15xf32>
    %57 = vector.extract_strided_slice %54 {offsets = [0, 1, 0], sizes = [8, 1, 15], strides = [1, 1, 1]} : vector<8x2x15xf32> to vector<8x1x15xf32>
    %58 = vector.shape_cast %57 : vector<8x1x15xf32> to vector<8x15xf32>
    %59 = arith.maximumf %56, %58 : vector<8x15xf32>
    %c0_11 = arith.constant 0 : index
    %c0_12 = arith.constant 0 : index
    %60 = vector.load %arg5[%c0_11, %c0_12] : memref<259x22xf32, #tpu.memory_space<vmem>>, vector<259x22xf32>
    %c0_13 = arith.constant 0 : index
    %c0_14 = arith.constant 0 : index
    %61 = vector.load %arg4[%c0_13, %c0_14] : memref<6x22xf32, #tpu.memory_space<vmem>>, vector<6x22xf32>
    %62 = vector.extract_strided_slice %60 {offsets = [0, 0], sizes = [105, 22], strides = [1, 1]} : vector<259x22xf32> to vector<105x22xf32>
    %63 = vector.extract_strided_slice %60 {offsets = [105, 0], sizes = [154, 22], strides = [1, 1]} : vector<259x22xf32> to vector<154x22xf32>
    %64 = vector.extract_strided_slice %61 {offsets = [0, 0], sizes = [1, 22], strides = [1, 1]} : vector<6x22xf32> to vector<1x22xf32>
    %65 = vector.extract_strided_slice %61 {offsets = [1, 0], sizes = [1, 22], strides = [1, 1]} : vector<6x22xf32> to vector<1x22xf32>
    %66 = vector.extract_strided_slice %61 {offsets = [2, 0], sizes = [1, 22], strides = [1, 1]} : vector<6x22xf32> to vector<1x22xf32>
    %67 = arith.truncf %59 : vector<8x15xf32> to vector<8x15xbf16>
    %cst_15 = arith.constant 0.000000e+00 : bf16
    %68 = vector.broadcast %cst_15 : bf16 to vector<3x15xbf16>
    %69 = tpu.concatenate %68, %67, %68 in 0 : vector<3x15xbf16>, vector<8x15xbf16>, vector<3x15xbf16> -> vector<14x15xbf16>
    %70 = vector.extract_strided_slice %69 {offsets = [0, 0], sizes = [8, 15], strides = [1, 1]} : vector<14x15xbf16> to vector<8x15xbf16>
    %71 = vector.extract_strided_slice %69 {offsets = [1, 0], sizes = [8, 15], strides = [1, 1]} : vector<14x15xbf16> to vector<8x15xbf16>
    %72 = vector.extract_strided_slice %69 {offsets = [2, 0], sizes = [8, 15], strides = [1, 1]} : vector<14x15xbf16> to vector<8x15xbf16>
    %73 = vector.extract_strided_slice %69 {offsets = [3, 0], sizes = [8, 15], strides = [1, 1]} : vector<14x15xbf16> to vector<8x15xbf16>
    %74 = vector.extract_strided_slice %69 {offsets = [4, 0], sizes = [8, 15], strides = [1, 1]} : vector<14x15xbf16> to vector<8x15xbf16>
    %75 = vector.extract_strided_slice %69 {offsets = [5, 0], sizes = [8, 15], strides = [1, 1]} : vector<14x15xbf16> to vector<8x15xbf16>
    %76 = vector.extract_strided_slice %69 {offsets = [6, 0], sizes = [8, 15], strides = [1, 1]} : vector<14x15xbf16> to vector<8x15xbf16>
    %77 = tpu.concatenate %70, %71, %72, %73, %74, %75, %76 in 1 : vector<8x15xbf16>, vector<8x15xbf16>, vector<8x15xbf16>, vector<8x15xbf16>, vector<8x15xbf16>, vector<8x15xbf16>, vector<8x15xbf16> -> vector<8x105xbf16>
    %78 = arith.truncf %62 : vector<105x22xf32> to vector<105x22xbf16>
    %cst_16 = arith.constant dense<0.000000e+00> : vector<8x22xf32>
    %79 = tpu.matmul %77, %78, %cst_16 {dimension_numbers = #tpu.dot_dimension_numbers<[1], [0], [0], [1], [0, 0, 1, 1], [], []>} : vector<8x105xbf16>, vector<105x22xbf16>, vector<8x22xf32> -> vector<8x22xf32>
    %80 = vector.broadcast %64 : vector<1x22xf32> to vector<8x22xf32>
    %81 = arith.addf %79, %80 : vector<8x22xf32>
    %cst_17 = arith.constant 0.000000e+00 : f32
    %82 = vector.broadcast %cst_17 : f32 to vector<8x22xf32>
    %83 = arith.maximumf %81, %82 : vector<8x22xf32>
    %84 = vector.broadcast %65 : vector<1x22xf32> to vector<8x22xf32>
    %85 = arith.mulf %83, %84 : vector<8x22xf32>
    %86 = vector.broadcast %66 : vector<1x22xf32> to vector<8x22xf32>
    %87 = arith.addf %85, %86 : vector<8x22xf32>
    %88 = vector.extract_strided_slice %61 {offsets = [3, 0], sizes = [1, 22], strides = [1, 1]} : vector<6x22xf32> to vector<1x22xf32>
    %89 = vector.extract_strided_slice %61 {offsets = [4, 0], sizes = [1, 22], strides = [1, 1]} : vector<6x22xf32> to vector<1x22xf32>
    %90 = vector.extract_strided_slice %61 {offsets = [5, 0], sizes = [1, 22], strides = [1, 1]} : vector<6x22xf32> to vector<1x22xf32>
    %91 = arith.truncf %87 : vector<8x22xf32> to vector<8x22xbf16>
    %cst_18 = arith.constant 0.000000e+00 : bf16
    %92 = vector.broadcast %cst_18 : bf16 to vector<3x22xbf16>
    %93 = tpu.concatenate %92, %91, %92 in 0 : vector<3x22xbf16>, vector<8x22xbf16>, vector<3x22xbf16> -> vector<14x22xbf16>
    %94 = vector.extract_strided_slice %93 {offsets = [0, 0], sizes = [8, 22], strides = [1, 1]} : vector<14x22xbf16> to vector<8x22xbf16>
    %95 = vector.extract_strided_slice %93 {offsets = [1, 0], sizes = [8, 22], strides = [1, 1]} : vector<14x22xbf16> to vector<8x22xbf16>
    %96 = vector.extract_strided_slice %93 {offsets = [2, 0], sizes = [8, 22], strides = [1, 1]} : vector<14x22xbf16> to vector<8x22xbf16>
    %97 = vector.extract_strided_slice %93 {offsets = [3, 0], sizes = [8, 22], strides = [1, 1]} : vector<14x22xbf16> to vector<8x22xbf16>
    %98 = vector.extract_strided_slice %93 {offsets = [4, 0], sizes = [8, 22], strides = [1, 1]} : vector<14x22xbf16> to vector<8x22xbf16>
    %99 = vector.extract_strided_slice %93 {offsets = [5, 0], sizes = [8, 22], strides = [1, 1]} : vector<14x22xbf16> to vector<8x22xbf16>
    %100 = vector.extract_strided_slice %93 {offsets = [6, 0], sizes = [8, 22], strides = [1, 1]} : vector<14x22xbf16> to vector<8x22xbf16>
    %101 = tpu.concatenate %94, %95, %96, %97, %98, %99, %100 in 1 : vector<8x22xbf16>, vector<8x22xbf16>, vector<8x22xbf16>, vector<8x22xbf16>, vector<8x22xbf16>, vector<8x22xbf16>, vector<8x22xbf16> -> vector<8x154xbf16>
    %102 = arith.truncf %63 : vector<154x22xf32> to vector<154x22xbf16>
    %cst_19 = arith.constant dense<0.000000e+00> : vector<8x22xf32>
    %103 = tpu.matmul %101, %102, %cst_19 {dimension_numbers = #tpu.dot_dimension_numbers<[1], [0], [0], [1], [0, 0, 1, 1], [], []>} : vector<8x154xbf16>, vector<154x22xbf16>, vector<8x22xf32> -> vector<8x22xf32>
    %104 = vector.broadcast %88 : vector<1x22xf32> to vector<8x22xf32>
    %105 = arith.addf %103, %104 : vector<8x22xf32>
    %cst_20 = arith.constant 0.000000e+00 : f32
    %106 = vector.broadcast %cst_20 : f32 to vector<8x22xf32>
    %107 = arith.maximumf %105, %106 : vector<8x22xf32>
    %108 = vector.broadcast %89 : vector<1x22xf32> to vector<8x22xf32>
    %109 = arith.mulf %107, %108 : vector<8x22xf32>
    %110 = vector.broadcast %90 : vector<1x22xf32> to vector<8x22xf32>
    %111 = arith.addf %109, %110 : vector<8x22xf32>
    %112 = vector.shape_cast %111 : vector<8x22xf32> to vector<4x2x22xf32>
    %113 = vector.extract_strided_slice %112 {offsets = [0, 0, 0], sizes = [4, 1, 22], strides = [1, 1, 1]} : vector<4x2x22xf32> to vector<4x1x22xf32>
    %114 = vector.shape_cast %113 : vector<4x1x22xf32> to vector<4x22xf32>
    %115 = vector.extract_strided_slice %112 {offsets = [0, 1, 0], sizes = [4, 1, 22], strides = [1, 1, 1]} : vector<4x2x22xf32> to vector<4x1x22xf32>
    %116 = vector.shape_cast %115 : vector<4x1x22xf32> to vector<4x22xf32>
    %117 = arith.maximumf %114, %116 : vector<4x22xf32>
    %c0_21 = arith.constant 0 : index
    %c0_22 = arith.constant 0 : index
    %118 = vector.load %arg7[%c0_21, %c0_22] : memref<385x33xf32, #tpu.memory_space<vmem>>, vector<385x33xf32>
    %c0_23 = arith.constant 0 : index
    %c0_24 = arith.constant 0 : index
    %119 = vector.load %arg6[%c0_23, %c0_24] : memref<6x33xf32, #tpu.memory_space<vmem>>, vector<6x33xf32>
    %120 = vector.extract_strided_slice %118 {offsets = [0, 0], sizes = [154, 33], strides = [1, 1]} : vector<385x33xf32> to vector<154x33xf32>
    %121 = vector.extract_strided_slice %118 {offsets = [154, 0], sizes = [231, 33], strides = [1, 1]} : vector<385x33xf32> to vector<231x33xf32>
    %122 = vector.extract_strided_slice %119 {offsets = [0, 0], sizes = [1, 33], strides = [1, 1]} : vector<6x33xf32> to vector<1x33xf32>
    %123 = vector.extract_strided_slice %119 {offsets = [1, 0], sizes = [1, 33], strides = [1, 1]} : vector<6x33xf32> to vector<1x33xf32>
    %124 = vector.extract_strided_slice %119 {offsets = [2, 0], sizes = [1, 33], strides = [1, 1]} : vector<6x33xf32> to vector<1x33xf32>
    %125 = arith.truncf %117 : vector<4x22xf32> to vector<4x22xbf16>
    %cst_25 = arith.constant 0.000000e+00 : bf16
    %126 = vector.broadcast %cst_25 : bf16 to vector<3x22xbf16>
    %127 = tpu.concatenate %126, %125, %126 in 0 : vector<3x22xbf16>, vector<4x22xbf16>, vector<3x22xbf16> -> vector<10x22xbf16>
    %128 = vector.extract_strided_slice %127 {offsets = [0, 0], sizes = [4, 22], strides = [1, 1]} : vector<10x22xbf16> to vector<4x22xbf16>
    %129 = vector.extract_strided_slice %127 {offsets = [1, 0], sizes = [4, 22], strides = [1, 1]} : vector<10x22xbf16> to vector<4x22xbf16>
    %130 = vector.extract_strided_slice %127 {offsets = [2, 0], sizes = [4, 22], strides = [1, 1]} : vector<10x22xbf16> to vector<4x22xbf16>
    %131 = vector.extract_strided_slice %127 {offsets = [3, 0], sizes = [4, 22], strides = [1, 1]} : vector<10x22xbf16> to vector<4x22xbf16>
    %132 = vector.extract_strided_slice %127 {offsets = [4, 0], sizes = [4, 22], strides = [1, 1]} : vector<10x22xbf16> to vector<4x22xbf16>
    %133 = vector.extract_strided_slice %127 {offsets = [5, 0], sizes = [4, 22], strides = [1, 1]} : vector<10x22xbf16> to vector<4x22xbf16>
    %134 = vector.extract_strided_slice %127 {offsets = [6, 0], sizes = [4, 22], strides = [1, 1]} : vector<10x22xbf16> to vector<4x22xbf16>
    %135 = tpu.concatenate %128, %129, %130, %131, %132, %133, %134 in 1 : vector<4x22xbf16>, vector<4x22xbf16>, vector<4x22xbf16>, vector<4x22xbf16>, vector<4x22xbf16>, vector<4x22xbf16>, vector<4x22xbf16> -> vector<4x154xbf16>
    %136 = arith.truncf %120 : vector<154x33xf32> to vector<154x33xbf16>
    %cst_26 = arith.constant dense<0.000000e+00> : vector<4x33xf32>
    %137 = tpu.matmul %135, %136, %cst_26 {dimension_numbers = #tpu.dot_dimension_numbers<[1], [0], [0], [1], [0, 0, 1, 1], [], []>} : vector<4x154xbf16>, vector<154x33xbf16>, vector<4x33xf32> -> vector<4x33xf32>
    %138 = vector.broadcast %122 : vector<1x33xf32> to vector<4x33xf32>
    %139 = arith.addf %137, %138 : vector<4x33xf32>
    %cst_27 = arith.constant 0.000000e+00 : f32
    %140 = vector.broadcast %cst_27 : f32 to vector<4x33xf32>
    %141 = arith.maximumf %139, %140 : vector<4x33xf32>
    %142 = vector.broadcast %123 : vector<1x33xf32> to vector<4x33xf32>
    %143 = arith.mulf %141, %142 : vector<4x33xf32>
    %144 = vector.broadcast %124 : vector<1x33xf32> to vector<4x33xf32>
    %145 = arith.addf %143, %144 : vector<4x33xf32>
    %146 = vector.extract_strided_slice %119 {offsets = [3, 0], sizes = [1, 33], strides = [1, 1]} : vector<6x33xf32> to vector<1x33xf32>
    %147 = vector.extract_strided_slice %119 {offsets = [4, 0], sizes = [1, 33], strides = [1, 1]} : vector<6x33xf32> to vector<1x33xf32>
    %148 = vector.extract_strided_slice %119 {offsets = [5, 0], sizes = [1, 33], strides = [1, 1]} : vector<6x33xf32> to vector<1x33xf32>
    %149 = arith.truncf %145 : vector<4x33xf32> to vector<4x33xbf16>
    %cst_28 = arith.constant 0.000000e+00 : bf16
    %150 = vector.broadcast %cst_28 : bf16 to vector<3x33xbf16>
    %151 = tpu.concatenate %150, %149, %150 in 0 : vector<3x33xbf16>, vector<4x33xbf16>, vector<3x33xbf16> -> vector<10x33xbf16>
    %152 = vector.extract_strided_slice %151 {offsets = [0, 0], sizes = [4, 33], strides = [1, 1]} : vector<10x33xbf16> to vector<4x33xbf16>
    %153 = vector.extract_strided_slice %151 {offsets = [1, 0], sizes = [4, 33], strides = [1, 1]} : vector<10x33xbf16> to vector<4x33xbf16>
    %154 = vector.extract_strided_slice %151 {offsets = [2, 0], sizes = [4, 33], strides = [1, 1]} : vector<10x33xbf16> to vector<4x33xbf16>
    %155 = vector.extract_strided_slice %151 {offsets = [3, 0], sizes = [4, 33], strides = [1, 1]} : vector<10x33xbf16> to vector<4x33xbf16>
    %156 = vector.extract_strided_slice %151 {offsets = [4, 0], sizes = [4, 33], strides = [1, 1]} : vector<10x33xbf16> to vector<4x33xbf16>
    %157 = vector.extract_strided_slice %151 {offsets = [5, 0], sizes = [4, 33], strides = [1, 1]} : vector<10x33xbf16> to vector<4x33xbf16>
    %158 = vector.extract_strided_slice %151 {offsets = [6, 0], sizes = [4, 33], strides = [1, 1]} : vector<10x33xbf16> to vector<4x33xbf16>
    %159 = tpu.concatenate %152, %153, %154, %155, %156, %157, %158 in 1 : vector<4x33xbf16>, vector<4x33xbf16>, vector<4x33xbf16>, vector<4x33xbf16>, vector<4x33xbf16>, vector<4x33xbf16>, vector<4x33xbf16> -> vector<4x231xbf16>
    %160 = arith.truncf %121 : vector<231x33xf32> to vector<231x33xbf16>
    %cst_29 = arith.constant dense<0.000000e+00> : vector<4x33xf32>
    %161 = tpu.matmul %159, %160, %cst_29 {dimension_numbers = #tpu.dot_dimension_numbers<[1], [0], [0], [1], [0, 0, 1, 1], [], []>} : vector<4x231xbf16>, vector<231x33xbf16>, vector<4x33xf32> -> vector<4x33xf32>
    %162 = vector.broadcast %146 : vector<1x33xf32> to vector<4x33xf32>
    %163 = arith.addf %161, %162 : vector<4x33xf32>
    %cst_30 = arith.constant 0.000000e+00 : f32
    %164 = vector.broadcast %cst_30 : f32 to vector<4x33xf32>
    %165 = arith.maximumf %163, %164 : vector<4x33xf32>
    %166 = vector.broadcast %147 : vector<1x33xf32> to vector<4x33xf32>
    %167 = arith.mulf %165, %166 : vector<4x33xf32>
    %168 = vector.broadcast %148 : vector<1x33xf32> to vector<4x33xf32>
    %169 = arith.addf %167, %168 : vector<4x33xf32>
    %c0_31 = arith.constant 0 : index
    %c0_32 = arith.constant 0 : index
    %170 = vector.load %arg11[%c0_31, %c0_32] : memref<528x22xf32, #tpu.memory_space<vmem>>, vector<528x22xf32>
    %c0_33 = arith.constant 0 : index
    %c0_34 = arith.constant 0 : index
    %171 = vector.load %arg10[%c0_33, %c0_34] : memref<7x22xf32, #tpu.memory_space<vmem>>, vector<7x22xf32>
    %172 = vector.extract_strided_slice %170 {offsets = [0, 0], sizes = [33, 22], strides = [1, 1]} : vector<528x22xf32> to vector<33x22xf32>
    %173 = vector.extract_strided_slice %170 {offsets = [33, 0], sizes = [33, 22], strides = [1, 1]} : vector<528x22xf32> to vector<33x22xf32>
    %174 = vector.extract_strided_slice %170 {offsets = [66, 0], sizes = [154, 22], strides = [1, 1]} : vector<528x22xf32> to vector<154x22xf32>
    %175 = vector.extract_strided_slice %170 {offsets = [220, 0], sizes = [154, 22], strides = [1, 1]} : vector<528x22xf32> to vector<154x22xf32>
    %176 = vector.extract_strided_slice %170 {offsets = [374, 0], sizes = [154, 22], strides = [1, 1]} : vector<528x22xf32> to vector<154x22xf32>
    %177 = vector.extract_strided_slice %171 {offsets = [0, 0], sizes = [1, 22], strides = [1, 1]} : vector<7x22xf32> to vector<1x22xf32>
    %178 = vector.extract_strided_slice %171 {offsets = [1, 0], sizes = [1, 22], strides = [1, 1]} : vector<7x22xf32> to vector<1x22xf32>
    %179 = vector.extract_strided_slice %171 {offsets = [2, 0], sizes = [1, 22], strides = [1, 1]} : vector<7x22xf32> to vector<1x22xf32>
    %180 = vector.extract_strided_slice %171 {offsets = [3, 0], sizes = [1, 22], strides = [1, 1]} : vector<7x22xf32> to vector<1x22xf32>
    %181 = vector.extract_strided_slice %171 {offsets = [4, 0], sizes = [1, 22], strides = [1, 1]} : vector<7x22xf32> to vector<1x22xf32>
    %182 = vector.extract_strided_slice %171 {offsets = [5, 0], sizes = [1, 22], strides = [1, 1]} : vector<7x22xf32> to vector<1x22xf32>
    %183 = vector.extract_strided_slice %171 {offsets = [6, 0], sizes = [1, 22], strides = [1, 1]} : vector<7x22xf32> to vector<1x22xf32>
    %184 = arith.truncf %169 : vector<4x33xf32> to vector<4x33xbf16>
    %185 = arith.truncf %172 : vector<33x22xf32> to vector<33x22xbf16>
    %cst_35 = arith.constant dense<0.000000e+00> : vector<4x22xf32>
    %186 = tpu.matmul %184, %185, %cst_35 {dimension_numbers = #tpu.dot_dimension_numbers<[1], [0], [0], [1], [0, 0, 1, 1], [], []>} : vector<4x33xbf16>, vector<33x22xbf16>, vector<4x22xf32> -> vector<4x22xf32>
    %187 = arith.truncf %173 : vector<33x22xf32> to vector<33x22xbf16>
    %cst_36 = arith.constant dense<0.000000e+00> : vector<4x22xf32>
    %188 = tpu.matmul %184, %187, %cst_36 {dimension_numbers = #tpu.dot_dimension_numbers<[1], [0], [0], [1], [0, 0, 1, 1], [], []>} : vector<4x33xbf16>, vector<33x22xbf16>, vector<4x22xf32> -> vector<4x22xf32>
    %189 = vector.shape_cast %186 : vector<4x22xf32> to vector<4x1x22xf32>
    %190 = vector.shape_cast %188 : vector<4x22xf32> to vector<4x1x22xf32>
    %191 = tpu.concatenate %189, %190 in 1 : vector<4x1x22xf32>, vector<4x1x22xf32> -> vector<4x2x22xf32>
    %192 = vector.shape_cast %191 : vector<4x2x22xf32> to vector<8x22xf32>
    %193 = vector.broadcast %177 : vector<1x22xf32> to vector<8x22xf32>
    %194 = arith.addf %192, %193 : vector<8x22xf32>
    %195 = arith.truncf %194 : vector<8x22xf32> to vector<8x22xbf16>
    %cst_37 = arith.constant 0.000000e+00 : bf16
    %196 = vector.broadcast %cst_37 : bf16 to vector<3x22xbf16>
    %197 = tpu.concatenate %196, %195, %196 in 0 : vector<3x22xbf16>, vector<8x22xbf16>, vector<3x22xbf16> -> vector<14x22xbf16>
    %198 = vector.extract_strided_slice %197 {offsets = [0, 0], sizes = [8, 22], strides = [1, 1]} : vector<14x22xbf16> to vector<8x22xbf16>
    %199 = vector.extract_strided_slice %197 {offsets = [1, 0], sizes = [8, 22], strides = [1, 1]} : vector<14x22xbf16> to vector<8x22xbf16>
    %200 = vector.extract_strided_slice %197 {offsets = [2, 0], sizes = [8, 22], strides = [1, 1]} : vector<14x22xbf16> to vector<8x22xbf16>
    %201 = vector.extract_strided_slice %197 {offsets = [3, 0], sizes = [8, 22], strides = [1, 1]} : vector<14x22xbf16> to vector<8x22xbf16>
    %202 = vector.extract_strided_slice %197 {offsets = [4, 0], sizes = [8, 22], strides = [1, 1]} : vector<14x22xbf16> to vector<8x22xbf16>
    %203 = vector.extract_strided_slice %197 {offsets = [5, 0], sizes = [8, 22], strides = [1, 1]} : vector<14x22xbf16> to vector<8x22xbf16>
    %204 = vector.extract_strided_slice %197 {offsets = [6, 0], sizes = [8, 22], strides = [1, 1]} : vector<14x22xbf16> to vector<8x22xbf16>
    %205 = tpu.concatenate %198, %199, %200, %201, %202, %203, %204 in 1 : vector<8x22xbf16>, vector<8x22xbf16>, vector<8x22xbf16>, vector<8x22xbf16>, vector<8x22xbf16>, vector<8x22xbf16>, vector<8x22xbf16> -> vector<8x154xbf16>
    %206 = arith.truncf %111 : vector<8x22xf32> to vector<8x22xbf16>
    %cst_38 = arith.constant 0.000000e+00 : bf16
    %207 = vector.broadcast %cst_38 : bf16 to vector<3x22xbf16>
    %208 = tpu.concatenate %207, %206, %207 in 0 : vector<3x22xbf16>, vector<8x22xbf16>, vector<3x22xbf16> -> vector<14x22xbf16>
    %209 = vector.extract_strided_slice %208 {offsets = [0, 0], sizes = [8, 22], strides = [1, 1]} : vector<14x22xbf16> to vector<8x22xbf16>
    %210 = vector.extract_strided_slice %208 {offsets = [1, 0], sizes = [8, 22], strides = [1, 1]} : vector<14x22xbf16> to vector<8x22xbf16>
    %211 = vector.extract_strided_slice %208 {offsets = [2, 0], sizes = [8, 22], strides = [1, 1]} : vector<14x22xbf16> to vector<8x22xbf16>
    %212 = vector.extract_strided_slice %208 {offsets = [3, 0], sizes = [8, 22], strides = [1, 1]} : vector<14x22xbf16> to vector<8x22xbf16>
    %213 = vector.extract_strided_slice %208 {offsets = [4, 0], sizes = [8, 22], strides = [1, 1]} : vector<14x22xbf16> to vector<8x22xbf16>
    %214 = vector.extract_strided_slice %208 {offsets = [5, 0], sizes = [8, 22], strides = [1, 1]} : vector<14x22xbf16> to vector<8x22xbf16>
    %215 = vector.extract_strided_slice %208 {offsets = [6, 0], sizes = [8, 22], strides = [1, 1]} : vector<14x22xbf16> to vector<8x22xbf16>
    %216 = tpu.concatenate %209, %210, %211, %212, %213, %214, %215 in 1 : vector<8x22xbf16>, vector<8x22xbf16>, vector<8x22xbf16>, vector<8x22xbf16>, vector<8x22xbf16>, vector<8x22xbf16>, vector<8x22xbf16> -> vector<8x154xbf16>
    %217 = arith.truncf %174 : vector<154x22xf32> to vector<154x22xbf16>
    %cst_39 = arith.constant dense<0.000000e+00> : vector<8x22xf32>
    %218 = tpu.matmul %205, %217, %cst_39 {dimension_numbers = #tpu.dot_dimension_numbers<[1], [0], [0], [1], [0, 0, 1, 1], [], []>} : vector<8x154xbf16>, vector<154x22xbf16>, vector<8x22xf32> -> vector<8x22xf32>
    %219 = arith.truncf %175 : vector<154x22xf32> to vector<154x22xbf16>
    %cst_40 = arith.constant dense<0.000000e+00> : vector<8x22xf32>
    %220 = tpu.matmul %216, %219, %cst_40 {dimension_numbers = #tpu.dot_dimension_numbers<[1], [0], [0], [1], [0, 0, 1, 1], [], []>} : vector<8x154xbf16>, vector<154x22xbf16>, vector<8x22xf32> -> vector<8x22xf32>
    %221 = arith.addf %218, %220 : vector<8x22xf32>
    %222 = vector.broadcast %178 : vector<1x22xf32> to vector<8x22xf32>
    %223 = arith.addf %221, %222 : vector<8x22xf32>
    %cst_41 = arith.constant 0.000000e+00 : f32
    %224 = vector.broadcast %cst_41 : f32 to vector<8x22xf32>
    %225 = arith.maximumf %223, %224 : vector<8x22xf32>
    %226 = vector.broadcast %179 : vector<1x22xf32> to vector<8x22xf32>
    %227 = arith.mulf %225, %226 : vector<8x22xf32>
    %228 = vector.broadcast %180 : vector<1x22xf32> to vector<8x22xf32>
    %229 = arith.addf %227, %228 : vector<8x22xf32>
    %230 = arith.truncf %229 : vector<8x22xf32> to vector<8x22xbf16>
    %cst_42 = arith.constant 0.000000e+00 : bf16
    %231 = vector.broadcast %cst_42 : bf16 to vector<3x22xbf16>
    %232 = tpu.concatenate %231, %230, %231 in 0 : vector<3x22xbf16>, vector<8x22xbf16>, vector<3x22xbf16> -> vector<14x22xbf16>
    %233 = vector.extract_strided_slice %232 {offsets = [0, 0], sizes = [8, 22], strides = [1, 1]} : vector<14x22xbf16> to vector<8x22xbf16>
    %234 = vector.extract_strided_slice %232 {offsets = [1, 0], sizes = [8, 22], strides = [1, 1]} : vector<14x22xbf16> to vector<8x22xbf16>
    %235 = vector.extract_strided_slice %232 {offsets = [2, 0], sizes = [8, 22], strides = [1, 1]} : vector<14x22xbf16> to vector<8x22xbf16>
    %236 = vector.extract_strided_slice %232 {offsets = [3, 0], sizes = [8, 22], strides = [1, 1]} : vector<14x22xbf16> to vector<8x22xbf16>
    %237 = vector.extract_strided_slice %232 {offsets = [4, 0], sizes = [8, 22], strides = [1, 1]} : vector<14x22xbf16> to vector<8x22xbf16>
    %238 = vector.extract_strided_slice %232 {offsets = [5, 0], sizes = [8, 22], strides = [1, 1]} : vector<14x22xbf16> to vector<8x22xbf16>
    %239 = vector.extract_strided_slice %232 {offsets = [6, 0], sizes = [8, 22], strides = [1, 1]} : vector<14x22xbf16> to vector<8x22xbf16>
    %240 = tpu.concatenate %233, %234, %235, %236, %237, %238, %239 in 1 : vector<8x22xbf16>, vector<8x22xbf16>, vector<8x22xbf16>, vector<8x22xbf16>, vector<8x22xbf16>, vector<8x22xbf16>, vector<8x22xbf16> -> vector<8x154xbf16>
    %241 = arith.truncf %176 : vector<154x22xf32> to vector<154x22xbf16>
    %cst_43 = arith.constant dense<0.000000e+00> : vector<8x22xf32>
    %242 = tpu.matmul %240, %241, %cst_43 {dimension_numbers = #tpu.dot_dimension_numbers<[1], [0], [0], [1], [0, 0, 1, 1], [], []>} : vector<8x154xbf16>, vector<154x22xbf16>, vector<8x22xf32> -> vector<8x22xf32>
    %243 = vector.broadcast %181 : vector<1x22xf32> to vector<8x22xf32>
    %244 = arith.addf %242, %243 : vector<8x22xf32>
    %cst_44 = arith.constant 0.000000e+00 : f32
    %245 = vector.broadcast %cst_44 : f32 to vector<8x22xf32>
    %246 = arith.maximumf %244, %245 : vector<8x22xf32>
    %247 = vector.broadcast %182 : vector<1x22xf32> to vector<8x22xf32>
    %248 = arith.mulf %246, %247 : vector<8x22xf32>
    %249 = vector.broadcast %183 : vector<1x22xf32> to vector<8x22xf32>
    %250 = arith.addf %248, %249 : vector<8x22xf32>
    %c0_45 = arith.constant 0 : index
    %c0_46 = arith.constant 0 : index
    %251 = vector.load %arg13[%c0_45, %c0_46] : memref<359x15xf32, #tpu.memory_space<vmem>>, vector<359x15xf32>
    %c0_47 = arith.constant 0 : index
    %c0_48 = arith.constant 0 : index
    %252 = vector.load %arg12[%c0_47, %c0_48] : memref<7x15xf32, #tpu.memory_space<vmem>>, vector<7x15xf32>
    %253 = vector.extract_strided_slice %251 {offsets = [0, 0], sizes = [22, 15], strides = [1, 1]} : vector<359x15xf32> to vector<22x15xf32>
    %254 = vector.extract_strided_slice %251 {offsets = [22, 0], sizes = [22, 15], strides = [1, 1]} : vector<359x15xf32> to vector<22x15xf32>
    %255 = vector.extract_strided_slice %251 {offsets = [44, 0], sizes = [105, 15], strides = [1, 1]} : vector<359x15xf32> to vector<105x15xf32>
    %256 = vector.extract_strided_slice %251 {offsets = [149, 0], sizes = [105, 15], strides = [1, 1]} : vector<359x15xf32> to vector<105x15xf32>
    %257 = vector.extract_strided_slice %251 {offsets = [254, 0], sizes = [105, 15], strides = [1, 1]} : vector<359x15xf32> to vector<105x15xf32>
    %258 = vector.extract_strided_slice %252 {offsets = [0, 0], sizes = [1, 15], strides = [1, 1]} : vector<7x15xf32> to vector<1x15xf32>
    %259 = vector.extract_strided_slice %252 {offsets = [1, 0], sizes = [1, 15], strides = [1, 1]} : vector<7x15xf32> to vector<1x15xf32>
    %260 = vector.extract_strided_slice %252 {offsets = [2, 0], sizes = [1, 15], strides = [1, 1]} : vector<7x15xf32> to vector<1x15xf32>
    %261 = vector.extract_strided_slice %252 {offsets = [3, 0], sizes = [1, 15], strides = [1, 1]} : vector<7x15xf32> to vector<1x15xf32>
    %262 = vector.extract_strided_slice %252 {offsets = [4, 0], sizes = [1, 15], strides = [1, 1]} : vector<7x15xf32> to vector<1x15xf32>
    %263 = vector.extract_strided_slice %252 {offsets = [5, 0], sizes = [1, 15], strides = [1, 1]} : vector<7x15xf32> to vector<1x15xf32>
    %264 = vector.extract_strided_slice %252 {offsets = [6, 0], sizes = [1, 15], strides = [1, 1]} : vector<7x15xf32> to vector<1x15xf32>
    %265 = arith.truncf %250 : vector<8x22xf32> to vector<8x22xbf16>
    %266 = arith.truncf %253 : vector<22x15xf32> to vector<22x15xbf16>
    %cst_49 = arith.constant dense<0.000000e+00> : vector<8x15xf32>
    %267 = tpu.matmul %265, %266, %cst_49 {dimension_numbers = #tpu.dot_dimension_numbers<[1], [0], [0], [1], [0, 0, 1, 1], [], []>} : vector<8x22xbf16>, vector<22x15xbf16>, vector<8x15xf32> -> vector<8x15xf32>
    %268 = arith.truncf %254 : vector<22x15xf32> to vector<22x15xbf16>
    %cst_50 = arith.constant dense<0.000000e+00> : vector<8x15xf32>
    %269 = tpu.matmul %265, %268, %cst_50 {dimension_numbers = #tpu.dot_dimension_numbers<[1], [0], [0], [1], [0, 0, 1, 1], [], []>} : vector<8x22xbf16>, vector<22x15xbf16>, vector<8x15xf32> -> vector<8x15xf32>
    %270 = vector.shape_cast %267 : vector<8x15xf32> to vector<8x1x15xf32>
    %271 = vector.shape_cast %269 : vector<8x15xf32> to vector<8x1x15xf32>
    %272 = tpu.concatenate %270, %271 in 1 : vector<8x1x15xf32>, vector<8x1x15xf32> -> vector<8x2x15xf32>
    %273 = vector.shape_cast %272 : vector<8x2x15xf32> to vector<16x15xf32>
    %274 = vector.broadcast %258 : vector<1x15xf32> to vector<16x15xf32>
    %275 = arith.addf %273, %274 : vector<16x15xf32>
    %276 = arith.truncf %275 : vector<16x15xf32> to vector<16x15xbf16>
    %cst_51 = arith.constant 0.000000e+00 : bf16
    %277 = vector.broadcast %cst_51 : bf16 to vector<3x15xbf16>
    %278 = tpu.concatenate %277, %276, %277 in 0 : vector<3x15xbf16>, vector<16x15xbf16>, vector<3x15xbf16> -> vector<22x15xbf16>
    %279 = vector.extract_strided_slice %278 {offsets = [0, 0], sizes = [16, 15], strides = [1, 1]} : vector<22x15xbf16> to vector<16x15xbf16>
    %280 = vector.extract_strided_slice %278 {offsets = [1, 0], sizes = [16, 15], strides = [1, 1]} : vector<22x15xbf16> to vector<16x15xbf16>
    %281 = vector.extract_strided_slice %278 {offsets = [2, 0], sizes = [16, 15], strides = [1, 1]} : vector<22x15xbf16> to vector<16x15xbf16>
    %282 = vector.extract_strided_slice %278 {offsets = [3, 0], sizes = [16, 15], strides = [1, 1]} : vector<22x15xbf16> to vector<16x15xbf16>
    %283 = vector.extract_strided_slice %278 {offsets = [4, 0], sizes = [16, 15], strides = [1, 1]} : vector<22x15xbf16> to vector<16x15xbf16>
    %284 = vector.extract_strided_slice %278 {offsets = [5, 0], sizes = [16, 15], strides = [1, 1]} : vector<22x15xbf16> to vector<16x15xbf16>
    %285 = vector.extract_strided_slice %278 {offsets = [6, 0], sizes = [16, 15], strides = [1, 1]} : vector<22x15xbf16> to vector<16x15xbf16>
    %286 = tpu.concatenate %279, %280, %281, %282, %283, %284, %285 in 1 : vector<16x15xbf16>, vector<16x15xbf16>, vector<16x15xbf16>, vector<16x15xbf16>, vector<16x15xbf16>, vector<16x15xbf16>, vector<16x15xbf16> -> vector<16x105xbf16>
    %287 = arith.truncf %53 : vector<16x15xf32> to vector<16x15xbf16>
    %cst_52 = arith.constant 0.000000e+00 : bf16
    %288 = vector.broadcast %cst_52 : bf16 to vector<3x15xbf16>
    %289 = tpu.concatenate %288, %287, %288 in 0 : vector<3x15xbf16>, vector<16x15xbf16>, vector<3x15xbf16> -> vector<22x15xbf16>
    %290 = vector.extract_strided_slice %289 {offsets = [0, 0], sizes = [16, 15], strides = [1, 1]} : vector<22x15xbf16> to vector<16x15xbf16>
    %291 = vector.extract_strided_slice %289 {offsets = [1, 0], sizes = [16, 15], strides = [1, 1]} : vector<22x15xbf16> to vector<16x15xbf16>
    %292 = vector.extract_strided_slice %289 {offsets = [2, 0], sizes = [16, 15], strides = [1, 1]} : vector<22x15xbf16> to vector<16x15xbf16>
    %293 = vector.extract_strided_slice %289 {offsets = [3, 0], sizes = [16, 15], strides = [1, 1]} : vector<22x15xbf16> to vector<16x15xbf16>
    %294 = vector.extract_strided_slice %289 {offsets = [4, 0], sizes = [16, 15], strides = [1, 1]} : vector<22x15xbf16> to vector<16x15xbf16>
    %295 = vector.extract_strided_slice %289 {offsets = [5, 0], sizes = [16, 15], strides = [1, 1]} : vector<22x15xbf16> to vector<16x15xbf16>
    %296 = vector.extract_strided_slice %289 {offsets = [6, 0], sizes = [16, 15], strides = [1, 1]} : vector<22x15xbf16> to vector<16x15xbf16>
    %297 = tpu.concatenate %290, %291, %292, %293, %294, %295, %296 in 1 : vector<16x15xbf16>, vector<16x15xbf16>, vector<16x15xbf16>, vector<16x15xbf16>, vector<16x15xbf16>, vector<16x15xbf16>, vector<16x15xbf16> -> vector<16x105xbf16>
    %298 = arith.truncf %255 : vector<105x15xf32> to vector<105x15xbf16>
    %cst_53 = arith.constant dense<0.000000e+00> : vector<16x15xf32>
    %299 = tpu.matmul %286, %298, %cst_53 {dimension_numbers = #tpu.dot_dimension_numbers<[1], [0], [0], [1], [0, 0, 1, 1], [], []>} : vector<16x105xbf16>, vector<105x15xbf16>, vector<16x15xf32> -> vector<16x15xf32>
    %300 = arith.truncf %256 : vector<105x15xf32> to vector<105x15xbf16>
    %cst_54 = arith.constant dense<0.000000e+00> : vector<16x15xf32>
    %301 = tpu.matmul %297, %300, %cst_54 {dimension_numbers = #tpu.dot_dimension_numbers<[1], [0], [0], [1], [0, 0, 1, 1], [], []>} : vector<16x105xbf16>, vector<105x15xbf16>, vector<16x15xf32> -> vector<16x15xf32>
    %302 = arith.addf %299, %301 : vector<16x15xf32>
    %303 = vector.broadcast %259 : vector<1x15xf32> to vector<16x15xf32>
    %304 = arith.addf %302, %303 : vector<16x15xf32>
    %cst_55 = arith.constant 0.000000e+00 : f32
    %305 = vector.broadcast %cst_55 : f32 to vector<16x15xf32>
    %306 = arith.maximumf %304, %305 : vector<16x15xf32>
    %307 = vector.broadcast %260 : vector<1x15xf32> to vector<16x15xf32>
    %308 = arith.mulf %306, %307 : vector<16x15xf32>
    %309 = vector.broadcast %261 : vector<1x15xf32> to vector<16x15xf32>
    %310 = arith.addf %308, %309 : vector<16x15xf32>
    %311 = arith.truncf %310 : vector<16x15xf32> to vector<16x15xbf16>
    %cst_56 = arith.constant 0.000000e+00 : bf16
    %312 = vector.broadcast %cst_56 : bf16 to vector<3x15xbf16>
    %313 = tpu.concatenate %312, %311, %312 in 0 : vector<3x15xbf16>, vector<16x15xbf16>, vector<3x15xbf16> -> vector<22x15xbf16>
    %314 = vector.extract_strided_slice %313 {offsets = [0, 0], sizes = [16, 15], strides = [1, 1]} : vector<22x15xbf16> to vector<16x15xbf16>
    %315 = vector.extract_strided_slice %313 {offsets = [1, 0], sizes = [16, 15], strides = [1, 1]} : vector<22x15xbf16> to vector<16x15xbf16>
    %316 = vector.extract_strided_slice %313 {offsets = [2, 0], sizes = [16, 15], strides = [1, 1]} : vector<22x15xbf16> to vector<16x15xbf16>
    %317 = vector.extract_strided_slice %313 {offsets = [3, 0], sizes = [16, 15], strides = [1, 1]} : vector<22x15xbf16> to vector<16x15xbf16>
    %318 = vector.extract_strided_slice %313 {offsets = [4, 0], sizes = [16, 15], strides = [1, 1]} : vector<22x15xbf16> to vector<16x15xbf16>
    %319 = vector.extract_strided_slice %313 {offsets = [5, 0], sizes = [16, 15], strides = [1, 1]} : vector<22x15xbf16> to vector<16x15xbf16>
    %320 = vector.extract_strided_slice %313 {offsets = [6, 0], sizes = [16, 15], strides = [1, 1]} : vector<22x15xbf16> to vector<16x15xbf16>
    %321 = tpu.concatenate %314, %315, %316, %317, %318, %319, %320 in 1 : vector<16x15xbf16>, vector<16x15xbf16>, vector<16x15xbf16>, vector<16x15xbf16>, vector<16x15xbf16>, vector<16x15xbf16>, vector<16x15xbf16> -> vector<16x105xbf16>
    %322 = arith.truncf %257 : vector<105x15xf32> to vector<105x15xbf16>
    %cst_57 = arith.constant dense<0.000000e+00> : vector<16x15xf32>
    %323 = tpu.matmul %321, %322, %cst_57 {dimension_numbers = #tpu.dot_dimension_numbers<[1], [0], [0], [1], [0, 0, 1, 1], [], []>} : vector<16x105xbf16>, vector<105x15xbf16>, vector<16x15xf32> -> vector<16x15xf32>
    %324 = vector.broadcast %262 : vector<1x15xf32> to vector<16x15xf32>
    %325 = arith.addf %323, %324 : vector<16x15xf32>
    %cst_58 = arith.constant 0.000000e+00 : f32
    %326 = vector.broadcast %cst_58 : f32 to vector<16x15xf32>
    %327 = arith.maximumf %325, %326 : vector<16x15xf32>
    %328 = vector.broadcast %263 : vector<1x15xf32> to vector<16x15xf32>
    %329 = arith.mulf %327, %328 : vector<16x15xf32>
    %330 = vector.broadcast %264 : vector<1x15xf32> to vector<16x15xf32>
    %331 = arith.addf %329, %330 : vector<16x15xf32>
    %c0_59 = arith.constant 0 : index
    %c0_60 = arith.constant 0 : index
    %332 = vector.load %arg3[%c0_59, %c0_60] : memref<1x15xf32, #tpu.memory_space<vmem>>, vector<1x15xf32>
    %c0_61 = arith.constant 0 : index
    %c0_62 = arith.constant 0 : index
    %333 = vector.load %arg2[%c0_61, %c0_62] : memref<1x1xf32, #tpu.memory_space<vmem>>, vector<1x1xf32>
    %334 = vector.shape_cast %331 : vector<16x15xf32> to vector<1x16x15xf32>
    %335 = vector.shape_cast %332 : vector<1x15xf32> to vector<1x1x15xf32>
    %336 = vector.broadcast %335 : vector<1x1x15xf32> to vector<1x16x15xf32>
    %337 = arith.mulf %334, %336 : vector<1x16x15xf32>
    %cst_63 = arith.constant dense<0.000000e+00> : vector<1x16xf32>
    %338 = vector.multi_reduction <add>, %337, %cst_63 [2] : vector<1x16x15xf32> to vector<1x16xf32>
    %339 = vector.broadcast %333 : vector<1x1xf32> to vector<1x16xf32>
    %340 = arith.addf %338, %339 : vector<1x16xf32>
    %c0_64 = arith.constant 0 : index
    %c0_65 = arith.constant 0 : index
    %c0_66 = arith.constant 0 : index
    %341 = vector.load %arg14[%c0_64, %c0_65, %c0_66] : memref<1x1x16xf32, #tpu.memory_space<vmem>>, vector<1x1x16xf32>
    %342 = vector.shape_cast %341 : vector<1x1x16xf32> to vector<1x16xf32>
    %343 = vector.shape_cast %340 : vector<1x16xf32> to vector<1x1x16xf32>
    tpu.vector_store %arg14[%c0_64, %c0_65, %c0_66], %343 {strides = array<i32>} : memref<1x1x16xf32, #tpu.memory_space<vmem>>, vector<1x1x16xf32>,
    return
  }
  func.func @transform_0(%arg0: i32) -> (i32, i32, i32) {
    %c0_i32 = arith.constant 0 : i32
    %c0_i32_0 = arith.constant 0 : i32
    %c0_i32_1 = arith.constant 0 : i32
    return %arg0, %c0_i32, %c0_i32_0 : i32, i32, i32
  }
  func.func @transform_1(%arg0: i32) -> (i32, i32) {
    %c0_i32 = arith.constant 0 : i32
    %c0_i32_0 = arith.constant 0 : i32
    %c0_i32_1 = arith.constant 0 : i32
    return %c0_i32, %c0_i32_0 : i32, i32
  }
  func.func @transform_2(%arg0: i32) -> (i32, i32) {
    %c0_i32 = arith.constant 0 : i32
    %c0_i32_0 = arith.constant 0 : i32
    %c0_i32_1 = arith.constant 0 : i32
    return %c0_i32, %c0_i32_0 : i32, i32
  }
  func.func @transform_3(%arg0: i32) -> (i32, i32) {
    %c0_i32 = arith.constant 0 : i32
    %c0_i32_0 = arith.constant 0 : i32
    %c0_i32_1 = arith.constant 0 : i32
    return %c0_i32, %c0_i32_0 : i32, i32
  }
  func.func @transform_4(%arg0: i32) -> (i32, i32) {
    %c0_i32 = arith.constant 0 : i32
    %c0_i32_0 = arith.constant 0 : i32
    %c0_i32_1 = arith.constant 0 : i32
    return %c0_i32, %c0_i32_0 : i32, i32
  }
  func.func @transform_5(%arg0: i32) -> (i32, i32) {
    %c0_i32 = arith.constant 0 : i32
    %c0_i32_0 = arith.constant 0 : i32
    %c0_i32_1 = arith.constant 0 : i32
    return %c0_i32, %c0_i32_0 : i32, i32
  }
  func.func @transform_6(%arg0: i32) -> (i32, i32) {
    %c0_i32 = arith.constant 0 : i32
    %c0_i32_0 = arith.constant 0 : i32
    %c0_i32_1 = arith.constant 0 : i32
    return %c0_i32, %c0_i32_0 : i32, i32
  }
  func.func @transform_7(%arg0: i32) -> (i32, i32) {
    %c0_i32 = arith.constant 0 : i32
    %c0_i32_0 = arith.constant 0 : i32
    %c0_i32_1 = arith.constant 0 : i32
    return %c0_i32, %c0_i32_0 : i32, i32
  }
  func.func @transform_8(%arg0: i32) -> (i32, i32) {
    %c0_i32 = arith.constant 0 : i32
    %c0_i32_0 = arith.constant 0 : i32
    %c0_i32_1 = arith.constant 0 : i32
    return %c0_i32, %c0_i32_0 : i32, i32
  }
  func.func @transform_9(%arg0: i32) -> (i32, i32) {
    %c0_i32 = arith.constant 0 : i32
    %c0_i32_0 = arith.constant 0 : i32
    %c0_i32_1 = arith.constant 0 : i32
    return %c0_i32, %c0_i32_0 : i32, i32
  }
  func.func @transform_10(%arg0: i32) -> (i32, i32) {
    %c0_i32 = arith.constant 0 : i32
    %c0_i32_0 = arith.constant 0 : i32
    %c0_i32_1 = arith.constant 0 : i32
    return %c0_i32, %c0_i32_0 : i32, i32
  }
  func.func @transform_11(%arg0: i32) -> (i32, i32) {
    %c0_i32 = arith.constant 0 : i32
    %c0_i32_0 = arith.constant 0 : i32
    %c0_i32_1 = arith.constant 0 : i32
    return %c0_i32, %c0_i32_0 : i32, i32
  }
  func.func @transform_12(%arg0: i32) -> (i32, i32) {
    %c0_i32 = arith.constant 0 : i32
    %c0_i32_0 = arith.constant 0 : i32
    %c0_i32_1 = arith.constant 0 : i32
    return %c0_i32, %c0_i32_0 : i32, i32
  }
  func.func @transform_13(%arg0: i32) -> (i32, i32, i32) {
    %c0_i32 = arith.constant 0 : i32
    %c0_i32_0 = arith.constant 0 : i32
    %c0_i32_1 = arith.constant 0 : i32
    return %arg0, %c0_i32, %c0_i32_0 : i32, i32, i32
  }
}

</mosaic_0001>

<bundles_post_ra>
// kernel: leopard_unet_forward.1
= control target key start
LH: loop header
LB: loop body
LE: loop exit
PB: predicated region body
PF: predicated region fallthrough
CT: control target
= control target key end

     0   :  { %s5526_s0 = inlined_call_operand.vmem [shape: f32[2,16,5], index: 0, kind: input, shape index: {}]   ;;  %s5527_s1 = inlined_call_operand.<no memory space> [shape: f32[1,1], index: 1, kind: input, shape index: {}]   ;;  %s5528_s2 = inlined_call_operand.vmem [shape: f32[1,15], index: 2, kind: input, shape index: {}]   ;;  %s5529_s3 = inlined_call_operand.vmem [shape: f32[6,22], index: 3, kind: input, shape index: {}]   ;;  %s5530_s4 = inlined_call_operand.vmem [shape: f32[259,22], index: 4, kind: input, shape index: {}]   ;;  %s5531_s5 = inlined_call_operand.vmem [shape: f32[6,33], index: 5, kind: input, shape index: {}]   ;;  %s5532_s6 = inlined_call_operand.vmem [shape: f32[385,33], index: 6, kind: input, shape index: {}]   ;;  %s5533_s7 = inlined_call_operand.vmem [shape: f32[6,15], index: 7, kind: input, shape index: {}]   ;;  %s5534_s8 = inlined_call_operand.vmem [shape: f32[140,15], index: 8, kind: input, shape index: {}]   ;;  %s5535_s9 = inlined_call_operand.vmem [shape: f32[7,22], index: 9, kind: input, shape index: {}]   ;;  %s5536_s10 = inlined_call_operand.vmem [shape: f32[528,22], index: 10, kind: input, shape index: {}]   ;;  %s5537_s11 = inlined_call_operand.vmem [shape: f32[7,15], index: 11, kind: input, shape index: {}]   ;;  %s5538_s12 = inlined_call_operand.vmem [shape: f32[359,15], index: 12, kind: input, shape index: {}]   ;;  %s5539_s13 = inlined_call_operand.hbm [shape: f32[2,1,16], index: 13, kind: output, shape index: {}]  }
   0x1   :  { %5586 = sst [smem:[#allocation10_spill]] %s5526_s0  ;;  %v18_v0 = vstv %s5527_s1 }
   0x2   :  { %5587 = sst [smem:[#allocation11_spill]] %s5529_s3  ;;  %19 = vst [vmem:[#allocation2] sm:$0x1] %v18_v0 }
   0x3   :  { %5588 = sst [smem:[#allocation12_spill]] %s5530_s4 }
   0x4   :  { %5589 = sst [smem:[#allocation13_spill]] %s5531_s5 }
   0x5   :  { %5590 = sst [smem:[#allocation14_spill]] %s5532_s6 }
   0x6   :  { %20 = vsyncpa [#allocation4], 0 }
   0x7   :  { %22 = vsyncpa [#allocation4 + $0x1], 0  ;;  %s4042_s27 = smov 0   ;;  %s4044_s28 = smov 0  }
   0x8   :  { %s4046_s29 = smov 0   ;;  %s4048_s30 = smov 0  }
   0x9 LB: > { %5591 = sst [smem:[#allocation6_spill]] %s3936_s29  ;;  %s4063_s1 = sadd.s32 4294967295, %s3940_s30   ;;  %s3940_s30 = sphi %s4048_s30, %s5729_s30   ;;  %s3936_s29 = sphi %s4046_s29, %s5731_s29   ;;  %s3932_s28 = sphi %s4044_s28, %s5733_s28   ;;  %s3928_s27 = sphi %s4042_s27, %s5732_s27  }
   0xa   : > { %s3579_s14 = sadd.s32 4294967294, %s3940_s30   ;;  %s4067_s15 = sadd.s32 1, %s3940_s30  }
   0xb   : > { %5592 = sst [smem:[#allocation7_spill]] %s4067_s15  ;;  %s313_s16 = sadd.s32 1, %s3936_s29 }
   0xc   : > { %s310_s17 = ssub.s32 %s3940_s30, %s4067_s15  ;;  %p323_p0 = scmp.ne.s32.totalorder %s3936_s29, %s3932_s28 }
   0xd   : > { %p311_p1 = scmp.eq.s32.totalorder %s310_s17, 0  ;;  %p324_p2 = scmp.eq.s32.totalorder %s4063_s1, 1 }
   0xe   : > { %p329_p3 = scmp.ne.s32.totalorder %s3932_s28, %s3928_s27  ;;  %p330_p4 = scmp.eq.s32.totalorder %s3579_s14, 1 }
   0xf   : > { %s4078_s18 = scalar_select %p311_p1, %s3936_s29, %s313_s16  }
  0x10   : > { %p4080_p5 = por %p324_p2, %p323_p0  ;;  %p4084_p6 = por %p330_p4, %p329_p3 }
  0x11   : > { %5593 = sst [smem:[#allocation8_spill]] %s4078_s18  ;;  %p3582_p7 = scmp.ge.s32.totalorder %s3940_s30, 1 }
  0x12   : > { %s5595_s20 = scalar_select %p4084_p6, 1, 0 }
  0x13   : > { %p392_p8 = scmp.lt.s32.totalorder %s3940_s30, 3 }
  0x14   : > { %5596 = sst [smem:[#allocation9_spill]] %s5595_s20 }
  0x15   : > { %p393_p9 = pnand %p3582_p7, %p392_p8 }
  0x16   : > { %p435_p10 = scmp.lt.s32.totalorder (!%p393_p9), %s4063_s1, 1  ;;  %v3942_v1 = vmov (!%p393_p9), 0.0   ;;  %v443_v2 = vld [vmem:[%s5534_s8] sm:$0xff] (!%p393_p9)  ;;  %v444_v3 = vld [vmem:[%s5534_s8 + $0x8] sm:$0xff] (!%p393_p9)  ;;  %s5597_s0 = sld [smem:[#allocation10_spill]] (!%p393_p9)  ;;  %v445_v5 = vld [vmem:[%s5534_s8 + $0x10] sm:$0xff] (!%p393_p9) }
  0x17   : > { %396 = sbr.rel (%p393_p9) target bundleno = 4354 (0x1102), region = 72  ;;  %3676 = vmatprep.subr.bf16.mxu1 (!%p393_p9), %v3942_v1  ;;  %3704 = vmatprep.subr.bf16.mxu0 (!%p393_p9), %v3942_v1  ;;  %v552_v4 = vpack.c.bf16 (!%p393_p9), %v444_v3, %v443_v2  ;;  %v446_v6 = vld [vmem:[%s5534_s8 + $0x18] sm:$0xff] (!%p393_p9)  ;;  %vm472_vm0 = vcmask (!%p393_p9), 1041408   ;;  %vm473_vm1 = vsmask.f32 (!%p393_p9), 1280  ;;  %v4113_v13 = vld [vmem:[%s5534_s8 + $0x20] sm:$0xff] (!%p393_p9) }
  0x18   : > { %v553_v9 = vpack.c.bf16 (!%p393_p9), %v446_v6, %v445_v5  ;;  %vm5549_vm2 = vcmask (!%p393_p9), 1040384   ;;  %v554_v14 = vpack.c.bf16 (!%p393_p9), %v4113_v13, %v4113_v13  ;;  %v3943_v15 = vmov (!%p393_p9), 65535   ;;  %vm4120_vm3 = vmand (!%p393_p9), %vm472_vm0, %vm473_vm1  ;;  %s3944_s29 = smov (!%p393_p9), 10   ;;  %s3945_s15 = smov (!%p393_p9), 20   ;;  %v448_v5 = vld [vmem:[%s5534_s8 + $0x28] sm:$0xff] (!%p393_p9) }
  0x19   : > { %3677 = vmatpush3.bf16.msra.mxu1 (!%p393_p9), %v552_v4  ;;  %v564_v16 = vsel (!%p393_p9), %vm5549_vm2, 4294967295, %v3943_v15  ;;  %vm5550_vm4 = vcmask (!%p393_p9), 1046528   ;;  %vm512_vm5 = vcmask (!%p393_p9), 1045504   ;;  %vm5555_vm6 = vsmask.f32 (!%p393_p9), 7424  ;;  %s3946_s18 = smov (!%p393_p9), 5  }
  0x1a   : > { %3678 = vmatprep.subr.bf16.mxu1 (!%p393_p9), %v3942_v1  ;;  %v565_v20 = vsel (!%p393_p9), %vm472_vm0, %v564_v16, 0  ;;  %vm5544_vm7 = vsmask.f32 (!%p393_p9), 6400  ;;  %vm5585_vm8 = vsmask.f32 (!%p393_p9), 5376  ;;  %vm5554_vm9 = vcmask (!%p393_p9), 1044480  }
  0x1b   : > { %v567_v22 = vand.u32 (!%p393_p9), %v565_v20, %v554_v14  ;;  %vm5551_vm10 = vmmov (!%p393_p9), 0   ;;  %s5567_s20 = smov (!%p393_p9), 15   ;;  %s3949_s23 = smov (!%p393_p9), 25   ;;  %vm534_vm11 = vcmask (!%p393_p9), 39936   ;;  %vm537_vm12 = vcmask (!%p393_p9), 80896  }
  0x1c   : > { %3682 = vmatprep.mubr.msk.bf16.mxu1 (!%p393_p9), %vm5551_vm10, %v3942_v1  ;;  %3718 = vmatprep.mubr.msk.bf16.mxu0 (!%p393_p9), %vm5551_vm10, %v3942_v1  ;;  %s5561_s24 = smov (!%p393_p9), 30   ;;  %vm5579_vm13 = vcmask (!%p393_p9), 121856   ;;  %vm543_vm14 = vcmask (!%p393_p9), 162816   ;;  %vm546_vm15 = vcmask (!%p393_p9), 203776   ;;  %vm5578_vm0 = vcmask (!%p393_p9), 244736   ;;  %s5559_s22 = smov (!%p393_p9), 60  }
  0x1d   : > { %3679 = vmatpush3.bf16.msra.mxu1 (!%p393_p9), %v553_v9  ;;  %vm559_vm1 = vcmask (!%p393_p9), 285696   ;;  %v703_v6 = vpack.c.bf16 (!%p393_p9), %v448_v5, %v4113_v13  ;;  %v449_v9 = vld [vmem:[%s5534_s8 + $0x30] sm:$0xff] (!%p393_p9)  ;;  %v452_v13 = vld [vmem:[%s5534_s8 + $0x48] sm:$0xff] (!%p393_p9)  ;;  %s5600_s4 = sld [smem:[#allocation12_spill]] (!%p393_p9)  ;;  %vm983_vm2 = vcmask (!%p393_p9), 1044484   ;;  %s5603_s25 = smov (!%p393_p9), 45  }
  0x1e   : > { %s436_s21 = scalar_select %p435_p10, %s4063_s1, 1  ;;  %3680 = vmatprep.subr.bf16.mxu1 %v3942_v1 }
  0x1f   : > { %s5610_s3 = sld [smem:[#allocation11_spill]]  ;;  %s5614_s6 = sld [smem:[#allocation14_spill]] }
  0x20   : > { %s3617_s26 = sshll.u32 %s436_s21, 4  ;;  %s5569_s21 = smov 110  }
  0x21   : > { %s439_s17 = scalar_lea.vmem %s5597_s0, %s3617_s26  ;;  %3681 = vmatpush3.bf16.msra.mxu1 %v567_v22  ;;  %v455_v22 = vld [vmem:[%s5534_s8 + $0x60] sm:$0xff]  ;;  %s5604_s26 = smov 75  }
  0x22   : > { %v441_v7 = vld [vmem:[%s439_s17] sm:$0xff]  ;;  %v442_v8 = vld [vmem:[%s439_s17 + $0x8] sm:$0xff]  ;;  %3686 = vmatprep.subr.bf16.mxu1 %v3942_v1  ;;  %s5580_s17 = smov 88   ;;  %s5634_s5 = sld [smem:[#allocation13_spill]] }
  0x23   : > { %v462_v10 = vpack.c.bf16 %v442_v8, %v441_v7  ;;  %v715_v7 = vshrl.u32 %v703_v6, 16  ;;  %v718_v8 = vshll.u32 %v703_v6, 16  ;;  %v457_v6 = vld [vmem:[%s5534_s8 + $0x70] sm:$0xff]  ;;  %s3963_s16 = smov 37   ;;  %s3966_s14 = smov 33  }
  0x25   : > { %v464_v11 = vshrl.u32 %v462_v10, 16  ;;  %v467_v12 = vshll.u32 %v462_v10, 16  ;;  %v450_v10 = vld [vmem:[%s5534_s8 + $0x38] sm:$0xff]  ;;  %v717_v14 = vrot.slane %v715_v7, 1  ;;  %v720_v16 = vrot.slane %v718_v8, 2 }
  0x26   : > { %v458_v7 = vld [vmem:[%s5534_s8 + $0x78] sm:$0xff] }
  0x27   : > { %v466_v17 = vrot.slane %v464_v11, 6  ;;  %v469_v18 = vrot.slane %v467_v12, 7  ;;  %v451_v11 = vld [vmem:[%s5534_s8 + $0x40] sm:$0xff]  ;;  %v704_v12 = vpack.c.bf16 %v450_v10, %v449_v9  ;;  %v708_v8 = vpack.c.bf16 %v458_v7, %v457_v6 }
  0x28   : > { %v705_v20 = vpack.c.bf16 %v452_v13, %v451_v11  ;;  %v460_v13 = vld [vmem:[%s5534_s8 + $0x88] sm:$0xf] }
  0x29   : > { %v470_v21 = vor.u32 %v469_v18, %v466_v17  ;;  %v453_v17 = vld [vmem:[%s5534_s8 + $0x50] sm:$0xff]  ;;  %v454_v18 = vld [vmem:[%s5534_s8 + $0x58] sm:$0xff]  ;;  %v759_v11 = vshrl.u32 %v708_v8, 16 }
  0x2b   : > { %v475_v23 = vsel %vm4120_vm3, 0, %v470_v21  ;;  %v476_v24 = vsel %vm4120_vm3, %v470_v21, 0  ;;  %v706_v21 = vpack.c.bf16 %v454_v18, %v453_v17  ;;  %v761_v17 = vrot.slane %v759_v11, 1 }
  0x2c   : > { %v495_v25 = vrot.slane %v475_v23, 1  ;;  %v496_v26 = vrot.slane %v476_v24, 1  ;;  %v513_v27 = vrot.slane %v475_v23, 2  ;;  %v514_v28 = vrot.slane %v476_v24, 2 }
  0x2d   : > { %v479_v29 = vshrl.u32 %v475_v23, 16  ;;  %v481_v30 = vshll.u32 %v475_v23, 16  ;;  %v486_v31 = vshll.u32 %v476_v24, 16  ;;  %v504_v32 = vshrl.u32 %v476_v24, 16 }
  0x2e   : > { %v497_v33 = vsel %vm5550_vm4, %v495_v25, %v496_v26  ;;  %v515_v34 = vsel %vm512_vm5, %v513_v27, %v514_v28  ;;  %v529_v49 = vrot.slane %v475_v23, 3  ;;  %v530_v50 = vrot.slane %v476_v24, 3 }
  0x2f   : > { %498 = vrot.lane.b32.xlu0 %v497_v33, %s3944_s29  ;;  %516 = vrot.lane.b32.xlu1 %v515_v34, %s3945_s15  ;;  %v483_v35 = vrot.slane %v481_v30, 1  ;;  %v488_v36 = vrot.slane %v486_v31, 1  ;;  %v501_v37 = vrot.slane %v479_v29, 1  ;;  %v502_v38 = vrot.slane %v481_v30, 2  ;;  %s5557_s29 = smov 90   ;;  %s5547_s15 = smov 45  }
  0x30   : > { %v506_v39 = vrot.slane %v504_v32, 1  ;;  %v507_v40 = vrot.slane %v486_v31, 2  ;;  %v519_v41 = vrot.slane %v479_v29, 2  ;;  %v520_v42 = vrot.slane %v481_v30, 3 }
  0x31   : > { %v484_v43 = vor.u32 %v483_v35, %v479_v29  ;;  %v503_v44 = vor.u32 %v502_v38, %v501_v37  ;;  %v522_v45 = vrot.slane %v504_v32, 2  ;;  %v523_v46 = vrot.slane %v486_v31, 3 }
  0x32   : > { %v508_v47 = vor.u32 %v507_v40, %v506_v39  ;;  %v521_v48 = vor.u32 %v520_v42, %v519_v41  ;;  %v531_v55 = vsel %vm5554_vm9, %v529_v49, %v530_v50  ;;  %v723_v24 = vshrl.u32 %v704_v12, 16 }
  0x33   : > { %v489_v51 = vsel %vm5555_vm6, %v484_v43, %v488_v36  ;;  %v524_v52 = vor.u32 %v523_v46, %v522_v45  ;;  %v726_v25 = vshll.u32 %v704_v12, 16  ;;  %v732_v27 = vshrl.u32 %v705_v20, 16 }
  0x34   : > { %490 = vrot.lane.b32.xlu0 %v489_v51, %s3946_s18  ;;  %v509_v53 = vsel %vm5544_vm7, %v503_v44, %v508_v47  ;;  %v735_v28 = vshll.u32 %v705_v20, 16  ;;  %v741_v29 = vshrl.u32 %v706_v21, 16  ;;  %v744_v30 = vshll.u32 %v706_v21, 16  ;;  %s5545_s18 = smov 75  }
  0x35   : > { %510 = vrot.lane.b32.xlu1 %v509_v53, %s5567_s20  ;;  %v525_v54 = vsel %vm5585_vm8, %v521_v48, %v524_v52  ;;  %v721_v31 = vor.u32 %v720_v16, %v717_v14  ;;  %v725_v32 = vrot.slane %v723_v24, 1  ;;  %v728_v33 = vrot.slane %v726_v25, 2  ;;  %v4190_v53 = vld [vmem:[%s5533_s7] sm:$0x3f] }
  0x36   : > { %v734_v34 = vrot.slane %v732_v27, 1  ;;  %v737_v35 = vrot.slane %v735_v28, 2  ;;  %v743_v38 = vrot.slane %v741_v29, 1  ;;  %v746_v39 = vrot.slane %v744_v30, 2  ;;  %v459_v16 = vld [vmem:[%s5534_s8 + $0x80] sm:$0xff] }
  0x37   : > { %v729_v37 = vor.u32 %v728_v33, %v725_v32  ;;  %v555_v50 = vlaneseq  ;;  %v762_v12 = vshll.u32 %v708_v8, 16  ;;  %v709_v20 = vpack.c.bf16 %v460_v13, %v459_v16 }
  0x38   : > { %526 = vrot.lane.b32.xlu0 %v525_v54, %s3949_s23  ;;  %v738_v41 = vor.u32 %v737_v35, %v734_v34  ;;  %v747_v44 = vor.u32 %v746_v39, %v743_v38  ;;  %s3965_s23 = smov 70  }
  0x39   : > { %532 = vrot.lane.b32.xlu1 %v531_v55, %s5561_s24  ;;  %v730_v42 = vsel %vm5544_vm7, %v721_v31, %v729_v37  ;;  %v4182_v51 = vshrl.u32 %v555_v50, 7  ;;  %v764_v18 = vrot.slane %v762_v12, 2  ;;  %v768_v24 = vshrl.u32 %v709_v20, 16 }
  0x3a   : > { %v739_v43 = vsel %vm5544_vm7, %v729_v37, %v738_v41  ;;  %v748_v47 = vsel %vm5544_vm7, %v738_v41, %v747_v44  ;;  %v771_v25 = vshll.u32 %v709_v20, 16 }
  0x3b   : > { %v4185_v52 = vsub.s32 0, %v4182_v51  ;;  %v4195_v55 = vsub.s32 1, %v4182_v51  ;;  %v770_v30 = vrot.slane %v768_v24, 1 }
  0x3c   : > { %v773_v31 = vrot.slane %v771_v25, 2 }
  0x3d   : > { %v558_v54 = vrot.slane %v4190_v53, %v4185_v52 }
  0xa1   : > { %v499_v56 = vpop.permute.xlu0 %498  ;;  %v517_v57 = vpop.permute.xlu1 %516 }
  0xa6   : > { %v491_v58 = vpop.permute.xlu0 %490 }
  0xa7   : > { %v536_v59 = vsel %vm534_vm11, %v475_v23, %v491_v58  ;;  %v511_v60 = vpop.permute.xlu1 %510  ;;  %v456_v23 = vld [vmem:[%s5534_s8 + $0x68] sm:$0xff]  ;;  %v615_v58 = vrot.slane %v4190_v53, %v4195_v55  ;;  %vm5553_vm11 = vcmask 1043456  }
  0xa8   : > { %v539_v61 = vsel %vm537_vm12, %v536_v59, %v499_v56  ;;  %v707_v26 = vpack.c.bf16 %v456_v23, %v455_v22  ;;  %v4200_v59 = vsub.s32 2, %v4182_v51  ;;  %v765_v23 = vor.u32 %v764_v18, %v761_v17 }
  0xa9   : > { %v542_v62 = vsel %vm5579_vm13, %v539_v61, %v511_v60  ;;  %v787_v32 = vsel %vm5553_vm11, 4294967295, %v3943_v15  ;;  %vm5577_vm12 = vcmask 367616   ;;  %vm992_vm11 = vcmask 1047559  }
  0xaa   : > { %v545_v63 = vsel %vm543_vm14, %v542_v62, %v517_v57  ;;  %v527_v0 = vpop.permute.xlu0 %526  ;;  %v750_v36 = vshrl.u32 %v707_v26, 16  ;;  %v753_v40 = vshll.u32 %v707_v26, 16  ;;  %vm5566_vm14 = vcmask 490496  }
  0xab   : > { %v548_v2 = vsel %vm546_vm15, %v545_v63, %v527_v0  ;;  %v533_v3 = vpop.permute.xlu1 %532  ;;  %vm5565_vm15 = vcmask 613376  }
  0xac   : > { %v551_v4 = vsel %vm5578_vm0, %v548_v2, %v533_v3  ;;  %v752_v45 = vrot.slane %v750_v36, 1  ;;  %v755_v46 = vrot.slane %v753_v40, 2  ;;  %v621_v3 = vrot.slane %v4190_v53, %v4200_v59 }
  0xad   : > { %3683 = vmatmul.mubr.msk.bf16.vlgmr.msra.gmra.mrb[0].mxu1 %vm559_vm1, %v551_v4  ;;  %vm5564_vm1 = vcmask 736256  }
  0xae   : > { %3700 = vmatprep.mubr.msk.bf16.mxu1 %vm5551_vm10, %v3942_v1  ;;  %3687 = vmatpush3.bf16.msra.mxu1 %v730_v42  ;;  %v756_v48 = vor.u32 %v755_v46, %v752_v45  ;;  %v4226_v45 = vsel %vm5554_vm9, %v787_v32, 0  ;;  %vm5556_vm10 = vcmask 1046534  }
  0xaf   : > { %3688 = vmatprep.subr.bf16.mxu1 %v3942_v1 }
  0xb0   : > { %v757_v49 = vsel %vm5544_vm7, %v747_v44, %v756_v48  ;;  %v766_v28 = vsel %vm5544_vm7, %v756_v48, %v765_v23  ;;  %v774_v44 = vor.u32 %v773_v31, %v770_v30  ;;  %v926_v31 = vld [vmem:[%s5600_s4 + $0x18] sm:$0xff] }
  0xb2   : > { %3689 = vmatpush3.bf16.msra.mxu1 %v739_v43  ;;  %v790_v7 = vand.u32 %v4226_v45, %v774_v44 }
  0xb3   : > { %3690 = vmatprep.subr.bf16.mxu1 %v3942_v1 }
  0xb6   : > { %3691 = vmatpush3.bf16.msra.mxu1 %v748_v47 }
  0xb7   : > { %3692 = vmatprep.subr.bf16.mxu1 %v3942_v1 }
  0xba   : > { %3693 = vmatpush3.bf16.msra.mxu1 %v757_v49 }
  0xbb   : > { %3694 = vmatprep.subr.bf16.mxu1 %v3942_v1 }
  0xbe   : > { %3695 = vmatpush3.bf16.msra.mxu1 %v766_v28  ;;  %v924_v28 = vld [vmem:[%s5600_s4 + $0x8] sm:$0xff] }
  0xbf   : > { %3696 = vmatprep.subr.bf16.mxu1 %v3942_v1 }
 0x180   : > { %v603_v56 = vpop.f32.mrb[0].mxu1 }
 0x181   : > { %v604_v57 = vadd.f32 %v603_v56, %v558_v54  ;;  %v3684_v60 = vpop.f32.mrb[1].mxu1 }
 0x182   : > { %v606_v61 = vpop.f32.mrb[2].mxu1 }
 0x183   : > { %v610_v62 = vmax.f32 %v604_v57, 0.0  ;;  %v607_v63 = vadd.f32 %v606_v61, %v558_v54  ;;  %v3685_v0 = vpop.f32.mrb[3].mxu1 }
 0x185   : > { %v616_v2 = vmul.f32 %v615_v58, %v610_v62  ;;  %v611_v4 = vmax.f32 %v607_v63, 0.0 }
 0x187   : > { %v617_v5 = vmul.f32 %v615_v58, %v611_v4  ;;  %v622_v9 = vadd.f32 %v621_v3, %v616_v2 }
 0x189   : > { %v623_v10 = vadd.f32 %v621_v3, %v617_v5  ;;  %v775_v3 = vsel %vm5544_vm7, %v765_v23, %v774_v44  ;;  %v4286_v44 = vsub.s32 5, %v4182_v51 }
 0x18a   : > { %3697 = vmatpush3.bf16.msra.mxu1 %v775_v3 }
 0x18b   : > { %v624_v14 = vpack.c.bf16 %v623_v10, %v622_v9  ;;  %3698 = vmatprep.subr.bf16.mxu1 %v3942_v1 }
 0x18d   : > { %v626_v21 = vshrl.u32 %v624_v14, 16  ;;  %v629_v22 = vshll.u32 %v624_v14, 16 }
 0x18e   : > { %3699 = vmatpush3.bf16.msra.mxu1 %v790_v7 }
 0x18f   : > { %v628_v26 = vrot.slane %v626_v21, 6  ;;  %v631_v27 = vrot.slane %v629_v22, 7 }
 0x191   : > { %v632_v29 = vor.u32 %v631_v27, %v628_v26  ;;  %v923_v27 = vld [vmem:[%s5600_s4] sm:$0xff] }
 0x192   : > { %v1046_v30 = vpack.c.bf16 %v924_v28, %v923_v27 }
 0x193   : > { %v634_v33 = vsel %vm4120_vm3, 0, %v632_v29  ;;  %v635_v34 = vsel %vm4120_vm3, %v632_v29, 0  ;;  %v925_v29 = vld [vmem:[%s5600_s4 + $0x10] sm:$0xff] }
 0x194   : > { %v652_v35 = vrot.slane %v634_v33, 1  ;;  %v653_v36 = vrot.slane %v635_v34, 1  ;;  %v668_v37 = vrot.slane %v634_v33, 2  ;;  %v669_v38 = vrot.slane %v635_v34, 2  ;;  %3705 = vmatpush3.bf16.msra.mxu0 %v1046_v30 }
 0x195   : > { %v637_v39 = vshrl.u32 %v634_v33, 16  ;;  %v639_v40 = vshll.u32 %v634_v33, 16  ;;  %v644_v41 = vshll.u32 %v635_v34, 16  ;;  %v660_v43 = vshrl.u32 %v635_v34, 16  ;;  %3706 = vmatprep.subr.bf16.mxu0 %v3942_v1 }
 0x196   : > { %v654_v42 = vsel %vm5550_vm4, %v652_v35, %v653_v36  ;;  %v670_v49 = vsel %vm512_vm5, %v668_v37, %v669_v38  ;;  %v682_v54 = vrot.slane %v634_v33, 3  ;;  %v683_v61 = vrot.slane %v635_v34, 3  ;;  %v928_v34 = vld [vmem:[%s5600_s4 + $0x28] sm:$0xff]  ;;  %v929_v36 = vld [vmem:[%s5600_s4 + $0x30] sm:$0xff]  ;;  %v930_v37 = vld [vmem:[%s5600_s4 + $0x38] sm:$0xff] }
 0x197   : > { %655 = vrot.lane.b32.xlu1 %v654_v42, %s5561_s24  ;;  %v641_v46 = vrot.slane %v639_v40, 1  ;;  %v657_v47 = vrot.slane %v637_v39, 1  ;;  %v658_v48 = vrot.slane %v639_v40, 2  ;;  %v662_v56 = vrot.slane %v660_v43, 1 }
 0x198   : > { %v663_v57 = vrot.slane %v644_v41, 2  ;;  %v646_v60 = vrot.slane %v644_v41, 1  ;;  %v673_v62 = vrot.slane %v637_v39, 2  ;;  %v674_v0 = vrot.slane %v639_v40, 3 }
 0x199   : > { %v642_v58 = vor.u32 %v641_v46, %v637_v39  ;;  %v659_v63 = vor.u32 %v658_v48, %v657_v47  ;;  %v676_v2 = vrot.slane %v660_v43, 2  ;;  %v677_v6 = vrot.slane %v644_v41, 3 }
 0x19a   : > { %v664_v5 = vor.u32 %v663_v57, %v662_v56  ;;  %v684_v8 = vsel %vm5554_vm9, %v682_v54, %v683_v61  ;;  %v675_v10 = vor.u32 %v674_v0, %v673_v62  ;;  %v1047_v32 = vpack.c.bf16 %v926_v31, %v925_v29 }
 0x19b   : > { %671 = vrot.lane.b32.xlu1 %v670_v49, %s5559_s22  ;;  %v647_v4 = vsel %vm5555_vm6, %v642_v58, %v646_v60  ;;  %v678_v11 = vor.u32 %v677_v6, %v676_v2  ;;  %v1049_v38 = vpack.c.bf16 %v930_v37, %v929_v36  ;;  %v4278_v39 = vsub.s32 3, %v4182_v51 }
 0x19c   : > { %648 = vrot.lane.b32.xlu0 %v647_v4, %s5567_s20  ;;  %v665_v9 = vsel %vm5544_vm7, %v659_v63, %v664_v5  ;;  %vm5563_vm7 = vcmask 859136   ;;  %3707 = vmatpush3.bf16.msra.mxu0 %v1047_v32  ;;  %v4283_v41 = vsub.s32 4, %v4182_v51  ;;  %v3955_v42 = vmov 1983009808  }
 0x19d   : > { %v679_v12 = vsel %vm5585_vm8, %v675_v10, %v678_v11  ;;  %3708 = vmatprep.subr.bf16.mxu0 %v3942_v1  ;;  %v713_v40 = vrot.slane %v4190_v53, %v4278_v39  ;;  %v851_v43 = vunpack.c.l.s4 %v3955_v42  ;;  %v844_v58 = vrot.slane %v4190_v53, %v4286_v44 }
 0x19e   : > { %v838_v48 = vrot.slane %v4190_v53, %v4283_v41  ;;  %vm986_vm4 = vcmask 1045509   ;;  %vm995_vm9 = vcmask 1041409   ;;  %vm998_vm6 = vcmask 1042434  }
 0x19f   : > { %685 = vrot.lane.b32.xlu1 %v684_v8, %s5557_s29  ;;  %v852_v49 = vunpack.c.0.s8 %v851_v43 }
 0x1a0   : > { %666 = vrot.lane.b32.xlu0 %v665_v9, %s5547_s15  ;;  %s5571_s15 = smov 66  }
 0x1a1   : > { %v4293_v63 = vsub.s32 %v852_v49, %v4182_v51 }
 0x1a4   : > { %680 = vrot.lane.b32.xlu0 %v679_v12, %s5545_s18  ;;  %s5582_s18 = smov 44  }
 0x209   : > { %v656_v14 = vpop.permute.xlu1 %655 }
 0x20d   : > { %v672_v17 = vpop.permute.xlu1 %671 }
 0x20e   : > { %v649_v16 = vpop.permute.xlu0 %648 }
 0x20f   : > { %v688_v13 = vsel %vm5579_vm13, %v634_v33, %v649_v16  ;;  %v927_v33 = vld [vmem:[%s5600_s4 + $0x20] sm:$0xff] }
 0x210   : > { %v690_v18 = vsel %vm5578_vm0, %v688_v13, %v656_v14  ;;  %v1048_v35 = vpack.c.bf16 %v928_v34, %v927_v33 }
 0x211   : > { %v686_v24 = vpop.permute.xlu1 %685 }
 0x212   : > { %v667_v20 = vpop.permute.xlu0 %666  ;;  %3709 = vmatpush3.bf16.msra.mxu0 %v1048_v35 }
 0x213   : > { %v693_v21 = vsel %vm5577_vm12, %v690_v18, %v667_v20  ;;  %3710 = vmatprep.subr.bf16.mxu0 %v3942_v1 }
 0x214   : > { %v696_v22 = vsel %vm5566_vm14, %v693_v21, %v672_v17 }
 0x216   : > { %v681_v23 = vpop.permute.xlu0 %680  ;;  %3711 = vmatpush3.bf16.msra.mxu0 %v1049_v38 }
 0x217   : > { %v699_v25 = vsel %vm5565_vm15, %v696_v22, %v681_v23  ;;  %3712 = vmatprep.subr.bf16.mxu0 %v3942_v1 }
 0x218   : > { %v702_v26 = vsel %vm5564_vm1, %v699_v25, %v686_v24 }
 0x219   : > { %3701 = vmatmul.mubr.msk.bf16.vlgmr.msra.gmra.mrb[4].mxu1 %vm5563_vm7, %v702_v26 }
 0x2ec   : > { %v826_v46 = vpop.f32.mrb[4].mxu1 }
 0x2ed   : > { %v827_v47 = vadd.f32 %v826_v46, %v713_v40  ;;  %v3702_v54 = vpop.f32.mrb[5].mxu1 }
 0x2ee   : > { %v829_v56 = vpop.f32.mrb[6].mxu1 }
 0x2ef   : > { %v833_v57 = vmax.f32 %v827_v47, 0.0  ;;  %v830_v60 = vadd.f32 %v829_v56, %v713_v40  ;;  %v3703_v61 = vpop.f32.mrb[7].mxu1 }
 0x2f1   : > { %v839_v62 = vmul.f32 %v838_v48, %v833_v57  ;;  %v834_v0 = vmax.f32 %v830_v60, 0.0  ;;  %v931_v57 = vld [vmem:[%s5600_s4 + $0x40] sm:$0xff] }
 0x2f3   : > { %v845_v2 = vadd.f32 %v844_v58, %v839_v62  ;;  %v840_v3 = vmul.f32 %v838_v48, %v834_v0 }
 0x2f5   : > { %v849_v4 = vcombine.high %v845_v2, %v845_v2  ;;  %v856_v5 = vrot.slane %v845_v2, %v4293_v63  ;;  %v846_v6 = vadd.f32 %v844_v58, %v840_v3  ;;  %v932_v58 = vld [vmem:[%s5600_s4 + $0x48] sm:$0xff] }
 0x2f6   : > { %v1050_v3 = vpack.c.bf16 %v932_v58, %v931_v57 }
 0x2f7   : > { %v863_v7 = vrot.slane %v849_v4, %v4293_v63  ;;  %v864_v8 = vcombine.high %v856_v5, %v856_v5  ;;  %v3587_v9 = vrot.slane %v856_v5, 9  ;;  %v866_v10 = vcombine.high %v846_v6, %v846_v6 }
 0x2f8   : > { %v873_v53 = vrot.slane %v846_v6, %v4293_v63  ;;  %v4298_v11 = vpack.c.bf16 %v846_v6, %v845_v2  ;;  %3713 = vmatpush3.bf16.msra.mxu0 %v1050_v3  ;;  %v939_v3 = vld [vmem:[%s5600_s4 + $0x80] sm:$0xff] }
 0x2f9   : > { %v865_v12 = vcombine.high %v863_v7, %v863_v7  ;;  %v3588_v14 = vrot.slane %v864_v8, 9  ;;  %v3589_v16 = vrot.slane %v863_v7, 9  ;;  %v915_v13 = vmax.f32 %v856_v5, %v3587_v9  ;;  %3714 = vmatprep.subr.bf16.mxu0 %v3942_v1 }
 0x2fa   : > { %v880_v17 = vrot.slane %v866_v10, %v4293_v63  ;;  %v881_v18 = vcombine.high %v873_v53, %v873_v53  ;;  %v3591_v20 = vrot.slane %v873_v53, 9 }
 0x2fb   : > { %v3590_v21 = vrot.slane %v865_v12, 9  ;;  %v916_v22 = vmax.f32 %v864_v8, %v3588_v14  ;;  %v917_v23 = vmax.f32 %v863_v7, %v3589_v16  ;;  %v957_v24 = vpack.c.bf16 %v915_v13, %v915_v13  ;;  %v934_v14 = vld [vmem:[%s5600_s4 + $0x58] sm:$0xff] }
 0x2fc   : > { %v882_v25 = vcombine.high %v880_v17, %v880_v17  ;;  %v3592_v26 = vrot.slane %v881_v18, 9  ;;  %v3593_v27 = vrot.slane %v880_v17, 9  ;;  %v919_v28 = vmax.f32 %v873_v53, %v3591_v20  ;;  %v935_v20 = vld [vmem:[%s5600_s4 + $0x60] sm:$0xff] }
 0x2fd   : > { %v918_v29 = vmax.f32 %v865_v12, %v3590_v21  ;;  %v958_v30 = vpack.c.bf16 %v916_v22, %v916_v22  ;;  %v959_v31 = vpack.c.bf16 %v917_v23, %v917_v23  ;;  %v973_v32 = vunpack.c.l.b16 %v957_v24  ;;  %v933_v12 = vld [vmem:[%s5600_s4 + $0x50] sm:$0xff]  ;;  %v936_v21 = vld [vmem:[%s5600_s4 + $0x68] sm:$0xff] }
 0x2fe   : > { %v3594_v33 = vrot.slane %v882_v25, 9  ;;  %v920_v34 = vmax.f32 %v881_v18, %v3592_v26  ;;  %v921_v35 = vmax.f32 %v880_v17, %v3593_v27  ;;  %v961_v36 = vpack.c.bf16 %v919_v28, %v919_v28 }
 0x2ff   : > { %v960_v37 = vpack.c.bf16 %v918_v29, %v918_v29  ;;  %v974_v38 = vunpack.c.l.b16 %v958_v30  ;;  %v975_v40 = vunpack.c.l.b16 %v959_v31  ;;  %v981_v49 = vrot.slane %v973_v32, 5 }
 0x300   : > { %v922_v42 = vmax.f32 %v882_v25, %v3594_v33  ;;  %v962_v43 = vpack.c.bf16 %v920_v34, %v920_v34  ;;  %v963_v46 = vpack.c.bf16 %v921_v35, %v921_v35  ;;  %v977_v47 = vunpack.c.l.b16 %v961_v36 }
 0x301   : > { %v976_v48 = vunpack.c.l.b16 %v960_v37  ;;  %v982_v54 = vrot.slane %v974_v38, 4  ;;  %v985_v56 = vrot.slane %v975_v40, 3  ;;  %v1051_v16 = vpack.c.bf16 %v934_v14, %v933_v12 }
 0x302   : > { %v964_v60 = vpack.c.bf16 %v922_v42, %v922_v42  ;;  %v979_v61 = vunpack.c.l.b16 %v963_v46  ;;  %v978_v2 = vunpack.c.l.b16 %v962_v43  ;;  %v991_v5 = vrot.slane %v977_v47, 1 }
 0x303   : > { %v984_v62 = vsel %vm983_vm2, %v982_v54, %v981_v49  ;;  %v988_v0 = vrot.slane %v976_v48, 2  ;;  %3715 = vmatpush3.bf16.msra.mxu0 %v1051_v16  ;;  %v1052_v23 = vpack.c.bf16 %v936_v21, %v935_v20  ;;  %v944_v16 = vld [vmem:[%s5600_s4 + $0xa8] sm:$0xff] }
 0x304   : > { %v980_v4 = vunpack.c.l.b16 %v964_v60  ;;  %v994_v6 = vrot.slane %v979_v61, 7  ;;  %v987_v7 = vsel %vm986_vm4, %v985_v56, %v984_v62  ;;  %3716 = vmatprep.subr.bf16.mxu0 %v3942_v1  ;;  %v937_v61 = vld [vmem:[%s5600_s4 + $0x70] sm:$0xff] }
 0x305   : > { %v990_v8 = vsel %vm5556_vm10, %v988_v0, %v987_v7  ;;  %vm4319_vm10 = vmand %vm512_vm5, %vm5585_vm8  ;;  %v1060_v28 = vand.u32 %v1052_v23, %v4226_v45  ;;  %v1173_v62 = vpack.c.bf16 %v937_v61, %v936_v21  ;;  %v3956_v7 = vmov 0  }
 0x306   : > { %v997_v9 = vrot.slane %v980_v4, 6  ;;  %v993_v10 = vsel %vm992_vm11, %v991_v5, %v990_v8  ;;  %v996_v53 = vsel %vm995_vm9, %v994_v6, %v978_v2  ;;  %v938_v2 = vld [vmem:[%s5600_s4 + $0x78] sm:$0xff]  ;;  %v940_v6 = vld [vmem:[%s5600_s4 + $0x88] sm:$0xff]  ;;  %1281 = vmatprep.subr.bf16.mxu1 %v3956_v7  ;;  %3877 = vset.pattern.permute.xlu0 %v3956_v7  ;;  %vm1604_vm8 = vcmask 809984  }
 0x307   : > { %3717 = vmatpush3.bf16.msra.mxu0 %v1060_v28  ;;  %v1190_v0 = vshll.u32 %v1173_v62, 16  ;;  %v1188_v4 = vshrl.u32 %v1173_v62, 16  ;;  %v1174_v8 = vpack.c.bf16 %v939_v3, %v938_v2  ;;  %v946_v28 = vld [vmem:[%s5600_s4 + $0xb8] sm:$0xff] }
 0x308   : > { %v999_v13 = vsel %vm998_vm6, %v997_v9, %v996_v53  ;;  %v941_v9 = vld [vmem:[%s5600_s4 + $0x90] sm:$0xff]  ;;  %v943_v53 = vld [vmem:[%s5600_s4 + $0xa0] sm:$0xff]  ;;  %1507 = vmatprep.subr.bf16.mxu0 %v3956_v7  ;;  %vm5605_vm6 = vsmask.f32 7424 }
 0x309   : > { %v1000_v17 = vpack.c.b16 %v999_v13, %v993_v10  ;;  %v1192_v5 = vrot.slane %v1190_v0, 1  ;;  %v942_v10 = vld [vmem:[%s5600_s4 + $0x98] sm:$0xff]  ;;  %v1175_v12 = vpack.c.bf16 %v941_v9, %v940_v6  ;;  %v945_v13 = vld [vmem:[%s5600_s4 + $0xb0] sm:$0xff]  ;;  %v1195_v20 = vshll.u32 %v1174_v8, 16  ;;  %vm5606_vm9 = vmmov %vm5605_vm6 }
 0x30a   : > { %v1176_v14 = vpack.c.bf16 %v943_v53, %v942_v10  ;;  %v1199_v21 = vshrl.u32 %v1174_v8, 16  ;;  %v1177_v23 = vpack.c.bf16 %v945_v13, %v944_v16  ;;  %vm5607_vm11 = vmmov %vm5605_vm6 }
 0x30b   : > { %v1002_v22 = vsel %vm4120_vm3, 0, %v1000_v17  ;;  %v1193_v17 = vor.u32 %v1192_v5, %v1188_v4 }
 0x30c   : > { %v1004_v24 = vsel %vm4319_vm10, %v1002_v22, 0  ;;  %v1203_v22 = vshll.u32 %v1175_v12, 16 }
 0x30d   : > { %v1015_v25 = vrot.slane %v1004_v24, 1  ;;  %v1006_v26 = vshrl.u32 %v1004_v24, 16  ;;  %v1008_v27 = vshll.u32 %v1004_v24, 16  ;;  %v1023_v30 = vrot.slane %v1004_v24, 2 }
 0x30e   : > { %v1031_v34 = vrot.slane %v1004_v24, 3 }
 0x30f   : > { %1016 = vrot.lane.b32.xlu1 %v1015_v25, %s5561_s24  ;;  %v1010_v29 = vrot.slane %v1008_v27, 1  ;;  %v1018_v32 = vrot.slane %v1006_v26, 1  ;;  %v1019_v33 = vrot.slane %v1008_v27, 2  ;;  %v1026_v36 = vrot.slane %v1006_v26, 2  ;;  %s5575_s24 = smov 22  }
 0x310   : > { %v1027_v37 = vrot.slane %v1008_v27, 3  ;;  %v1207_v25 = vshrl.u32 %v1175_v12, 16  ;;  %v1205_v27 = vrot.slane %v1203_v22, 1  ;;  %v4413_v12 = vld [vmem:[%s5610_s3] sm:$0x3f]  ;;  %s5637_s3 = smov 44  }
 0x311   : > { %v1011_v31 = vor.u32 %v1010_v29, %v1006_v26  ;;  %v1020_v35 = vor.u32 %v1019_v33, %v1018_v32  ;;  %v1211_v26 = vshll.u32 %v1176_v14, 16  ;;  %v947_v29 = vld [vmem:[%s5600_s4 + $0xc0] sm:$0xff]  ;;  %v1215_v32 = vshrl.u32 %v1176_v14, 16 }
 0x312   : > { %v1028_v38 = vor.u32 %v1027_v37, %v1026_v36  ;;  %v1219_v33 = vshll.u32 %v1177_v23, 16  ;;  %v1178_v37 = vpack.c.bf16 %v947_v29, %v946_v28  ;;  %v1056_v14 = vrot.slane %v4413_v12, %v4185_v52  ;;  %v953_v28 = vld [vmem:[%s5600_s4 + $0xf0] sm:$0xff] }
 0x313   : > { %1024 = vrot.lane.b32.xlu1 %v1023_v30, %s5559_s22  ;;  %1012 = vrot.lane.b32.xlu0 %v1011_v31, %s5567_s20  ;;  %v1213_v36 = vrot.slane %v1211_v26, 1  ;;  %s5573_s22 = smov 4  }
 0x317   : > { %1032 = vrot.lane.b32.xlu1 %v1031_v34, %s5557_s29  ;;  %1021 = vrot.lane.b32.xlu0 %v1020_v35, %s5603_s25  ;;  %v1209_v35 = vor.u32 %v1207_v25, %v1205_v27  ;;  %s3964_s29 = smov 99  }
 0x31b   : > { %1029 = vrot.lane.b32.xlu0 %v1028_v38, %s5604_s26  ;;  %v948_v38 = vld [vmem:[%s5600_s4 + $0xc8] sm:$0xff] }
 0x381   : > { %v1017_v40 = vpop.permute.xlu1 %1016 }
 0x385   : > { %v1013_v42 = vpop.permute.xlu0 %1012  ;;  %v1025_v46 = vpop.permute.xlu1 %1024 }
 0x386   : > { %v1035_v43 = vsel %vm5579_vm13, %v1004_v24, %v1013_v42  ;;  %v1197_v24 = vrot.slane %v1195_v20, 1  ;;  %v1223_v42 = vshrl.u32 %v1177_v23, 16  ;;  %v1111_v23 = vrot.slane %v4413_v12, %v4200_v59 }
 0x387   : > { %v1037_v47 = vsel %vm5578_vm0, %v1035_v43, %v1017_v40  ;;  %v949_v40 = vld [vmem:[%s5600_s4 + $0xd0] sm:$0xff]  ;;  %vm5615_vm0 = vcmask 1046534  }
 0x388   : > { %v1198_v30 = vsel %vm5605_vm6, %v1193_v17, %v1197_v24  ;;  %v1201_v31 = vor.u32 %v1199_v21, %v1197_v24  ;;  %v1179_v43 = vpack.c.bf16 %v949_v40, %v948_v38  ;;  %v1106_v17 = vrot.slane %v4413_v12, %v4195_v55  ;;  %v955_v38 = vld [vmem:[%s5600_s4 + $0x100] sm:$0x7] }
 0x389   : > { %v1022_v48 = vpop.permute.xlu0 %1021  ;;  %v1033_v57 = vpop.permute.xlu1 %1032  ;;  %1282 = vmatpush1.bf16.msra.mxu1 %v1198_v30 }
 0x38a   : > { %v1039_v49 = vsel %vm5577_vm12, %v1037_v47, %v1022_v48  ;;  %1283 = vmatprep.subr.bf16.mxu1 %v3956_v7  ;;  %v1206_v34 = vsel %vm5606_vm9, %v1201_v31, %v1205_v27  ;;  %v1217_v47 = vor.u32 %v1215_v32, %v1213_v36  ;;  %v1221_v48 = vrot.slane %v1219_v33, 1  ;;  %vm5608_vm9 = vmmov %vm5605_vm6  ;;  %v952_v27 = vld [vmem:[%s5600_s4 + $0xe8] sm:$0xff] }
 0x38b   : > { %v1041_v54 = vsel %vm5566_vm14, %v1039_v49, %v1025_v46  ;;  %v1214_v46 = vsel %vm5607_vm11, %v1209_v35, %v1213_v36  ;;  %v1227_v49 = vshll.u32 %v1178_v37, 16  ;;  %v1235_v0 = vshll.u32 %v1179_v43, 16  ;;  %vm5609_vm11 = vmmov %vm5605_vm6 }
 0x38c   : > { %v1225_v61 = vor.u32 %v1223_v42, %v1221_v48  ;;  %v1239_v2 = vshrl.u32 %v1179_v43, 16  ;;  %v1181_v30 = vpack.c.bf16 %v953_v28, %v952_v27  ;;  %vm1275_vm14 = vcmask 211968  }
 0x38d   : > { %v1030_v56 = vpop.permute.xlu0 %1029  ;;  %1284 = vmatpush1.bf16.msra.mxu1 %v1206_v34  ;;  %v1229_v62 = vrot.slane %v1227_v49, 1  ;;  %v1237_v5 = vrot.slane %v1235_v0, 1  ;;  %vm1443_vm12 = vsmask.f32 3328 }
 0x38e   : > { %v1043_v58 = vsel %vm5565_vm15, %v1041_v54, %v1030_v56  ;;  %1285 = vmatprep.subr.bf16.mxu1 %v3956_v7  ;;  %v950_v54 = vld [vmem:[%s5600_s4 + $0xd8] sm:$0xff]  ;;  %v951_v56 = vld [vmem:[%s5600_s4 + $0xe0] sm:$0xff]  ;;  %v1251_v33 = vshll.u32 %v1181_v30, 16  ;;  %v1255_v40 = vshrl.u32 %v1181_v30, 16  ;;  %vm1170_vm15 = vcmask 31744  }
 0x38f   : > { %v1045_v60 = vsel %vm5564_vm1, %v1043_v58, %v1033_v57  ;;  %v1231_v57 = vshrl.u32 %v1178_v37, 16  ;;  %v1180_v58 = vpack.c.bf16 %v951_v56, %v950_v54  ;;  %v1230_v3 = vsel %vm5608_vm9, %v1225_v61, %v1229_v62  ;;  %v954_v37 = vld [vmem:[%s5600_s4 + $0xf8] sm:$0xff]  ;;  %vm5611_vm9 = vmmov %vm5605_vm6  ;;  %s5638_s4 = smov 88  }
 0x390   : > { %3719 = vmatmul.mubr.msk.bf16.vlgmr.msra.gmra.mrb[0].mxu0 %vm5563_vm7, %v1045_v60  ;;  %v1222_v60 = vsel %vm5605_vm6, %v1217_v47, %v1221_v48  ;;  %v1241_v9 = vor.u32 %v1239_v2, %v1237_v5  ;;  %v1253_v36 = vrot.slane %v1251_v33, 1  ;;  %vm1163_vm7 = vcmask 719872   ;;  %v1371_v33 = vld [vmem:[%s5614_s6 + $0x8] sm:$0xff] }
 0x391   : > { %1286 = vmatpush1.bf16.msra.mxu1 %v1214_v46  ;;  %v1233_v4 = vor.u32 %v1231_v57, %v1229_v62  ;;  %v1243_v6 = vshll.u32 %v1180_v58, 16  ;;  %v1247_v29 = vshrl.u32 %v1180_v58, 16  ;;  %v1182_v46 = vpack.c.bf16 %v955_v38, %v954_v37  ;;  %v1374_v38 = vld [vmem:[%s5614_s6 + $0x20] sm:$0xff] }
 0x392   : > { %1287 = vmatprep.subr.bf16.mxu1 %v3956_v7  ;;  %v1257_v54 = vor.u32 %v1255_v40, %v1253_v36  ;;  %vm1166_vm1 = vcmask 900096   ;;  %v1375_v40 = vld [vmem:[%s5614_s6 + $0x28] sm:$0xff] }
 0x393   : > { %v1238_v8 = vsel %vm5609_vm11, %v1233_v4, %v1237_v5  ;;  %v1245_v10 = vrot.slane %v1243_v6, 1  ;;  %v1259_v49 = vshll.u32 %v1182_v46, 16  ;;  %v1263_v56 = vshrl.u32 %v1182_v46, 16  ;;  %vm5612_vm11 = vmmov %vm5605_vm6  ;;  %v1377_v46 = vld [vmem:[%s5614_s6 + $0x38] sm:$0xff] }
 0x395   : > { %1288 = vmatpush1.bf16.msra.mxu1 %v1222_v60  ;;  %v1246_v53 = vsel %vm5605_vm6, %v1241_v9, %v1245_v10  ;;  %v1249_v32 = vor.u32 %v1247_v29, %v1245_v10  ;;  %v1261_v58 = vrot.slane %v1259_v49, 1  ;;  %vm5613_vm6 = vcmask 1044480   ;;  %v1379_v49 = vld [vmem:[%s5614_s6 + $0x48] sm:$0xff] }
 0x396   : > { %1289 = vmatprep.subr.bf16.mxu1 %v3956_v7 }
 0x397   : > { %v1254_v47 = vsel %vm5611_vm9, %v1249_v32, %v1253_v36  ;;  %v1262_v2 = vsel %vm5612_vm11, %v1257_v54, %v1261_v58  ;;  %vm1154_vm9 = vcmask 179200   ;;  %vm1157_vm11 = vcmask 359424   ;;  %v1370_v32 = vld [vmem:[%s5614_s6] sm:$0xff]  ;;  %v1373_v36 = vld [vmem:[%s5614_s6 + $0x18] sm:$0xff] }
 0x399   : > { %1290 = vmatpush1.bf16.msra.mxu1 %v1230_v3  ;;  %v1265_v3 = vor.u32 %v1263_v56, %v1261_v58  ;;  %v1380_v56 = vld [vmem:[%s5614_s6 + $0x50] sm:$0xff] }
 0x39a   : > { %1291 = vmatprep.subr.bf16.mxu1 %v3956_v7 }
 0x39b   : > { %v1279_v10 = vsel %vm5613_vm6, %v1265_v3, 0  ;;  %vm1160_vm6 = vcmask 539648  }
 0x39d   : > { %1292 = vmatpush1.bf16.msra.mxu1 %v1238_v8 }
 0x39e   : > { %1293 = vmatprep.subr.bf16.mxu1 %v3956_v7 }
 0x3a1   : > { %1294 = vmatpush1.bf16.msra.mxu1 %v1246_v53 }
 0x3a2   : > { %1295 = vmatprep.subr.bf16.mxu1 %v3956_v7 }
 0x3a5   : > { %1296 = vmatpush1.bf16.msra.mxu1 %v1254_v47 }
 0x3a6   : > { %1297 = vmatprep.subr.bf16.mxu1 %v3956_v7 }
 0x3a9   : > { %1298 = vmatpush1.bf16.msra.mxu1 %v1262_v2 }
 0x3aa   : > { %1299 = vmatprep.subr.bf16.mxu1 %v3956_v7 }
 0x3ad   : > { %1300 = vmatpush1.bf16.msra.mxu1 %v1279_v10 }
 0x3ae   : > { %1702 = vmatprep.subr.bf16.mxu1 %v3956_v7 }
 0x463   : > { %v1096_v16 = vpop.f32.mrb[0].mxu0 }
 0x464   : > { %v1097_v13 = vadd.f32 %v1096_v16, %v1056_v14  ;;  %v3720_v20 = vpop.f32.mrb[1].mxu0 }
 0x465   : > { %v1099_v21 = vpop.f32.mrb[2].mxu0 }
 0x466   : > { %v1102_v22 = vmax.f32 %v1097_v13, 0.0  ;;  %v3721_v24 = vpop.f32.mrb[3].mxu0 }
 0x468   : > { %v1107_v25 = vmul.f32 %v1106_v17, %v1102_v22 }
 0x46a   : > { %v1112_v26 = vadd.f32 %v1111_v23, %v1107_v25 }
 0x46c   : > { %v1113_v31 = vpack.c.bf16 %v1112_v26, %v1112_v26 }
 0x46e   : > { %v1115_v34 = vshrl.u32 %v1113_v31, 16  ;;  %v1118_v35 = vshll.u32 %v1113_v31, 16 }
 0x470   : > { %v1117_v42 = vrot.slane %v1115_v34, 6  ;;  %v1120_v43 = vrot.slane %v1118_v35, 7  ;;  %v1372_v34 = vld [vmem:[%s5614_s6 + $0x10] sm:$0xff]  ;;  %v1488_v35 = vpack.c.bf16 %v1371_v33, %v1370_v32 }
 0x471   : > { %v1489_v37 = vpack.c.bf16 %v1373_v36, %v1372_v34 }
 0x472   : > { %v1121_v48 = vor.u32 %v1120_v43, %v1117_v42  ;;  %1508 = vmatpush1.bf16.msra.mxu0 %v1488_v35  ;;  %v1490_v42 = vpack.c.bf16 %v1375_v40, %v1374_v38  ;;  %v1376_v43 = vld [vmem:[%s5614_s6 + $0x30] sm:$0xff] }
 0x473   : > { %1509 = vmatprep.subr.bf16.mxu0 %v3956_v7  ;;  %v1491_v47 = vpack.c.bf16 %v1377_v46, %v1376_v43  ;;  %v1385_v43 = vld [vmem:[%s5614_s6 + $0x78] sm:$0xff] }
 0x474   : > { %v1123_v57 = vsel %vm4120_vm3, 0, %v1121_v48  ;;  %v1378_v48 = vld [vmem:[%s5614_s6 + $0x40] sm:$0xff] }
 0x475   : > { %v1124_v60 = vsel %vm4319_vm10, %v1123_v57, 0  ;;  %v1492_v54 = vpack.c.bf16 %v1379_v49, %v1378_v48  ;;  %v1381_v57 = vld [vmem:[%s5614_s6 + $0x58] sm:$0xff] }
 0x476   : > { %v1135_v61 = vrot.slane %v1124_v60, 1  ;;  %v1126_v62 = vshrl.u32 %v1124_v60, 16  ;;  %v1128_v0 = vshll.u32 %v1124_v60, 16  ;;  %v1143_v5 = vrot.slane %v1124_v60, 2  ;;  %1510 = vmatpush1.bf16.msra.mxu0 %v1489_v37 }
 0x477   : > { %v1151_v53 = vrot.slane %v1124_v60, 3  ;;  %1511 = vmatprep.subr.bf16.mxu0 %v3956_v7  ;;  %v1493_v58 = vpack.c.bf16 %v1381_v57, %v1380_v56 }
 0x478   : > { %1136 = vrot.lane.b32.xlu1 %v1135_v61, %s5582_s18  ;;  %v1130_v4 = vrot.slane %v1128_v0, 1  ;;  %v1138_v8 = vrot.slane %v1126_v62, 1  ;;  %v1139_v9 = vrot.slane %v1128_v0, 2  ;;  %v1146_v16 = vrot.slane %v1126_v62, 2  ;;  %v1383_v61 = vld [vmem:[%s5614_s6 + $0x68] sm:$0xff] }
 0x479   : > { %v1147_v13 = vrot.slane %v1128_v0, 3  ;;  %v1186_v0 = vrot.slane %v4413_v12, %v4278_v39 }
 0x47a   : > { %v1131_v6 = vor.u32 %v1130_v4, %v1126_v62  ;;  %v1140_v14 = vor.u32 %v1139_v9, %v1138_v8  ;;  %1512 = vmatpush1.bf16.msra.mxu0 %v1490_v42  ;;  %v1325_v4 = vrot.slane %v4413_v12, %v4283_v41  ;;  %v1330_v9 = vrot.slane %v4413_v12, %v4286_v44  ;;  %v1384_v42 = vld [vmem:[%s5614_s6 + $0x70] sm:$0xff] }
 0x47b   : > { %v1148_v17 = vor.u32 %v1147_v13, %v1146_v16  ;;  %1513 = vmatprep.subr.bf16.mxu0 %v3956_v7  ;;  %v1495_v56 = vpack.c.bf16 %v1385_v43, %v1384_v42 }
 0x47c   : > { %1144 = vrot.lane.b32.xlu1 %v1143_v5, %s5580_s17  ;;  %1132 = vrot.lane.b32.xlu0 %v1131_v6, %s5575_s24  ;;  %s5623_s24 = smov 110  }
 0x47e   : > { %1514 = vmatpush1.bf16.msra.mxu0 %v1491_v47 }
 0x47f   : > { %1515 = vmatprep.subr.bf16.mxu0 %v3956_v7 }
 0x480   : > { %1152 = vrot.lane.b32.xlu1 %v1151_v53, %s5573_s22  ;;  %1141 = vrot.lane.b32.xlu0 %v1140_v14, %s5571_s15  ;;  %s5621_s22 = smov 4   ;;  %s5622_s15 = smov 66  }
 0x482   : > { %1516 = vmatpush1.bf16.msra.mxu0 %v1492_v54 }
 0x483   : > { %1517 = vmatprep.subr.bf16.mxu0 %v3956_v7 }
 0x484   : > { %1149 = vrot.lane.b32.xlu0 %v1148_v17, %s5569_s21  ;;  %s5620_s21 = smov 22  }
 0x486   : > { %1518 = vmatpush1.bf16.msra.mxu0 %v1493_v58 }
 0x487   : > { %1519 = vmatprep.subr.bf16.mxu0 %v3956_v7 }
 0x4ea   : > { %v1137_v20 = vpop.permute.xlu1 %1136 }
 0x4ee   : > { %v1133_v21 = vpop.permute.xlu0 %1132  ;;  %v1145_v23 = vpop.permute.xlu1 %1144 }
 0x4ef   : > { %v1156_v22 = vsel %vm1154_vm9, %v1124_v60, %v1133_v21  ;;  %v1382_v60 = vld [vmem:[%s5614_s6 + $0x60] sm:$0xff] }
 0x4f0   : > { %v1159_v24 = vsel %vm1157_vm11, %v1156_v22, %v1137_v20  ;;  %v1494_v62 = vpack.c.bf16 %v1383_v61, %v1382_v60 }
 0x4f2   : > { %v1142_v25 = vpop.permute.xlu0 %1141  ;;  %v1153_v27 = vpop.permute.xlu1 %1152  ;;  %1520 = vmatpush1.bf16.msra.mxu0 %v1494_v62 }
 0x4f3   : > { %v1162_v26 = vsel %vm1160_vm6, %v1159_v24, %v1142_v25  ;;  %1521 = vmatprep.subr.bf16.mxu0 %v3956_v7 }
 0x4f4   : > { %v1165_v28 = vsel %vm1163_vm7, %v1162_v26, %v1145_v23 }
 0x4f6   : > { %v1150_v29 = vpop.permute.xlu0 %1149  ;;  %1522 = vmatpush1.bf16.msra.mxu0 %v1495_v56 }
 0x4f7   : > { %v1168_v30 = vsel %vm1166_vm1, %v1165_v28, %v1150_v29  ;;  %v1172_v31 = vsel %vm1170_vm15, %v1150_v29, %v1153_v27  ;;  %1523 = vmatprep.subr.bf16.mxu0 %v3956_v7 }
 0x4f8   : > { %3596 = vmatprep.mubr.msk.bf16.mxu1 %vm1275_vm14, %v1172_v31 }
 0x4f9   : > { %1314 = vmatmul.mubr.bf16.vlgmr.msra.gmra.mrb[8].mxu1 %v1168_v30 }
 0x5cc   : > { %v1315_v2 = vpop.f32.mrb[8].mxu1 }
 0x5cd   : > { %v1316_v3 = vadd.f32 %v1315_v2, %v1186_v0  ;;  %v1317_v5 = vpop.f32.mrb[9].mxu1 }
 0x5ce   : > { %v1318_v6 = vpop.f32.mrb[10].mxu1 }
 0x5cf   : > { %v1321_v8 = vmax.f32 %v1316_v3, 0.0  ;;  %v1319_v10 = vpop.f32.mrb[11].mxu1  ;;  %v1386_v3 = vld [vmem:[%s5614_s6 + $0x80] sm:$0xff] }
 0x5d1   : > { %v1326_v53 = vmul.f32 %v1325_v4, %v1321_v8  ;;  %v1387_v4 = vld [vmem:[%s5614_s6 + $0x88] sm:$0xff] }
 0x5d2   : > { %v1496_v8 = vpack.c.bf16 %v1387_v4, %v1386_v3  ;;  %v1393_v3 = vld [vmem:[%s5614_s6 + $0xb8] sm:$0xff] }
 0x5d3   : > { %v1331_v14 = vadd.f32 %v1330_v9, %v1326_v53 }
 0x5d4   : > { %1524 = vmatpush1.bf16.msra.mxu0 %v1496_v8  ;;  %v1395_v8 = vld [vmem:[%s5614_s6 + $0xc8] sm:$0xff] }
 0x5d5   : > { %v1333_v16 = vcombine.high %v1331_v14, %v1331_v14  ;;  %v1340_v13 = vrot.slane %v1331_v14, %v4293_v63  ;;  %v2126_v17 = vpack.c.bf16 %v1331_v14, %v1331_v14  ;;  %1525 = vmatprep.subr.bf16.mxu0 %v3956_v7 }
 0x5d7   : > { %v1347_v20 = vrot.slane %v1333_v16, %v4293_v63  ;;  %v1348_v21 = vcombine.high %v1340_v13, %v1340_v13  ;;  %v3597_v22 = vrot.slane %v1340_v13, 9  ;;  %v2128_v23 = vshrl.u32 %v2126_v17, 16  ;;  %v1388_v16 = vld [vmem:[%s5614_s6 + $0x90] sm:$0xff] }
 0x5d8   : > { %v2131_v24 = vshll.u32 %v2126_v17, 16 }
 0x5d9   : > { %v1349_v25 = vcombine.high %v1347_v20, %v1347_v20  ;;  %v3598_v26 = vrot.slane %v1348_v21, 9  ;;  %v3599_v27 = vrot.slane %v1347_v20, 9  ;;  %v1366_v28 = vmax.f32 %v1340_v13, %v3597_v22  ;;  %v1389_v13 = vld [vmem:[%s5614_s6 + $0x98] sm:$0xff] }
 0x5da   : > { %v2130_v29 = vrot.slane %v2128_v23, 6  ;;  %v2133_v30 = vrot.slane %v2131_v24, 7 }
 0x5db   : > { %v3600_v12 = vrot.slane %v1349_v25, 9  ;;  %v1367_v31 = vmax.f32 %v1348_v21, %v3598_v26  ;;  %v1368_v32 = vmax.f32 %v1347_v20, %v3599_v27  ;;  %v1420_v33 = vpack.c.bf16 %v1366_v28, %v1366_v28 }
 0x5dc   : > { %v2134_v34 = vor.u32 %v2133_v30, %v2130_v29  ;;  %v1497_v21 = vpack.c.bf16 %v1389_v13, %v1388_v16 }
 0x5dd   : > { %v1369_v35 = vmax.f32 %v1349_v25, %v3600_v12  ;;  %v1421_v36 = vpack.c.bf16 %v1367_v31, %v1367_v31  ;;  %v1422_v37 = vpack.c.bf16 %v1368_v32, %v1368_v32  ;;  %v1428_v38 = vunpack.c.l.b16 %v1420_v33 }
 0x5de   : > { %v2136_v40 = vsel %vm4120_vm3, 0, %v2134_v34 }
 0x5df   : > { %v1423_v46 = vpack.c.bf16 %v1369_v35, %v1369_v35  ;;  %v1429_v47 = vunpack.c.l.b16 %v1421_v36  ;;  %v1430_v48 = vunpack.c.l.b16 %v1422_v37  ;;  %v1432_v49 = vrot.slane %v1428_v38, 5 }
 0x5e0   : > { %v4523_v54 = vsel %vm4319_vm10, %v2136_v40, 0 }
 0x5e1   : > { %v1431_v57 = vunpack.c.l.b16 %v1423_v46  ;;  %v1433_v58 = vrot.slane %v1429_v47, 4  ;;  %v1435_v60 = vrot.slane %v1430_v48, 3  ;;  %v4526_v61 = vshrl.u32 %v4523_v54, 16 }
 0x5e2   : > { %v4529_v62 = vshll.u32 %v4523_v54, 16 }
 0x5e3   : > { %v1434_v0 = vsel %vm983_vm2, %v1433_v58, %v1432_v49  ;;  %v1437_v2 = vrot.slane %v1431_v57, 2  ;;  %v2159_v5 = vrot.slane %v4526_v61, 2  ;;  %vm5616_vm2 = vcmask 1043456   ;;  %v1390_v58 = vld [vmem:[%s5614_s6 + $0xa0] sm:$0xff] }
 0x5e4   : > { %v1436_v6 = vsel %vm986_vm4, %v1435_v60, %v1434_v0  ;;  %v2160_v10 = vrot.slane %v4529_v62, 3  ;;  %vm4544_vm13 = vmand %vm5616_vm2, %vm1443_vm12  ;;  %vm5619_vm4 = vcmask 1044480   ;;  %v1616_v60 = vpack.c.bf16 %v1390_v58, %v1389_v13  ;;  %v1391_v0 = vld [vmem:[%s5614_s6 + $0xa8] sm:$0xff] }
 0x5e5   : > { %v1438_v9 = vsel %vm5615_vm0, %v1437_v2, %v1436_v6  ;;  %v1505_v26 = vsel %vm5619_vm4, %v1497_v21, 0  ;;  %vm5624_vm0 = vmmov 0   ;;  %v1392_v2 = vld [vmem:[%s5614_s6 + $0xb0] sm:$0xff]  ;;  %v1394_v6 = vld [vmem:[%s5614_s6 + $0xc0] sm:$0xff]  ;;  %vm5625_vm12 = vcmask 1046528  }
 0x5e6   : > { %v1439_v53 = vpack.c.b16 %v1438_v9, %v1438_v9  ;;  %v4555_v17 = vor.u32 %v2160_v10, %v2159_v5  ;;  %1526 = vmatpush1.bf16.msra.mxu0 %v1505_v26  ;;  %v1617_v4 = vpack.c.bf16 %v1392_v2, %v1391_v0  ;;  %v1650_v5 = vrot.slane %v1616_v60, 1  ;;  %v1396_v9 = vld [vmem:[%s5614_s6 + $0xd0] sm:$0xff]  ;;  %v1398_v21 = vld [vmem:[%s5614_s6 + $0xe0] sm:$0xff]  ;;  %vm5626_vm2 = vmmov %vm5625_vm12 }
 0x5e7   : > { %3722 = vmatprep.subr.bf16.mxu0 %v3942_v1  ;;  %v1618_v10 = vpack.c.bf16 %v1394_v6, %v1393_v3  ;;  %v1619_v16 = vpack.c.bf16 %v1396_v9, %v1395_v8  ;;  %v1399_v26 = vld [vmem:[%s5614_s6 + $0xe8] sm:$0xff]  ;;  %vm5627_vm4 = vmmov %vm5626_vm2  ;;  %v1409_v0 = vld [vmem:[%s5614_s6 + $0x138] sm:$0xff] }
 0x5e8   : > { %v1441_v20 = vsel %vm4120_vm3, 0, %v1439_v53  ;;  %v1651_v53 = vrot.slane %v1617_v4, 1  ;;  %v1410_v2 = vld [vmem:[%s5614_s6 + $0x140] sm:$0xff]  ;;  %v1411_v6 = vld [vmem:[%s5614_s6 + $0x148] sm:$0xff]  ;;  %v1412_v8 = vld [vmem:[%s5614_s6 + $0x150] sm:$0xff] }
 0x5e9   : > { %v1445_v22 = vsel %vm4544_vm13, %v1441_v20, 0  ;;  %v1653_v13 = vrot.slane %v1618_v10, 1  ;;  %v1397_v20 = vld [vmem:[%s5614_s6 + $0xd8] sm:$0xff] }
 0x5ea   : > { %v1456_v23 = vrot.slane %v1445_v22, 1  ;;  %v1447_v24 = vshrl.u32 %v1445_v22, 16  ;;  %v1449_v25 = vshll.u32 %v1445_v22, 16  ;;  %v1464_v28 = vrot.slane %v1445_v22, 2 }
 0x5eb   : > { %v1472_v31 = vrot.slane %v1445_v22, 3 }
 0x5ec   : > { %1457 = vrot.lane.b32.xlu1 %v1456_v23, %s5582_s18  ;;  %v1451_v27 = vrot.slane %v1449_v25, 1  ;;  %v1459_v30 = vrot.slane %v1447_v24, 1  ;;  %v1460_v12 = vrot.slane %v1449_v25, 2  ;;  %v1467_v33 = vrot.slane %v1447_v24, 2 }
 0x5ed   : > { %v1468_v34 = vrot.slane %v1449_v25, 3  ;;  %v1654_v23 = vsel %vm5626_vm2, %v1651_v53, %v1653_v13  ;;  %v1620_v25 = vpack.c.bf16 %v1398_v21, %v1397_v20 }
 0x5ee   : > { %v1452_v29 = vor.u32 %v1451_v27, %v1447_v24  ;;  %v1461_v32 = vor.u32 %v1460_v12, %v1459_v30  ;;  %v1655_v24 = vrot.slane %v1619_v16, 1  ;;  %v1400_v27 = vld [vmem:[%s5614_s6 + $0xf0] sm:$0xff]  ;;  %v1401_v12 = vld [vmem:[%s5614_s6 + $0xf8] sm:$0xff] }
 0x5ef   : > { %v1469_v35 = vor.u32 %v1468_v34, %v1467_v33  ;;  %v1621_v30 = vpack.c.bf16 %v1400_v27, %v1399_v26  ;;  %v1413_v16 = vld [vmem:[%s5614_s6 + $0x158] sm:$0xff]  ;;  %v4680_v26 = vld [vmem:[%s5634_s5] sm:$0x3f] }
 0x5f0   : > { %1465 = vrot.lane.b32.xlu1 %v1464_v28, %s5580_s17  ;;  %1453 = vrot.lane.b32.xlu0 %v1452_v29, %s5620_s21  ;;  %v1656_v28 = vsel %vm5627_vm4, %v1653_v13, %v1655_v24  ;;  %v1657_v29 = vrot.slane %v1620_v25, 1  ;;  %vm5629_vm4 = vmmov %vm5626_vm2  ;;  %v1414_v13 = vld [vmem:[%s5614_s6 + $0x160] sm:$0xff]  ;;  %v1501_v27 = vrot.slane %v4680_v26, %v4185_v52 }
 0x5f1   : > { %v1659_v33 = vrot.slane %v1621_v30, 1  ;;  %v1551_v30 = vrot.slane %v4680_v26, %v4195_v55 }
 0x5f4   : > { %1473 = vrot.lane.b32.xlu1 %v1472_v31, %s5621_s22  ;;  %1462 = vrot.lane.b32.xlu0 %v1461_v32, %s5622_s15  ;;  %v1402_v31 = vld [vmem:[%s5614_s6 + $0x100] sm:$0xff] }
 0x5f5   : > { %v1622_v34 = vpack.c.bf16 %v1402_v31, %v1401_v12 }
 0x5f8   : > { %1470 = vrot.lane.b32.xlu0 %v1469_v35, %s5623_s24  ;;  %v1403_v35 = vld [vmem:[%s5614_s6 + $0x108] sm:$0xff] }
 0x65e   : > { %v1458_v36 = vpop.permute.xlu1 %1457 }
 0x662   : > { %v1454_v37 = vpop.permute.xlu0 %1453  ;;  %v1466_v40 = vpop.permute.xlu1 %1465 }
 0x663   : > { %v1476_v38 = vsel %vm1154_vm9, %v1445_v22, %v1454_v37  ;;  %v1652_v22 = vsel %vm5625_vm12, %v1650_v5, %v1651_v53  ;;  %vm5628_vm12 = vmmov %vm5626_vm2  ;;  %v1660_v37 = vsel %vm5626_vm2, %v1657_v29, %v1659_v33  ;;  %v1626_v5 = vpack.c.bf16 %v1410_v2, %v1409_v0 }
 0x664   : > { %v1478_v42 = vsel %vm1157_vm11, %v1476_v38, %v1458_v36  ;;  %1703 = vmatpush1.bf16.msra.mxu1 %v1652_v22  ;;  %v1658_v32 = vsel %vm5628_vm12, %v1655_v24, %v1657_v29  ;;  %v1404_v36 = vld [vmem:[%s5614_s6 + $0x110] sm:$0xff]  ;;  %v1661_v38 = vrot.slane %v1622_v34, 1  ;;  %vm5630_vm12 = vmmov %vm5626_vm2  ;;  %v1627_v53 = vpack.c.bf16 %v1412_v8, %v1411_v6 }
 0x665   : > { %1704 = vmatprep.subr.bf16.mxu1 %v3956_v7  ;;  %v1669_v10 = vrot.slane %v1626_v5, 1  ;;  %v1628_v22 = vpack.c.bf16 %v1414_v13, %v1413_v16 }
 0x666   : > { %v1463_v43 = vpop.permute.xlu0 %1462  ;;  %v1474_v47 = vpop.permute.xlu1 %1473  ;;  %v1671_v21 = vrot.slane %v1627_v53, 1 }
 0x667   : > { %v1480_v46 = vsel %vm1160_vm6, %v1478_v42, %v1463_v43  ;;  %v1405_v42 = vld [vmem:[%s5614_s6 + $0x118] sm:$0xff]  ;;  %v1406_v43 = vld [vmem:[%s5614_s6 + $0x120] sm:$0xff]  ;;  %v1673_v24 = vrot.slane %v1628_v22, 1 }
 0x668   : > { %v1482_v48 = vsel %vm1163_vm7, %v1480_v46, %v1466_v40  ;;  %1705 = vmatpush1.bf16.msra.mxu1 %v1654_v23  ;;  %v1623_v40 = vpack.c.bf16 %v1404_v36, %v1403_v35  ;;  %v1662_v46 = vsel %vm5629_vm4, %v1659_v33, %v1661_v38  ;;  %vm5631_vm4 = vmmov %vm5626_vm2  ;;  %v1672_v23 = vsel %vm5626_vm2, %v1669_v10, %v1671_v21 }
 0x669   : > { %1706 = vmatprep.subr.bf16.mxu1 %v3956_v7  ;;  %v1556_v33 = vrot.slane %v4680_v26, %v4200_v59 }
 0x66a   : > { %v1471_v49 = vpop.permute.xlu0 %1470 }
 0x66b   : > { %v1484_v56 = vsel %vm1166_vm1, %v1482_v48, %v1471_v49  ;;  %v1487_v57 = vsel %vm1170_vm15, %v1471_v49, %v1474_v47  ;;  %v1663_v47 = vrot.slane %v1623_v40, 1  ;;  %v1624_v48 = vpack.c.bf16 %v1406_v43, %v1405_v42  ;;  %v1407_v49 = vld [vmem:[%s5614_s6 + $0x128] sm:$0xff] }
 0x66c   : > { %3601 = vmatprep.mubr.msk.bf16.mxu0 %vm1275_vm14, %v1487_v57  ;;  %1707 = vmatpush1.bf16.msra.mxu1 %v1656_v28 }
 0x66d   : > { %1540 = vmatmul.mubr.bf16.vlgmr.msra.gmra.mrb[4].mxu0 %v1484_v56  ;;  %1708 = vmatprep.subr.bf16.mxu1 %v3956_v7  ;;  %v1408_v56 = vld [vmem:[%s5614_s6 + $0x130] sm:$0xff]  ;;  %v1664_v57 = vsel %vm5630_vm12, %v1661_v38, %v1663_v47  ;;  %v1665_v58 = vrot.slane %v1624_v48, 1  ;;  %vm5632_vm12 = vmmov %vm5626_vm2 }
 0x66e   : > { %3728 = vmatprep.mubr.msk.bf16.mxu0 %vm5624_vm0, %v3942_v1  ;;  %v1625_v60 = vpack.c.bf16 %v1408_v56, %v1407_v49  ;;  %v1416_v38 = vld [vmem:[%s5614_s6 + $0x170] sm:$0xff]  ;;  %v1417_v49 = vld [vmem:[%s5614_s6 + $0x178] sm:$0xff]  ;;  %v1418_v56 = vld [vmem:[%s5614_s6 + $0x180] sm:$0x1] }
 0x66f   : > { %v1666_v3 = vsel %vm5626_vm2, %v1663_v47, %v1665_v58 }
 0x670   : > { %1709 = vmatpush1.bf16.msra.mxu1 %v1658_v32  ;;  %v1667_v4 = vrot.slane %v1625_v60, 1  ;;  %v1630_v60 = vpack.c.bf16 %v1418_v56, %v1417_v49 }
 0x671   : > { %1710 = vmatprep.subr.bf16.mxu1 %v3956_v7 }
 0x672   : > { %v1668_v9 = vsel %vm5631_vm4, %v1665_v58, %v1667_v4  ;;  %v1670_v20 = vsel %vm5632_vm12, %v1667_v4, %v1669_v10  ;;  %vm5633_vm4 = vmmov %vm5626_vm2  ;;  %v1677_v2 = vrot.slane %v1630_v60, 1  ;;  %v1757_v60 = vld [vmem:[%s5536_s10 + $0x20] sm:$0xff] }
 0x673   : > { %v1674_v25 = vsel %vm5633_vm4, %v1671_v21, %v1673_v24  ;;  %vm5635_vm12 = vmmov %vm5626_vm2  ;;  %vm5584_vm4 = vcmask 1042432  }
 0x674   : > { %1711 = vmatpush1.bf16.msra.mxu1 %v1660_v37  ;;  %v1415_v37 = vld [vmem:[%s5614_s6 + $0x168] sm:$0xff]  ;;  %v1697_v6 = vsel %vm5584_vm4, 4294967295, %v3943_v15  ;;  %vm1599_vm4 = vcmask 269312  }
 0x675   : > { %1712 = vmatprep.subr.bf16.mxu1 %v3956_v7  ;;  %v1629_v40 = vpack.c.bf16 %v1416_v38, %v1415_v37 }
 0x677   : > { %v1675_v43 = vrot.slane %v1629_v40, 1 }
 0x678   : > { %1713 = vmatpush1.bf16.msra.mxu1 %v1662_v46 }
 0x679   : > { %1714 = vmatprep.subr.bf16.mxu1 %v3956_v7  ;;  %v1676_v48 = vsel %vm5635_vm12, %v1673_v24, %v1675_v43  ;;  %v1678_v4 = vsel %vm5626_vm2, %v1675_v43, %v1677_v2  ;;  %vm5636_vm12 = vcmask 1043456   ;;  %vm1613_vm2 = vcmask 572416  }
 0x67a   : > { %v1698_v53 = vsel %vm5636_vm12, %v1697_v6, 0  ;;  %vm1693_vm12 = vcmask 842752  }
 0x67b   : > { %v1700_v22 = vand.u32 %v1698_v53, %v1677_v2 }
 0x67c   : > { %1715 = vmatpush1.bf16.msra.mxu1 %v1664_v57 }
 0x67d   : > { %1716 = vmatprep.subr.bf16.mxu1 %v3956_v7 }
 0x680   : > { %1717 = vmatpush1.bf16.msra.mxu1 %v1666_v3 }
 0x681   : > { %1718 = vmatprep.subr.bf16.mxu1 %v3956_v7 }
 0x684   : > { %1719 = vmatpush1.bf16.msra.mxu1 %v1668_v9 }
 0x685   : > { %1720 = vmatprep.subr.bf16.mxu1 %v3956_v7 }
 0x688   : > { %1721 = vmatpush1.bf16.msra.mxu1 %v1670_v20 }
 0x689   : > { %1722 = vmatprep.subr.bf16.mxu1 %v3956_v7 }
 0x68c   : > { %1723 = vmatpush1.bf16.msra.mxu1 %v1672_v23 }
 0x68d   : > { %1724 = vmatprep.subr.bf16.mxu1 %v3956_v7 }
 0x690   : > { %1725 = vmatpush1.bf16.msra.mxu1 %v1674_v25 }
 0x691   : > { %1726 = vmatprep.subr.bf16.mxu1 %v3956_v7 }
 0x694   : > { %1727 = vmatpush1.bf16.msra.mxu1 %v1676_v48 }
 0x695   : > { %1728 = vmatprep.subr.bf16.mxu1 %v3956_v7 }
 0x698   : > { %1729 = vmatpush1.bf16.msra.mxu1 %v1678_v4 }
 0x699   : > { %1730 = vmatprep.subr.bf16.mxu1 %v3956_v7 }
 0x69c   : > { %1731 = vmatpush1.bf16.msra.mxu1 %v1700_v22 }
 0x69d   : > { %2326 = vmatprep.subr.bf16.mxu1 %v3956_v7 }
 0x740   : > { %v1541_v28 = vpop.f32.mrb[4].mxu0 }
 0x741   : > { %v1542_v29 = vadd.f32 %v1541_v28, %v1501_v27  ;;  %v1543_v12 = vpop.f32.mrb[5].mxu0  ;;  %v2143_v27 = vrot.slane %v4529_v62, 1 }
 0x742   : > { %v1544_v31 = vpop.f32.mrb[6].mxu0  ;;  %v1754_v12 = vld [vmem:[%s5536_s10 + $0x8] sm:$0xff] }
 0x743   : > { %v1547_v32 = vmax.f32 %v1542_v29, 0.0  ;;  %v1545_v34 = vpop.f32.mrb[7].mxu0  ;;  %v2144_v28 = vor.u32 %v2143_v27, %v4526_v61 }
 0x744   : > { %v2152_v34 = vrot.slane %v4529_v62, 2 }
 0x745   : > { %v1552_v35 = vmul.f32 %v1551_v30, %v1547_v32  ;;  %v1753_v30 = vld [vmem:[%s5536_s10] sm:$0xff]  ;;  %v2148_v32 = vrot.slane %v4523_v54, 1 }
 0x746   : > { %v1821_v31 = vpack.c.bf16 %v1754_v12, %v1753_v30 }
 0x747   : > { %v1557_v36 = vadd.f32 %v1556_v33, %v1552_v35  ;;  %v2151_v33 = vrot.slane %v4526_v61, 1 }
 0x748   : > { %3723 = vmatpush3.bf16.msra.mxu0 %v1821_v31 }
 0x749   : > { %v1558_v42 = vpack.c.bf16 %v1557_v36, %v1557_v36  ;;  %3724 = vmatprep.subr.bf16.mxu0 %v3942_v1  ;;  %v2153_v35 = vor.u32 %v2152_v34, %v2151_v33  ;;  %v2156_v36 = vrot.slane %v4523_v54, 2 }
 0x74b   : > { %v1560_v46 = vshrl.u32 %v1558_v42, 16  ;;  %v1563_v47 = vshll.u32 %v1558_v42, 16 }
 0x74d   : > { %v1562_v57 = vrot.slane %v1560_v46, 6  ;;  %v1565_v58 = vrot.slane %v1563_v47, 7 }
 0x74f   : > { %v1566_v0 = vor.u32 %v1565_v58, %v1562_v57  ;;  %v1755_v57 = vld [vmem:[%s5536_s10 + $0x10] sm:$0xff]  ;;  %v1756_v58 = vld [vmem:[%s5536_s10 + $0x18] sm:$0xff] }
 0x750   : > { %v1822_v2 = vpack.c.bf16 %v1756_v58, %v1755_v57  ;;  %v1782_v57 = vld [vmem:[%s5536_s10 + $0xe8] sm:$0xff]  ;;  %v1783_v58 = vld [vmem:[%s5536_s10 + $0xf0] sm:$0xff] }
 0x751   : > { %v1568_v3 = vsel %vm4120_vm3, 0, %v1566_v0 }
 0x752   : > { %v1569_v5 = vsel %vm4544_vm13, %v1568_v3, 0  ;;  %vm1610_vm13 = vcmask 302080   ;;  %v1823_v3 = vpack.c.bf16 %v1757_v60, %v1757_v60  ;;  %3725 = vmatpush3.bf16.msra.mxu0 %v1822_v2  ;;  %v1766_v2 = vld [vmem:[%s5536_s10 + $0x68] sm:$0xff] }
 0x753   : > { %v1588_v8 = vrot.slane %v1569_v5, 2  ;;  %v1571_v9 = vshrl.u32 %v1569_v5, 16  ;;  %v1573_v10 = vshll.u32 %v1569_v5, 16  ;;  %v1596_v15 = vrot.slane %v1569_v5, 3  ;;  %3726 = vmatprep.subr.bf16.mxu0 %v3942_v1 }
 0x754   : > { %v1580_v29 = vrot.slane %v1569_v5, 1 }
 0x755   : > { %1589 = vrot.lane.b32.xlu1 %v1588_v8, %s5621_s22  ;;  %v1591_v16 = vrot.slane %v1571_v9, 2  ;;  %v1592_v13 = vrot.slane %v1573_v10, 3  ;;  %v1583_v20 = vrot.slane %v1571_v9, 1  ;;  %v1584_v21 = vrot.slane %v1573_v10, 2  ;;  %v1759_v8 = vld [vmem:[%s5536_s10 + $0x30] sm:$0xff] }
 0x756   : > { %v1575_v24 = vrot.slane %v1573_v10, 1  ;;  %v1634_v10 = vrot.slane %v4680_v26, %v4278_v39 }
 0x757   : > { %v1593_v14 = vor.u32 %v1592_v13, %v1591_v16  ;;  %v1585_v23 = vor.u32 %v1584_v21, %v1583_v20  ;;  %v1761_v13 = vld [vmem:[%s5536_s10 + $0x40] sm:$0xff]  ;;  %v1746_v21 = vrot.slane %v4680_v26, %v4283_v41 }
 0x758   : > { %v1576_v25 = vor.u32 %v1575_v24, %v1571_v9  ;;  %v1760_v9 = vld [vmem:[%s5536_s10 + $0x38] sm:$0xff] }
 0x759   : > { %1594 = vrot.lane.b32.xlu1 %v1593_v14, %s3963_s16  ;;  %1586 = vrot.lane.b32.xlu0 %v1585_v23, %s3964_s29  ;;  %v1873_v53 = vpack.c.bf16 %v1760_v9, %v1759_v8  ;;  %v1784_v8 = vld [vmem:[%s5536_s10 + $0xf8] sm:$0xff]  ;;  %v1785_v9 = vld [vmem:[%s5536_s10 + $0x100] sm:$0xff] }
 0x75b   : > { %v1887_v12 = vshrl.u32 %v1873_v53, 16 }
 0x75d   : > { %1597 = vrot.lane.b32.xlu1 %v1596_v15, %s3965_s23  ;;  %1577 = vrot.lane.b32.xlu0 %v1576_v25, %s3966_s14  ;;  %v1883_v15 = vshll.u32 %v1873_v53, 16  ;;  %v1874_v25 = vpack.c.bf16 %v1761_v13, %v1761_v13 }
 0x75f   : > { %v1885_v33 = vrot.slane %v1883_v15, 1  ;;  %v1891_v34 = vshll.u32 %v1874_v25, 16  ;;  %v1769_v15 = vld [vmem:[%s5536_s10 + $0x80] sm:$0xff] }
 0x761   : > { %2145 = vrot.lane.b32.xlu1 %v2144_v28, %s5620_s21  ;;  %1581 = vrot.lane.b32.xlu0 %v1580_v29, %s5622_s15  ;;  %v1751_v29 = vrot.slane %v4680_v26, %v4286_v44 }
 0x765   : > { %2149 = vrot.lane.b32.xlu1 %v2148_v32, %s5637_s3 }
 0x769   : > { %2154 = vrot.lane.b32.xlu1 %v2153_v35, %s5622_s15 }
 0x76d   : > { %2157 = vrot.lane.b32.xlu1 %v2156_v36, %s5638_s4 }
 0x7c7   : > { %v1590_v37 = vpop.permute.xlu1 %1589 }
 0x7cb   : > { %v1595_v38 = vpop.permute.xlu1 %1594  ;;  %v1587_v40 = vpop.permute.xlu0 %1586 }
 0x7cc   : > { %v1609_v42 = vsel %vm1170_vm15, %v1587_v40, %v1590_v37 }
 0x7cd   : > { %v1612_v62 = vsel %vm1610_vm13, %v1609_v42, %v1595_v38  ;;  %vm5639_vm13 = vcmask 1040384   ;;  %v1889_v38 = vor.u32 %v1887_v12, %v1885_v33  ;;  %v1895_v42 = vshrl.u32 %v1874_v25, 16  ;;  %v1770_v25 = vld [vmem:[%s5536_s10 + $0x88] sm:$0xff] }
 0x7ce   : > { %v1828_v0 = vsel %vm5639_vm13, 65535, %v3956_v7 }
 0x7cf   : > { %v1598_v61 = vpop.permute.xlu1 %1597  ;;  %v1578_v43 = vpop.permute.xlu0 %1577  ;;  %v1830_v4 = vand.u32 %v1828_v0, %v1823_v3 }
 0x7d0   : > { %v1615_v46 = vsel %vm1613_vm2, %v1612_v62, %v1598_v61  ;;  %v1601_v47 = vsel %vm1599_vm4, %v1569_v5, %v1578_v43  ;;  %v1758_v5 = vld [vmem:[%s5536_s10 + $0x28] sm:$0xff]  ;;  %v1900_v61 = vand.u32 %v1895_v42, %v1828_v0  ;;  %v1763_v43 = vld [vmem:[%s5536_s10 + $0x50] sm:$0xff]  ;;  %v1765_v0 = vld [vmem:[%s5536_s10 + $0x60] sm:$0xff] }
 0x7d1   : > { %3602 = vmatprep.mubr.msk.bf16.mxu1 %vm1693_vm12, %v1615_v46  ;;  %3727 = vmatpush3.bf16.msra.mxu0 %v1830_v4  ;;  %v1872_v6 = vpack.c.bf16 %v1758_v5, %v1757_v60  ;;  %v1762_v62 = vld [vmem:[%s5536_s10 + $0x48] sm:$0xff]  ;;  %v1764_v46 = vld [vmem:[%s5536_s10 + $0x58] sm:$0xff]  ;;  %v2191_v5 = vpack.c.bf16 %v1783_v58, %v1782_v57  ;;  %v1791_v42 = vld [vmem:[%s5536_s10 + $0x130] sm:$0xff] }
 0x7d2   : > { %3732 = vmatprep.subr.bf16.mxu0 %v3942_v1 }
 0x7d3   : > { %v1582_v48 = vpop.permute.xlu0 %1581  ;;  %v1878_v16 = vshll.u32 %v1872_v6, 16  ;;  %v1876_v22 = vshrl.u32 %v1872_v6, 16  ;;  %v2182_v6 = vpack.c.bf16 %v1766_v2, %v1765_v0  ;;  %v3967_v2 = vmov 1966171168  }
 0x7d4   : > { %v1603_v49 = vsel %vm1160_vm6, %v1601_v47, %v1582_v48  ;;  %v2180_v47 = vpack.c.bf16 %v1762_v62, %v1761_v13  ;;  %v2181_v48 = vpack.c.bf16 %v1764_v46, %v1763_v43  ;;  %v1768_v13 = vld [vmem:[%s5536_s10 + $0x78] sm:$0xff] }
 0x7d5   : > { %v1606_v56 = vsel %vm1604_vm8, %v1603_v49, %v1587_v40  ;;  %v1880_v24 = vrot.slane %v1878_v16, 1  ;;  %vm5640_vm8 = vsmask.f32 7424  ;;  %v1893_v40 = vrot.slane %v1891_v34, 1  ;;  %v4786_v49 = vld [vmem:[%s5536_s10 + $0xd8] sm:$0xff]  ;;  %v1771_v34 = vld [vmem:[%s5536_s10 + $0x90] sm:$0xff] }
 0x7d6   : > { %1735 = vmatmul.mubr.bf16.vlgmr.msra.gmra.mrb[12].mxu1 %v1606_v56  ;;  %vm5641_vm2 = vmmov %vm5640_vm8  ;;  %v1781_v56 = vld [vmem:[%s5536_s10 + $0xe0] sm:$0xff]  ;;  %v2293_v3 = vrot.slane %v2180_v47, 1  ;;  %v2294_v4 = vrot.slane %v2181_v48, 1  ;;  %v2192_v16 = vpack.c.bf16 %v1785_v9, %v1784_v8 }
 0x7d7   : > { %v1881_v32 = vor.u32 %v1880_v24, %v1876_v22  ;;  %v1894_v26 = vsel %vm5641_vm2, %v1889_v38, %v1893_v40  ;;  %v2190_v60 = vpack.c.bf16 %v1781_v56, %v4786_v49  ;;  %v1790_v40 = vld [vmem:[%s5536_s10 + $0x128] sm:$0xff] }
 0x7d8   : > { %v2195_v47 = vpack.c.bf16 %v1791_v42, %v1790_v40 }
 0x7d9   : > { %v1886_v37 = vsel %vm5640_vm8, %v1881_v32, %v1885_v33  ;;  %v2210_v53 = vrot.slane %v2190_v60, 2  ;;  %v2184_v33 = vpack.c.bf16 %v1770_v25, %v1769_v15 }
 0x7da   : > { %v4862_v58 = vrot.slane %v2195_v47, 2 }
 0x8a9   : > { %v1736_v20 = vpop.f32.mrb[12].mxu1 }
 0x8aa   : > { %v1737_v14 = vadd.f32 %v1736_v20, %v1634_v10  ;;  %v1738_v23 = vpop.f32.mrb[13].mxu1  ;;  %v1767_v10 = vld [vmem:[%s5536_s10 + $0x70] sm:$0xff]  ;;  %v1786_v20 = vld [vmem:[%s5536_s10 + $0x108] sm:$0xff] }
 0x8ab   : > { %v1739_v27 = vpop.f32.mrb[14].mxu1  ;;  %v2296_v23 = vrot.slane %v2182_v6, 1  ;;  %v2183_v24 = vpack.c.bf16 %v1768_v13, %v1767_v10 }
 0x8ac   : > { %v1742_v28 = vmax.f32 %v1737_v14, 0.0  ;;  %v1740_v30 = vpop.f32.mrb[15].mxu1  ;;  %v2211_v14 = vrot.slane %v2191_v5, 2  ;;  %v2213_v27 = vrot.slane %v2192_v16, 2 }
 0x8ad   : > { %v1789_v30 = vld [vmem:[%s5536_s10 + $0x120] sm:$0xff]  ;;  %v2298_v32 = vrot.slane %v2183_v24, 1 }
 0x8ae   : > { %v1747_v31 = vmul.f32 %v1746_v21, %v1742_v28  ;;  %v1787_v21 = vld [vmem:[%s5536_s10 + $0x110] sm:$0xff]  ;;  %v2212_v12 = vsel %vm512_vm5, %v2210_v53, %v2211_v14  ;;  %v4878_v53 = vld [vmem:[%s5535_s9] sm:$0x7f] }
 0x8af   : > { %v2193_v28 = vpack.c.bf16 %v1787_v21, %v1786_v20  ;;  %v2023_v16 = vrot.slane %v4878_v53, %v4185_v52 }
 0x8b0   : > { %v1752_v35 = vadd.f32 %v1751_v29, %v1747_v31  ;;  %v1788_v29 = vld [vmem:[%s5536_s10 + $0x118] sm:$0xff] }
 0x8b1   : > { %v2194_v38 = vpack.c.bf16 %v1789_v30, %v1788_v29  ;;  %v2025_v21 = vcombine.high %v2023_v16, %v2023_v16  ;;  %v2032_v15 = vrot.slane %v2023_v16, %v4293_v63 }
 0x8b2   : > { %v1820_v36 = vpack.c.bf16 %v1752_v35, %v1752_v35  ;;  %v1772_v35 = vld [vmem:[%s5536_s10 + $0x98] sm:$0xff] }
 0x8b3   : > { %v2185_v62 = vpack.c.bf16 %v1772_v35, %v1771_v34  ;;  %v2217_v46 = vrot.slane %v2194_v38, 2  ;;  %v2039_v30 = vrot.slane %v2025_v21, %v4293_v63  ;;  %v2040_v35 = vcombine.high %v2032_v15, %v2032_v15 }
 0x8b4   : > { %3729 = vmatmul.mubr.msk.bf16.vlgmr.msra.gmra.mrb[8].mxu0 %vm1599_vm4, %v1820_v36 }
 0x8b5   : > { %3733 = vmatpush3.bf16.msra.mxu0 %v1886_v37  ;;  %3738 = vmatprep.mubr.msk.bf16.mxu0 %vm5624_vm0, %v3942_v1  ;;  %v2215_v37 = vrot.slane %v2193_v28, 2  ;;  %v4858_v56 = vrot.slane %v2185_v62, 1  ;;  %v2220_v0 = vsel %vm512_vm5, %v2217_v46, %v4862_v58  ;;  %v2041_v42 = vcombine.high %v2039_v30, %v2039_v30 }
 0x8b6   : > { %3734 = vmatprep.subr.bf16.mxu0 %v3942_v1 }
 0x8b7   : > { %v2216_v43 = vsel %vm512_vm5, %v2213_v27, %v2215_v37  ;;  %v2218_v57 = vsel %vm512_vm5, %v2215_v37, %v2217_v46 }
 0x8b9   : > { %3735 = vmatpush3.bf16.msra.mxu0 %v1894_v26 }
 0x8ba   : > { %3736 = vmatprep.subr.bf16.mxu0 %v3942_v1 }
 0x8bd   : > { %3737 = vmatpush3.bf16.msra.mxu0 %v1900_v61  ;;  %v2300_v61 = vrot.slane %v2184_v33, 1 }
 0x8be   : > { %2243 = vmatprep.subr.bf16.mxu0 %v3956_v7 }
 0x8c0   : > { %3739 = vmatmul.mubr.msk.bf16.vlgmr.msra.gmra.mrb[12].mxu0 %vm1599_vm4, %v1820_v36  ;;  %vm5642_vm4 = vcmask 1046528   ;;  %v2214_v36 = vsel %vm512_vm5, %v2211_v14, %v2213_v27 }
 0x8c1   : > { %v2295_v22 = vsel %vm5642_vm4, %v2293_v3, %v2294_v4  ;;  %vm5643_vm12 = vmmov %vm5642_vm4  ;;  %2244 = vmatpush1.bf16.msra.mxu0 %v2212_v12  ;;  %v1944_v3 = vunpack.c.l.s4 %v3967_v2 }
 0x8c2   : > { %2327 = vmatpush1.bf16.msra.mxu1 %v2295_v22  ;;  %v2297_v31 = vsel %vm5643_vm12, %v2294_v4, %v2296_v23  ;;  %2245 = vmatprep.subr.bf16.mxu0 %v3956_v7  ;;  %vm5644_vm13 = vmmov %vm5642_vm4 }
 0x8c3   : > { %2328 = vmatprep.subr.bf16.mxu1 %v3956_v7  ;;  %v2299_v26 = vsel %vm5644_vm13, %v2296_v23, %v2298_v32  ;;  %vm5645_vm8 = vmmov %vm5642_vm4  ;;  %v1945_v5 = vunpack.c.0.s8 %v1944_v3 }
 0x8c4   : > { %v2301_v48 = vsel %vm5645_vm8, %v2298_v32, %v2300_v61  ;;  %vm5646_vm2 = vmmov %vm5642_vm4  ;;  %vm5647_vm4 = vcmask 1040384  }
 0x8c5   : > { %2246 = vmatpush1.bf16.msra.mxu0 %v2214_v36  ;;  %v2303_v60 = vsel %vm5646_vm2, %v2300_v61, %v4858_v56  ;;  %v4873_v10 = vsub.s32 %v1945_v5, %v4182_v51  ;;  %vm5648_vm12 = vmmov %vm5647_vm4 }
 0x8c6   : > { %2329 = vmatpush1.bf16.msra.mxu1 %v2297_v31  ;;  %2247 = vmatprep.subr.bf16.mxu0 %v3956_v7  ;;  %vm5649_vm13 = vmmov %vm5647_vm4 }
 0x8c7   : > { %2330 = vmatprep.subr.bf16.mxu1 %v3956_v7  ;;  %vm5650_vm8 = vmmov %vm5647_vm4 }
 0x8c9   : > { %2248 = vmatpush1.bf16.msra.mxu0 %v2216_v43 }
 0x8ca   : > { %2331 = vmatpush1.bf16.msra.mxu1 %v2299_v26  ;;  %2249 = vmatprep.subr.bf16.mxu0 %v3956_v7 }
 0x8cb   : > { %2332 = vmatprep.subr.bf16.mxu1 %v3956_v7 }
 0x8cd   : > { %2250 = vmatpush1.bf16.msra.mxu0 %v2218_v57 }
 0x8ce   : > { %2333 = vmatpush1.bf16.msra.mxu1 %v2301_v48  ;;  %2251 = vmatprep.subr.bf16.mxu0 %v3956_v7 }
 0x8cf   : > { %2334 = vmatprep.subr.bf16.mxu1 %v3956_v7 }
 0x8d1   : > { %2252 = vmatpush1.bf16.msra.mxu0 %v2220_v0 }
 0x8d2   : > { %2335 = vmatpush1.bf16.msra.mxu1 %v2303_v60  ;;  %2253 = vmatprep.subr.bf16.mxu0 %v3956_v7 }
 0x8d3   : > { %2336 = vmatprep.subr.bf16.mxu1 %v3956_v7 }
 0x987   : > { %v1866_v4 = vpop.f32.mrb[8].mxu0 }
 0x988   : > { %v3730_v6 = vpop.f32.mrb[9].mxu0  ;;  %v1949_v13 = vrot.slane %v1866_v4, %v4873_v10 }
 0x989   : > { %v1869_v8 = vpop.f32.mrb[10].mxu0  ;;  %v1773_v6 = vld [vmem:[%s5536_s10 + $0xa0] sm:$0xff] }
 0x98a   : > { %v3731_v9 = vpop.f32.mrb[11].mxu0  ;;  %v1950_v22 = vcombine.high %v1949_v13, %v1949_v13  ;;  %v1957_v24 = vrot.slane %v1949_v13, %v4873_v10  ;;  %v1774_v8 = vld [vmem:[%s5536_s10 + $0xa8] sm:$0xff]  ;;  %v1793_v13 = vld [vmem:[%s5536_s10 + $0x140] sm:$0xff] }
 0x98b   : > { %v1792_v9 = vld [vmem:[%s5536_s10 + $0x138] sm:$0xff]  ;;  %v2186_v16 = vpack.c.bf16 %v1774_v8, %v1773_v6 }
 0x98c   : > { %v1964_v12 = vrot.slane %v1950_v22, %v4873_v10  ;;  %v1965_v34 = vcombine.high %v1957_v24, %v1957_v24  ;;  %v2196_v21 = vpack.c.bf16 %v1793_v13, %v1792_v9 }
 0x98d   : > { %v2304_v22 = vrot.slane %v2186_v16, 1 }
 0x98e   : > { %v1966_v26 = vcombine.high %v1964_v12, %v1964_v12 }
 0x993   : > { %v1936_v20 = vpop.f32.mrb[12].mxu0 }
 0x994   : > { %v1978_v14 = vrot.slane %v1936_v20, %v4873_v10  ;;  %v3740_v23 = vpop.f32.mrb[13].mxu0 }
 0x995   : > { %v1939_v25 = vpop.f32.mrb[14].mxu0 }
 0x996   : > { %v1979_v27 = vcombine.high %v1978_v14, %v1978_v14  ;;  %v1986_v28 = vrot.slane %v1978_v14, %v4873_v10  ;;  %v3741_v29 = vpop.f32.mrb[15].mxu0  ;;  %v1776_v25 = vld [vmem:[%s5536_s10 + $0xb8] sm:$0xff] }
 0x998   : > { %v1993_v31 = vrot.slane %v1979_v27, %v4873_v10  ;;  %v1994_v32 = vcombine.high %v1986_v28, %v1986_v28  ;;  %v1999_v33 = vrot.slane %v1986_v28, %v4185_v52  ;;  %v1794_v27 = vld [vmem:[%s5536_s10 + $0x148] sm:$0xff]  ;;  %v2305_v28 = vsel %vm5646_vm2, %v4858_v56, %v2304_v22 }
 0x999   : > { %2337 = vmatpush1.bf16.msra.mxu1 %v2305_v28 }
 0x99a   : > { %v1995_v36 = vcombine.high %v1993_v31, %v1993_v31  ;;  %v2003_v37 = vrot.slane %v1993_v31, %v4185_v52  ;;  %v2007_v38 = vrot.slane %v1994_v32, %v4185_v52  ;;  %v2016_v40 = vsel %vm5647_vm4, %v1957_v24, %v1999_v33  ;;  %2338 = vmatprep.subr.bf16.mxu1 %v3956_v7  ;;  %vm5651_vm4 = vmmov %vm5646_vm2 }
 0x99b   : > { %v2046_v46 = vadd.f32 %v2032_v15, %v2016_v40  ;;  %v2221_v24 = vrot.slane %v2196_v21, 2  ;;  %v1775_v15 = vld [vmem:[%s5536_s10 + $0xb0] sm:$0xff] }
 0x99c   : > { %v2011_v61 = vrot.slane %v1995_v36, %v4185_v52  ;;  %v2017_v62 = vsel %vm5648_vm12, %v1964_v12, %v2003_v37  ;;  %v2018_v43 = vsel %vm5649_vm13, %v1965_v34, %v2007_v38  ;;  %v2187_v29 = vpack.c.bf16 %v1776_v25, %v1775_v15  ;;  %v1777_v37 = vld [vmem:[%s5536_s10 + $0xc0] sm:$0xff]  ;;  %v1778_v38 = vld [vmem:[%s5536_s10 + $0xc8] sm:$0xff]  ;;  %vm5652_vm12 = vmmov %vm5646_vm2 }
 0x99d   : > { %v2047_v47 = vadd.f32 %v2040_v35, %v2017_v62  ;;  %v2048_v57 = vadd.f32 %v2039_v30, %v2018_v43  ;;  %v1795_v30 = vld [vmem:[%s5536_s10 + $0x150] sm:$0xff]  ;;  %v2222_v32 = vsel %vm512_vm5, %v4862_v58, %v2221_v24  ;;  %vm5653_vm13 = vmmov %vm5646_vm2 }
 0x99e   : > { %v2019_v48 = vsel %vm5650_vm8, %v1966_v26, %v2011_v61  ;;  %v2197_v33 = vpack.c.bf16 %v1795_v30, %v1794_v27  ;;  %2254 = vmatpush1.bf16.msra.mxu0 %v2222_v32  ;;  %v2306_v34 = vrot.slane %v2187_v29, 1  ;;  %v1796_v26 = vld [vmem:[%s5536_s10 + $0x158] sm:$0xff]  ;;  %v1797_v61 = vld [vmem:[%s5536_s10 + $0x160] sm:$0xff]  ;;  %vm5654_vm8 = vcmask 1044480  }
 0x99f   : > { %v2049_v60 = vadd.f32 %v2041_v42, %v2019_v48  ;;  %v2054_v0 = vcombine.low %v2046_v46, %v2047_v47  ;;  %2255 = vmatprep.subr.bf16.mxu0 %v3956_v7  ;;  %v2188_v42 = vpack.c.bf16 %v1778_v38, %v1777_v37  ;;  %v2198_v43 = vpack.c.bf16 %v1797_v61, %v1796_v26  ;;  %vm5655_vm2 = vmmov %vm5654_vm8 }
 0x9a0   : > { %v2223_v56 = vrot.slane %v2197_v33, 2  ;;  %v2307_v36 = vsel %vm5651_vm4, %v2304_v22, %v2306_v34  ;;  %vm5656_vm4 = vmmov %vm5655_vm2 }
 0x9a1   : > { %v2055_v2 = vcombine.low %v2048_v57, %v2049_v60  ;;  %v2062_v3 = vrot.slane %v2054_v0, %v4293_v63  ;;  %2339 = vmatpush1.bf16.msra.mxu1 %v2307_v36  ;;  %v2308_v57 = vrot.slane %v2188_v42, 1  ;;  %v2225_v60 = vrot.slane %v2198_v43, 2  ;;  %v1779_v0 = vld [vmem:[%s5536_s10 + $0xd0] sm:$0xff] }
 0x9a2   : > { %v2224_v40 = vsel %vm512_vm5, %v2221_v24, %v2223_v56  ;;  %2340 = vmatprep.subr.bf16.mxu1 %v3956_v7  ;;  %v2189_v9 = vpack.c.bf16 %v4786_v49, %v1779_v0 }
 0x9a3   : > { %v2069_v4 = vrot.slane %v2055_v2, %v4293_v63  ;;  %2256 = vmatpush1.bf16.msra.mxu0 %v2224_v40  ;;  %v1798_v2 = vld [vmem:[%s5536_s10 + $0x168] sm:$0xff]  ;;  %v2309_v6 = vsel %vm5652_vm12, %v2306_v34, %v2308_v57  ;;  %v2226_v8 = vsel %vm512_vm5, %v2223_v56, %v2225_v60  ;;  %vm5657_vm12 = vmmov %vm5655_vm2 }
 0x9a4   : > { %2257 = vmatprep.subr.bf16.mxu0 %v3956_v7  ;;  %v2310_v21 = vrot.slane %v2189_v9, 1  ;;  %v1803_v9 = vld [vmem:[%s5536_s10 + $0x190] sm:$0xff] }
 0x9a5   : > { %v2070_v5 = vcombine.low %v2062_v3, %v2069_v4  ;;  %v4964_v3 = vld [vmem:[%s5536_s10 + $0x170] sm:$0xff]  ;;  %2341 = vmatpush1.bf16.msra.mxu1 %v2309_v6 }
 0x9a6   : > { %2342 = vmatprep.subr.bf16.mxu1 %v3956_v7  ;;  %v2324_v25 = vsel %vm5654_vm8, %v2310_v21, 0  ;;  %vm5659_vm8 = vmmov %vm5655_vm2 }
 0x9a7   : > { %v2072_v20 = vpack.c.bf16 %v2070_v5, %v2070_v5  ;;  %2258 = vmatpush1.bf16.msra.mxu0 %v2226_v8 }
 0x9a8   : > { %2259 = vmatprep.subr.bf16.mxu0 %v3956_v7 }
 0x9a9   : > { %v2074_v14 = vshrl.u32 %v2072_v20, 16  ;;  %v2077_v23 = vshll.u32 %v2072_v20, 16  ;;  %v2199_v20 = vpack.c.bf16 %v4964_v3, %v1798_v2 }
 0x9ab   : > { %v2076_v12 = vrot.slane %v2074_v14, 6  ;;  %v2079_v31 = vrot.slane %v2077_v23, 7  ;;  %v2227_v22 = vrot.slane %v2199_v20, 2  ;;  %v2311_v14 = vsel %vm5653_vm13, %v2308_v57, %v2310_v21  ;;  %v1806_v21 = vld [vmem:[%s5536_s10 + $0x1a8] sm:$0xff]  ;;  %vm5658_vm13 = vmmov %vm5655_vm2 }
 0x9ac   : > { %v2164_v23 = vrot.slane %v4523_v54, 3  ;;  %2343 = vmatpush1.bf16.msra.mxu1 %v2311_v14 }
 0x9ad   : > { %v2080_v35 = vor.u32 %v2079_v31, %v2076_v12  ;;  %v2228_v15 = vsel %vm512_vm5, %v2225_v60, %v2227_v22  ;;  %2344 = vmatprep.subr.bf16.mxu1 %v3956_v7  ;;  %v2241_v27 = vsel %vm5655_vm2, %v2227_v22, 0  ;;  %v2146_v31 = vpop.permute.xlu1 %2145 }
 0x9ae   : > { %2260 = vmatpush1.bf16.msra.mxu0 %v2228_v15 }
 0x9af   : > { %v2082_v58 = vsel %vm4120_vm3, 0, %v2080_v35  ;;  %2261 = vmatprep.subr.bf16.mxu0 %v3956_v7 }
 0x9b0   : > { %v4948_v62 = vsel %vm4319_vm10, %v2082_v58, 0  ;;  %2345 = vmatpush1.bf16.msra.mxu1 %v2324_v25 }
 0x9b1   : > { %v2094_v46 = vrot.slane %v4948_v62, 1  ;;  %v2085_v47 = vshrl.u32 %v4948_v62, 16  ;;  %v2087_v48 = vshll.u32 %v4948_v62, 16  ;;  %v2102_v16 = vrot.slane %v4948_v62, 2  ;;  %3742 = vmatprep.subr.bf16.mxu1 %v3942_v1  ;;  %v2150_v32 = vpop.permute.xlu1 %2149 }
 0x9b2   : > { %v2110_v49 = vrot.slane %v4948_v62, 3  ;;  %2262 = vmatpush1.bf16.msra.mxu0 %v2241_v27 }
 0x9b3   : > { %2095 = vrot.lane.b32.xlu0 %v2094_v46, %s5637_s3  ;;  %v2105_v4 = vrot.slane %v2085_v47, 2  ;;  %v2106_v5 = vrot.slane %v2087_v48, 3  ;;  %v2089_v24 = vrot.slane %v2087_v48, 1  ;;  %v2097_v29 = vrot.slane %v2085_v47, 1  ;;  %2493 = vmatprep.subr.bf16.mxu0 %v3956_v7 }
 0x9b4   : > { %v2098_v30 = vrot.slane %v2087_v48, 2 }
 0x9b5   : > { %v2107_v13 = vor.u32 %v2106_v5, %v2105_v4  ;;  %v2090_v28 = vor.u32 %v2089_v24, %v2085_v47  ;;  %v2155_v33 = vpop.permute.xlu1 %2154  ;;  %v1801_v4 = vld [vmem:[%s5536_s10 + $0x180] sm:$0xff]  ;;  %v1802_v5 = vld [vmem:[%s5536_s10 + $0x188] sm:$0xff]  ;;  %v1808_v24 = vld [vmem:[%s5536_s10 + $0x1b8] sm:$0xff] }
 0x9b6   : > { %v2099_v12 = vor.u32 %v2098_v30, %v2097_v29  ;;  %v2437_v8 = vpack.c.bf16 %v1802_v5, %v1801_v4  ;;  %v1809_v29 = vld [vmem:[%s5536_s10 + $0x1c0] sm:$0xff]  ;;  %v1810_v30 = vld [vmem:[%s5536_s10 + $0x1c8] sm:$0xff]  ;;  %v2375_v4 = vrot.slane %v4878_v53, %v4200_v59 }
 0x9b7   : > { %2103 = vrot.lane.b32.xlu0 %v2102_v16, %s5638_s4  ;;  %2108 = vrot.lane.b32.xlu1 %v2107_v13, %s5623_s24  ;;  %v1804_v16 = vld [vmem:[%s5536_s10 + $0x198] sm:$0xff]  ;;  %v1805_v13 = vld [vmem:[%s5536_s10 + $0x1a0] sm:$0xff] }
 0x9b8   : > { %v2438_v20 = vpack.c.bf16 %v1804_v16, %v1803_v9  ;;  %v2439_v14 = vpack.c.bf16 %v1806_v21, %v1805_v13  ;;  %v2380_v16 = vrot.slane %v4878_v53, %v4278_v39 }
 0x9b9   : > { %v2158_v35 = vpop.permute.xlu1 %2157 }
 0x9ba   : > { %v2465_v27 = vrot.slane %v2439_v14, 3  ;;  %v1816_v14 = vld [vmem:[%s5536_s10 + $0x1f8] sm:$0xff] }
 0x9bb   : > { %2111 = vrot.lane.b32.xlu0 %v2110_v49, %s5621_s22  ;;  %2165 = vrot.lane.b32.xlu1 %v2164_v23, %s5621_s22  ;;  %v2463_v49 = vrot.slane %v2438_v20, 3  ;;  %v1807_v23 = vld [vmem:[%s5536_s10 + $0x1b0] sm:$0xff] }
 0x9bf   : > { %2091 = vrot.lane.b32.xlu0 %v2090_v28, %s5620_s21  ;;  %v2440_v28 = vpack.c.bf16 %v1808_v24, %v1807_v23 }
 0x9c3   : > { %2100 = vrot.lane.b32.xlu0 %v2099_v12, %s5622_s15  ;;  %v2466_v12 = vsel %vm5658_vm13, %v2463_v49, %v2465_v27  ;;  %vm5662_vm13 = vmmov %vm5655_vm2 }
 0x9c7   : > { %2162 = vrot.lane.b32.xlu0 %v4555_v17, %s5623_s24  ;;  %v2168_v17 = vsel %vm1154_vm9, %v4523_v54, %v2146_v31  ;;  %v1800_v54 = vld [vmem:[%s5536_s10 + $0x178] sm:$0xff]  ;;  %v2467_v31 = vrot.slane %v2440_v28, 3  ;;  %v1817_v28 = vld [vmem:[%s5536_s10 + $0x200] sm:$0xff] }
 0x9c8   : > { %v2170_v43 = vsel %vm1157_vm11, %v2168_v17, %v2150_v32  ;;  %v2436_v6 = vpack.c.bf16 %v1800_v54, %v4964_v3  ;;  %v2461_v3 = vrot.slane %v2437_v8, 3  ;;  %v2441_v32 = vpack.c.bf16 %v1810_v30, %v1809_v29  ;;  %v1818_v29 = vld [vmem:[%s5536_s10 + $0x208] sm:$0xff] }
 0x9c9   : > { %v2172_v47 = vsel %vm1160_vm6, %v2170_v43, %v2155_v33  ;;  %v1811_v33 = vld [vmem:[%s5536_s10 + $0x1d0] sm:$0xff]  ;;  %v3004_v8 = vshll.u32 %v4298_v11, 16 }
 0x9ca   : > { %v2174_v57 = vsel %vm1163_vm7, %v2172_v47, %v2158_v35  ;;  %v2460_v22 = vrot.slane %v2436_v6, 3  ;;  %v2464_v25 = vsel %vm5657_vm12, %v2461_v3, %v2463_v49  ;;  %v2468_v35 = vsel %vm5659_vm8, %v2465_v27, %v2467_v31  ;;  %vm5661_vm12 = vmmov %vm5655_vm2 }
 0x9cb   : > { %v3001_v6 = vshrl.u32 %v4298_v11, 16  ;;  %v3006_v21 = vrot.slane %v3004_v8, 7  ;;  %vm5663_vm8 = vmmov %vm5655_vm2 }
 0x9cc   : > { %v2462_v15 = vsel %vm5656_vm4, %v2460_v22, %v2461_v3  ;;  %vm5660_vm4 = vmmov %vm5655_vm2  ;;  %v1815_v3 = vld [vmem:[%s5536_s10 + $0x1f0] sm:$0xff] }
 0x9cd   : > { %v3003_v20 = vrot.slane %v3001_v6, 6  ;;  %v2444_v49 = vpack.c.bf16 %v1816_v14, %v1815_v3 }
 0x9cf   : > { %v2475_v24 = vrot.slane %v2444_v49, 3  ;;  %v3007_v11 = vor.u32 %v3006_v21, %v3003_v20 }
 0x9d1   : > { %v3010_v18 = vsel %vm4120_vm3, %v3007_v11, 0 }
 0xa25   : > { %v2096_v34 = vpop.permute.xlu0 %2095 }
 0xa29   : > { %v2104_v56 = vpop.permute.xlu0 %2103  ;;  %v2109_v36 = vpop.permute.xlu1 %2108 }
 0xa2d   : > { %v2112_v37 = vpop.permute.xlu0 %2111  ;;  %v2166_v60 = vpop.permute.xlu1 %2165 }
 0xa2e   : > { %v2125_v38 = vsel %vm1170_vm15, %v2109_v36, %v2112_v37  ;;  %v1813_v37 = vld [vmem:[%s5536_s10 + $0x1e0] sm:$0xff] }
 0xa2f   : > { %3606 = vmatprep.mubr.msk.bf16.mxu1 %vm1275_vm14, %v2125_v38  ;;  %v1814_v38 = vld [vmem:[%s5536_s10 + $0x1e8] sm:$0xff] }
 0xa31   : > { %v2092_v58 = vpop.permute.xlu0 %2091 }
 0xa32   : > { %v2114_v40 = vsel %vm1154_vm9, %v4948_v62, %v2092_v58 }
 0xa33   : > { %v2116_v42 = vsel %vm1157_vm11, %v2114_v40, %v2096_v34  ;;  %v1812_v34 = vld [vmem:[%s5536_s10 + $0x1d8] sm:$0xff] }
 0xa35   : > { %v2101_v26 = vpop.permute.xlu0 %2100 }
 0xa36   : > { %v2118_v61 = vsel %vm1160_vm6, %v2116_v42, %v2101_v26  ;;  %v2443_v42 = vpack.c.bf16 %v1814_v38, %v1813_v37 }
 0xa37   : > { %v2120_v46 = vsel %vm1163_vm7, %v2118_v61, %v2104_v56  ;;  %v2469_v56 = vrot.slane %v2441_v32, 3  ;;  %v5094_v32 = vsel %vm4120_vm3, 0, %v3007_v11 }
 0xa38   : > { %v2122_v48 = vsel %vm1166_vm1, %v2120_v46, %v2109_v36  ;;  %v2442_v36 = vpack.c.bf16 %v1812_v34, %v1811_v33  ;;  %v2473_v17 = vrot.slane %v2443_v42, 3  ;;  %v3014_v37 = vshll.u32 %v5094_v32, 16 }
 0xa39   : > { %2359 = vmatmul.mubr.bf16.vlgmr.msra.gmra.mrb[16].mxu1 %v2122_v48  ;;  %v2163_v62 = vpop.permute.xlu0 %2162  ;;  %v2470_v58 = vsel %vm5655_vm2, %v2467_v31, %v2469_v56  ;;  %v2369_v48 = vrot.slane %v4878_v53, %v4195_v55  ;;  %v2445_v31 = vpack.c.bf16 %v1818_v29, %v1817_v28  ;;  %v3027_v8 = vrot.slane %v5094_v32, 1 }
 0xa3a   : > { %v2176_v0 = vsel %vm1166_vm1, %v2174_v57, %v2163_v62  ;;  %v2179_v2 = vsel %vm1170_vm15, %v2163_v62, %v2166_v60  ;;  %3746 = vmatprep.mubr.msk.bf16.mxu1 %vm5624_vm0, %v3942_v1  ;;  %v2471_v40 = vrot.slane %v2442_v36, 3  ;;  %v2476_v27 = vsel %vm5662_vm13, %v2473_v17, %v2475_v24 }
 0xa3b   : > { %3605 = vmatprep.mubr.msk.bf16.mxu0 %vm1275_vm14, %v2179_v2  ;;  %v2477_v34 = vrot.slane %v2445_v31, 3  ;;  %v3043_v49 = vrot.slane %v5094_v32, 2  ;;  %vm5670_vm13 = vsmask.f32 5376  ;;  %v3057_v31 = vrot.slane %v5094_v32, 3 }
 0xa3c   : > { %2276 = vmatmul.mubr.bf16.vlgmr.msra.gmra.mrb[16].mxu0 %v2176_v0  ;;  %v2472_v26 = vsel %vm5660_vm4, %v2469_v56, %v2471_v40  ;;  %v2474_v61 = vsel %vm5661_vm12, %v2471_v40, %v2473_v17  ;;  %v3016_v17 = vrot.slane %v3014_v37, 1  ;;  %vm5666_vm4 = vcmask 1046528  }
 0xa3d   : > { %2494 = vmatpush1.bf16.msra.mxu0 %v2462_v15  ;;  %v2478_v56 = vsel %vm5663_vm8, %v2475_v24, %v2477_v34  ;;  %v2491_v42 = vsel %vm5655_vm2, %v2477_v34, 0  ;;  %vm5668_vm12 = vsmask.f32 6400  ;;  %vm5671_vm8 = vmmov %vm5655_vm2  ;;  %vm5679_vm2 = vcmask 121856  }
 0xa3e   : > { %2495 = vmatprep.subr.bf16.mxu0 %v3956_v7 }
 0xa41   : > { %2496 = vmatpush1.bf16.msra.mxu0 %v2464_v25 }
 0xa42   : > { %2497 = vmatprep.subr.bf16.mxu0 %v3956_v7 }
 0xa45   : > { %2498 = vmatpush1.bf16.msra.mxu0 %v2466_v12 }
 0xa46   : > { %2499 = vmatprep.subr.bf16.mxu0 %v3956_v7 }
 0xa49   : > { %2500 = vmatpush1.bf16.msra.mxu0 %v2468_v35 }
 0xa4a   : > { %2501 = vmatprep.subr.bf16.mxu0 %v3956_v7 }
 0xa4d   : > { %2502 = vmatpush1.bf16.msra.mxu0 %v2470_v58 }
 0xa4e   : > { %2503 = vmatprep.subr.bf16.mxu0 %v3956_v7 }
 0xa51   : > { %2504 = vmatpush1.bf16.msra.mxu0 %v2472_v26 }
 0xa52   : > { %2505 = vmatprep.subr.bf16.mxu0 %v3956_v7 }
 0xa55   : > { %2506 = vmatpush1.bf16.msra.mxu0 %v2474_v61 }
 0xa56   : > { %2507 = vmatprep.subr.bf16.mxu0 %v3956_v7 }
 0xa59   : > { %2508 = vmatpush1.bf16.msra.mxu0 %v2476_v27 }
 0xa5a   : > { %2509 = vmatprep.subr.bf16.mxu0 %v3956_v7 }
 0xa5d   : > { %2510 = vmatpush1.bf16.msra.mxu0 %v2478_v56  ;;  %v2563_v56 = vld [vmem:[%s5538_s12 + $0x98] sm:$0xff] }
 0xa5e   : > { %2511 = vmatprep.subr.bf16.mxu0 %v3956_v7  ;;  %v3019_v7 = vshll.u32 %v3010_v18, 16 }
 0xa60   : > { %v3038_v21 = vrot.slane %v3019_v7, 2  ;;  %v3052_v27 = vrot.slane %v3019_v7, 3 }
 0xa61   : > { %2512 = vmatpush1.bf16.msra.mxu0 %v2491_v42  ;;  %v2567_v42 = vld [vmem:[%s5538_s12 + $0xb8] sm:$0xff] }
 0xa62   : > { %3758 = vmatprep.subr.bf16.mxu0 %v3942_v1 }
 0xb0c   : > { %v2360_v43 = vpop.f32.mrb[16].mxu1 }
 0xb0d   : > { %v2362_v46 = vpop.f32.mrb[17].mxu1 }
 0xb0e   : > { %v2363_v47 = vpop.f32.mrb[18].mxu1 }
 0xb0f   : > { %v2277_v57 = vpop.f32.mrb[16].mxu0  ;;  %v2364_v60 = vpop.f32.mrb[19].mxu1 }
 0xb10   : > { %v2361_v62 = vadd.f32 %v2360_v43, %v2277_v57  ;;  %v2279_v0 = vpop.f32.mrb[17].mxu0 }
 0xb11   : > { %v2280_v2 = vpop.f32.mrb[18].mxu0 }
 0xb12   : > { %v2370_v54 = vadd.f32 %v2369_v48, %v2361_v62  ;;  %v2281_v5 = vpop.f32.mrb[19].mxu0  ;;  %v3012_v48 = vshrl.u32 %v5094_v32, 16 }
 0xb14   : > { %v2371_v9 = vmax.f32 %v2370_v54, 0.0  ;;  %v3017_v57 = vor.u32 %v3016_v17, %v3012_v48  ;;  %v3035_v54 = vshrl.u32 %v3010_v18, 16  ;;  %v3048_v24 = vrot.slane %v3012_v48, 2 }
 0xb16   : > { %v2376_v13 = vmul.f32 %v2375_v4, %v2371_v9  ;;  %v3021_v4 = vrot.slane %v3019_v7, 1  ;;  %v3028_v9 = vrot.slane %v3010_v18, 1  ;;  %v3037_v20 = vrot.slane %v3035_v54, 1 }
 0xb18   : > { %v2381_v22 = vadd.f32 %v2380_v16, %v2376_v13  ;;  %v3032_v16 = vrot.slane %v3012_v48, 1  ;;  %v3033_v13 = vrot.slane %v3014_v37, 2  ;;  %v3039_v14 = vor.u32 %v3038_v21, %v3037_v20 }
 0xb1a   : > { %v2382_v23 = vpack.c.bf16 %v2381_v22, %v2381_v22  ;;  %v3029_v22 = vsel %vm5666_vm4, %v3027_v8, %v3028_v9  ;;  %v3034_v3 = vor.u32 %v3033_v13, %v3032_v16  ;;  %v2570_v9 = vld [vmem:[%s5538_s12 + $0xd0] sm:$0xff]  ;;  %v2571_v16 = vld [vmem:[%s5538_s12 + $0xd8] sm:$0xff]  ;;  %vm5681_vm4 = vcmask 367616  }
 0xb1c   : > { %v2384_v15 = vshrl.u32 %v2382_v23, 16  ;;  %v2387_v25 = vshll.u32 %v2382_v23, 16  ;;  %v3044_v23 = vrot.slane %v3010_v18, 2  ;;  %v3040_v11 = vsel %vm5668_vm12, %v3034_v3, %v3039_v14 }
 0xb1d   : > { %vm5682_vm12 = vcmask 490496  }
 0xb1e   : > { %v2386_v30 = vrot.slane %v2384_v15, 6  ;;  %v2389_v12 = vrot.slane %v2387_v25, 7  ;;  %v3049_v15 = vrot.slane %v3014_v37, 3  ;;  %v3051_v25 = vrot.slane %v3035_v54, 2  ;;  %v2564_v37 = vld [vmem:[%s5538_s12 + $0xa0] sm:$0xff] }
 0xb1f   : > { %v3045_v28 = vsel %vm512_vm5, %v3043_v49, %v3044_v23 }
 0xb20   : > { %v2390_v33 = vor.u32 %v2389_v12, %v2386_v30  ;;  %v3050_v29 = vor.u32 %v3049_v15, %v3048_v24  ;;  %v3053_v30 = vor.u32 %v3052_v27, %v3051_v25  ;;  %v2572_v15 = vld [vmem:[%s5538_s12 + $0xe0] sm:$0xff]  ;;  %v2573_v25 = vld [vmem:[%s5538_s12 + $0xe8] sm:$0xff] }
 0xb22   : > { %v2392_v35 = vsel %vm4120_vm3, 0, %v2390_v33  ;;  %v3054_v12 = vsel %vm5670_vm13, %v3050_v29, %v3053_v30  ;;  %v3058_v33 = vrot.slane %v3010_v18, 3 }
 0xb23   : > { %v5101_v36 = vsel %vm4319_vm10, %v2392_v35, 0  ;;  %vm5664_vm10 = vsmask.f32 7424  ;;  %v5139_v35 = vld [vmem:[%s5538_s12 + $0x90] sm:$0xff] }
 0xb24   : > { %v2404_v38 = vrot.slane %v5101_v36, 1  ;;  %v2395_v58 = vshrl.u32 %v5101_v36, 16  ;;  %v2397_v40 = vshll.u32 %v5101_v36, 16  ;;  %v2412_v61 = vrot.slane %v5101_v36, 2 }
 0xb25   : > { %v2420_v60 = vrot.slane %v5101_v36, 3  ;;  %v3022_v5 = vsel %vm5664_vm10, %v3017_v57, %v3021_v4  ;;  %v3059_v34 = vsel %vm5671_vm8, %v3057_v31, %v3058_v33  ;;  %vm5680_vm10 = vcmask 244736  }
 0xb26   : > { %2405 = vrot.lane.b32.xlu1 %v2404_v38, %s5637_s3  ;;  %v2399_v26 = vrot.slane %v2397_v40, 1  ;;  %v2407_v46 = vrot.slane %v2395_v58, 1  ;;  %v2408_v47 = vrot.slane %v2397_v40, 2  ;;  %v2415_v0 = vrot.slane %v2395_v58, 2  ;;  %v2565_v38 = vld [vmem:[%s5538_s12 + $0xa8] sm:$0xff]  ;;  %s3968_s3 = smov [#allocation3]  }
 0xb27   : > { %v2416_v2 = vrot.slane %v2397_v40, 3  ;;  %v2566_v40 = vld [vmem:[%s5538_s12 + $0xb0] sm:$0xff]  ;;  %vm5684_vm8 = vcmask 736256  }
 0xb28   : > { %v2400_v43 = vor.u32 %v2399_v26, %v2395_v58  ;;  %v2409_v62 = vor.u32 %v2408_v47, %v2407_v46  ;;  %v3081_v58 = vpack.c.bf16 %v2563_v56, %v5139_v35  ;;  %v3082_v26 = vpack.c.bf16 %v2565_v38, %v2564_v37  ;;  %v2569_v46 = vld [vmem:[%s5538_s12 + $0xc8] sm:$0xff] }
 0xb29   : > { %v2417_v6 = vor.u32 %v2416_v2, %v2415_v0  ;;  %v3083_v18 = vpack.c.bf16 %v2567_v42, %v2566_v40  ;;  %v2574_v40 = vld [vmem:[%s5538_s12 + $0xf0] sm:$0xff]  ;;  %v5190_v42 = vld [vmem:[%s5538_s12 + $0xf8] sm:$0xff] }
 0xb2a   : > { %2413 = vrot.lane.b32.xlu1 %v2412_v61, %s5638_s4  ;;  %2401 = vrot.lane.b32.xlu0 %v2400_v43, %s5620_s21  ;;  %s5665_s21 = smov 15   ;;  %v3089_v61 = vshrl.u32 %v3081_v58, 16  ;;  %v2568_v43 = vld [vmem:[%s5538_s12 + $0xc0] sm:$0xff]  ;;  %v3092_v47 = vshll.u32 %v3081_v58, 16  ;;  %v3097_v48 = vshrl.u32 %v3082_v26, 16  ;;  %v3100_v7 = vshll.u32 %v3082_v26, 16 }
 0xb2b   : > { %v3106_v57 = vshrl.u32 %v3083_v18, 16  ;;  %v3086_v58 = vpack.c.bf16 %v2573_v25, %v2572_v15  ;;  %v2545_v15 = vld [vmem:[%s5538_s12 + $0x8] sm:$0xff]  ;;  %v2546_v25 = vld [vmem:[%s5538_s12 + $0x10] sm:$0xff]  ;;  %s3882_s4 = sshll.u32 %s3968_s3, 4  ;;  %s3883_s4 = int_to_ptr.vmem [resolvable:$false] %s3882_s4 }
 0xb2c   : > { %v3091_v54 = vrot.slane %v3089_v61, 2  ;;  %v3102_v8 = vrot.slane %v3100_v7, 3  ;;  %s3884_s0 = scalar_lea.vmem %s3883_s4, 32 }
 0xb2d   : > { %v3108_v13 = vrot.slane %v3106_v57, 2 }
 0xb2e   : > { %2421 = vrot.lane.b32.xlu1 %v2420_v60, %s5621_s22  ;;  %2410 = vrot.lane.b32.xlu0 %v2409_v62, %s5622_s15  ;;  %s5667_s22 = smov 30   ;;  %s5669_s15 = smov 60   ;;  %v3109_v60 = vshll.u32 %v3083_v18, 16  ;;  %v3084_v62 = vpack.c.bf16 %v2569_v46, %v2568_v43  ;;  %v3133_v46 = vshrl.u32 %v3086_v58, 16 }
 0xb30   : > { %v3111_v20 = vrot.slane %v3109_v60, 3  ;;  %v3115_v21 = vshrl.u32 %v3084_v62, 16  ;;  %v3118_v49 = vshll.u32 %v3084_v62, 16  ;;  %v3135_v62 = vrot.slane %v3133_v46, 2 }
 0xb32   : > { %3023 = vrot.lane.b32.xlu1 %v3022_v5, %s5665_s21  ;;  %2418 = vrot.lane.b32.xlu0 %v2417_v6, %s5623_s24  ;;  %s5672_s24 = smov 90   ;;  %v3094_v5 = vrot.slane %v3092_v47, 3  ;;  %v3099_v6 = vrot.slane %v3097_v48, 2  ;;  %v3112_v27 = vor.u32 %v3111_v20, %v3108_v13  ;;  %v3120_v31 = vrot.slane %v3118_v49, 3 }
 0xb33   : > { %v3136_v47 = vshll.u32 %v3086_v58, 16  ;;  %v3087_v48 = vpack.c.bf16 %v5190_v42, %v2574_v40 }
 0xb34   : > { %v3095_v24 = vor.u32 %v3094_v5, %v3091_v54 }
 0xb35   : > { %v3145_v54 = vshll.u32 %v3087_v48, 16 }
 0xb36   : > { %3030 = vrot.lane.b32.xlu1 %v3029_v22, %s5667_s22 }
 0xb3a   : > { %3041 = vrot.lane.b32.xlu1 %v3040_v11, %s5603_s25  ;;  %v3103_v11 = vor.u32 %v3102_v8, %v3099_v6  ;;  %v3147_v8 = vrot.slane %v3145_v54, 3 }
 0xb3e   : > { %3046 = vrot.lane.b32.xlu1 %v3045_v28, %s5669_s15  ;;  %v3117_v28 = vrot.slane %v3115_v21, 2 }
 0xb40   : > { %v3121_v18 = vor.u32 %v3120_v31, %v3117_v28  ;;  %v2592_v28 = vpack.c.bf16 %v2546_v25, %v2546_v25  ;;  %v2548_v31 = vld [vmem:[%s5538_s12 + $0x20] sm:$0xff] }
 0xb42   : > { %3055 = vrot.lane.b32.xlu1 %v3054_v12, %s5604_s26 }
 0xb46   : > { %3060 = vrot.lane.b32.xlu1 %v3059_v34, %s5672_s24 }
 0xb98   : > { %v2406_v17 = vpop.permute.xlu1 %2405 }
 0xb9c   : > { %v2414_v0 = vpop.permute.xlu1 %2413  ;;  %v2402_v2 = vpop.permute.xlu0 %2401 }
 0xb9d   : > { %v2424_v4 = vsel %vm1154_vm9, %v5101_v36, %v2402_v2  ;;  %v3085_v36 = vpack.c.bf16 %v2571_v16, %v2570_v9  ;;  %v3142_v2 = vshrl.u32 %v3087_v48, 16 }
 0xb9e   : > { %v2426_v3 = vsel %vm1157_vm11, %v2424_v4, %v2406_v17  ;;  %vm5673_vm11 = vmmov %vm5670_vm13  ;;  %vm5683_vm13 = vcmask 613376  }
 0xb9f   : > { %v3124_v33 = vshrl.u32 %v3085_v36, 16  ;;  %v3127_v34 = vshll.u32 %v3085_v36, 16  ;;  %v3104_v38 = vsel %vm5673_vm11, %v3095_v24, %v3103_v11  ;;  %v3144_v6 = vrot.slane %v3142_v2, 2 }
 0xba0   : > { %v2422_v22 = vpop.permute.xlu1 %2421  ;;  %v2411_v14 = vpop.permute.xlu0 %2410 }
 0xba1   : > { %v2428_v23 = vsel %vm1160_vm6, %v2426_v3, %v2411_v14  ;;  %v3126_v17 = vrot.slane %v3124_v33, 2  ;;  %v3129_v61 = vrot.slane %v3127_v34, 3  ;;  %v3148_v13 = vor.u32 %v3147_v8, %v3144_v6  ;;  %v2549_v33 = vld [vmem:[%s5538_s12 + $0x28] sm:$0xff]  ;;  %v2552_v6 = vld [vmem:[%s5538_s12 + $0x40] sm:$0xff] }
 0xba2   : > { %v2430_v30 = vsel %vm1163_vm7, %v2428_v23, %v2414_v0  ;;  %vm5674_vm7 = vmmov %vm5673_vm11  ;;  %v3138_v0 = vrot.slane %v3136_v47, 3  ;;  %vm5685_vm11 = vcmask 859136   ;;  %v2541_v34 = vsub.s32 6, %v4182_v51 }
 0xba3   : > { %v3113_v43 = vsel %vm5674_vm7, %v3103_v11, %v3112_v27  ;;  %v3130_v57 = vor.u32 %v3129_v61, %v3126_v17 }
 0xba4   : > { %v3024_v29 = vpop.permute.xlu1 %3023  ;;  %v2419_v12 = vpop.permute.xlu0 %2418  ;;  %v3139_v5 = vor.u32 %v3138_v0, %v3135_v62  ;;  %v2542_v61 = vrot.slane %v4878_v53, %v2541_v34 }
 0xba5   : > { %v2432_v56 = vsel %vm1166_vm1, %v2430_v30, %v2419_v12  ;;  %v2435_v37 = vsel %vm1170_vm15, %v2419_v12, %v2422_v22  ;;  %vm5676_vm15 = vmmov %vm5674_vm7  ;;  %v3159_v22 = vand.u32 %v3148_v13, %v4226_v45  ;;  %v3063_v3 = vsel %vm5679_vm2, %v5094_v32, %v3024_v29  ;;  %v2544_v32 = vld [vmem:[%s5538_s12] sm:$0xff]  ;;  %v2547_v12 = vld [vmem:[%s5538_s12 + $0x18] sm:$0xff] }
 0xba6   : > { %3607 = vmatprep.mubr.msk.bf16.mxu0 %vm1275_vm14, %v2435_v37  ;;  %vm5675_vm14 = vmmov %vm5674_vm7  ;;  %v3131_v4 = vsel %vm5676_vm15, %v3121_v18, %v3130_v57  ;;  %v2449_v30 = vrot.slane %v4878_v53, %v4283_v41  ;;  %v2639_v40 = vpack.c.bf16 %v2547_v12, %v2546_v25 }
 0xba7   : > { %2526 = vmatmul.mubr.bf16.vlgmr.msra.gmra.mrb[20].mxu0 %v2432_v56  ;;  %v3122_v7 = vsel %vm5675_vm14, %v3112_v27, %v3121_v18  ;;  %vm5677_vm1 = vmmov %vm5674_vm7  ;;  %v2591_v27 = vpack.c.bf16 %v2545_v15, %v2544_v32  ;;  %vm5686_vm7 = vcmask 1042432   ;;  %vm5687_vm14 = vcmask 1044480  }
 0xba8   : > { %3759 = vmatpush3.bf16.msra.mxu0 %v3104_v38  ;;  %v3031_v26 = vpop.permute.xlu1 %3030  ;;  %3772 = vmatprep.mubr.msk.bf16.mxu0 %vm5624_vm0, %v3942_v1  ;;  %v3140_v16 = vsel %vm5677_vm1, %v3130_v57, %v3139_v5  ;;  %vm5678_vm6 = vmmov %vm5677_vm1  ;;  %v2597_v29 = vsel %vm5686_vm7, %v2592_v28, 0  ;;  %v2537_v38 = vrot.slane %v4878_v53, %v4286_v44  ;;  %v2643_v47 = vrot.slane %v2639_v40, 3 }
 0xba9   : > { %3760 = vmatprep.subr.bf16.mxu0 %v3942_v1  ;;  %v3149_v21 = vsel %vm5678_vm6, %v3139_v5, %v3148_v13  ;;  %v3065_v14 = vsel %vm5680_vm10, %v3063_v3, %v3031_v26  ;;  %3743 = vmatpush3.bf16.msra.mxu1 %v2591_v27  ;;  %v2640_v26 = vpack.c.bf16 %v2549_v33, %v2548_v31  ;;  %vm5688_vm15 = vmmov %vm5686_vm7  ;;  %v2551_v5 = vld [vmem:[%s5538_s12 + $0x38] sm:$0xff]  ;;  %v2554_v13 = vld [vmem:[%s5538_s12 + $0x50] sm:$0xff]  ;;  %vm5700_vm7 = vsmask.f32 5376 }
 0xbaa   : > { %3744 = vmatprep.subr.bf16.mxu1 %v3942_v1 }
 0xbab   : > { %v2644_v48 = vrot.slane %v2640_v26, 3 }
 0xbac   : > { %3761 = vmatpush3.bf16.msra.mxu0 %v3113_v43  ;;  %v3042_v60 = vpop.permute.xlu1 %3041 }
 0xbad   : > { %3762 = vmatprep.subr.bf16.mxu0 %v3942_v1  ;;  %v3067_v49 = vsel %vm5681_vm4, %v3065_v14, %v3042_v60  ;;  %3745 = vmatpush3.bf16.msra.mxu1 %v2597_v29  ;;  %v2645_v60 = vsel %vm5687_vm14, %v2643_v47, %v2644_v48  ;;  %v2648_v62 = vsel %vm5688_vm15, %v2644_v48, 0  ;;  %vm5701_vm15 = vcmask 121856  }
 0xbae   : > { %3750 = vmatprep.subr.bf16.mxu1 %v3942_v1 }
 0xbb0   : > { %3763 = vmatpush3.bf16.msra.mxu0 %v3122_v7  ;;  %v3047_v9 = vpop.permute.xlu1 %3046 }
 0xbb1   : > { %3764 = vmatprep.subr.bf16.mxu0 %v3942_v1  ;;  %v3069_v23 = vsel %vm5682_vm12, %v3067_v49, %v3047_v9  ;;  %v3075_v9 = vpack.c.bf16 %v2552_v6, %v2551_v5 }
 0xbb4   : > { %3765 = vmatpush3.bf16.msra.mxu0 %v3131_v4  ;;  %v3056_v20 = vpop.permute.xlu1 %3055  ;;  %v2550_v4 = vld [vmem:[%s5538_s12 + $0x30] sm:$0xff] }
 0xbb5   : > { %3766 = vmatprep.subr.bf16.mxu0 %v3942_v1  ;;  %v3071_v24 = vsel %vm5683_vm13, %v3069_v23, %v3056_v20  ;;  %v3074_v8 = vpack.c.bf16 %v2550_v4, %v2549_v33  ;;  %vm5697_vm13 = vcmask 1046528  }
 0xbb8   : > { %3767 = vmatpush3.bf16.msra.mxu0 %v3140_v16  ;;  %v3061_v36 = vpop.permute.xlu1 %3060  ;;  %v2553_v16 = vld [vmem:[%s5538_s12 + $0x48] sm:$0xff] }
 0xbb9   : > { %3768 = vmatprep.subr.bf16.mxu0 %v3942_v1  ;;  %v3073_v11 = vsel %vm5684_vm8, %v3071_v24, %v3061_v36  ;;  %v3076_v20 = vpack.c.bf16 %v2554_v13, %v2553_v16  ;;  %v5286_v36 = vld [vmem:[%s5537_s11] sm:$0x7f]  ;;  %vm5698_vm8 = vsmask.f32 7424 }
 0xbba   : > { %v2849_v24 = vrot.slane %v5286_v36, %v4185_v52 }
 0xbbb   : > { %v5276_v3 = vrot.slane %v3076_v20, 2 }
 0xbbc   : > { %3769 = vmatpush3.bf16.msra.mxu0 %v3149_v21  ;;  %v3209_v21 = vrot.slane %v3074_v8, 2  ;;  %v2851_v28 = vcombine.high %v2849_v24, %v2849_v24  ;;  %v2858_v31 = vrot.slane %v2849_v24, %v4293_v63 }
 0xbbd   : > { %3770 = vmatprep.subr.bf16.mxu0 %v3942_v1 }
 0xbbe   : > { %v2865_v33 = vrot.slane %v2851_v28, %v4293_v63  ;;  %v2866_v48 = vcombine.high %v2858_v31, %v2858_v31 }
 0xbc0   : > { %3771 = vmatpush3.bf16.msra.mxu0 %v3159_v22  ;;  %v3210_v22 = vrot.slane %v3075_v9, 2 }
 0xbc1   : > { %3794 = vmatprep.subr.bf16.mxu0 %v3942_v1 }
 0xbc2   : > { %v3211_v14 = vsel %vm512_vm5, %v3209_v21, %v3210_v22  ;;  %v3213_v49 = vsel %vm512_vm5, %v3210_v22, %v5276_v3 }
 0xbc3   : > { %3773 = vmatmul.mubr.msk.bf16.vlgmr.msra.gmra.mrb[24].mxu0 %vm5685_vm11, %v3073_v11  ;;  %vm5699_vm11 = vsmask.f32 6400 }
 0xbc4   : > { %3808 = vmatprep.mubr.msk.bf16.mxu0 %vm5624_vm0, %v3942_v1 }
 0xc7a   : > { %v2527_v56 = vpop.f32.mrb[20].mxu0 }
 0xc7b   : > { %v2528_v37 = vadd.f32 %v2527_v56, %v2449_v30  ;;  %v2529_v58 = vpop.f32.mrb[21].mxu0 }
 0xc7c   : > { %v2530_v18 = vpop.f32.mrb[22].mxu0 }
 0xc7d   : > { %v2533_v17 = vmax.f32 %v2528_v37, 0.0  ;;  %v2531_v43 = vpop.f32.mrb[23].mxu0 }
 0xc7f   : > { %v2538_v46 = vmul.f32 %v2537_v38, %v2533_v17 }
 0xc81   : > { %v2543_v7 = vadd.f32 %v2542_v61, %v2538_v46 }
 0xc83   : > { %v2590_v57 = vpack.c.bf16 %v2543_v7, %v2543_v7  ;;  %v2867_v7 = vcombine.high %v2865_v33, %v2865_v33 }
 0xc85   : > { %3747 = vmatmul.mubr.msk.bf16.vlgmr.msra.gmra.mrb[20].mxu1 %vm1154_vm9, %v2590_v57 }
 0xc86   : > { %3751 = vmatpush3.bf16.msra.mxu1 %v2645_v60  ;;  %3754 = vmatprep.mubr.msk.bf16.mxu1 %vm5624_vm0, %v3942_v1 }
 0xc87   : > { %3752 = vmatprep.subr.bf16.mxu1 %v3942_v1 }
 0xc8a   : > { %3753 = vmatpush3.bf16.msra.mxu1 %v2648_v62 }
 0xc8b   : > { %3776 = vmatprep.subr.bf16.mxu1 %v3942_v1 }
 0xc8d   : > { %3755 = vmatmul.mubr.msk.bf16.vlgmr.msra.gmra.mrb[24].mxu1 %vm1154_vm9, %v2590_v57  ;;  %vm5689_vm9 = vcmask 1040384  }
 0xc8e   : > { %3790 = vmatprep.mubr.msk.bf16.mxu1 %vm5624_vm0, %v3942_v1  ;;  %3777 = vmatpush3.bf16.msra.mxu1 %v3211_v14  ;;  %vm5690_vm0 = vmmov %vm5689_vm9 }
 0xc8f   : > { %3778 = vmatprep.subr.bf16.mxu1 %v3942_v1  ;;  %vm5691_vm1 = vmmov %vm5690_vm0 }
 0xc90   : > { %vm5692_vm6 = vmmov %vm5690_vm0 }
 0xc91   : > { %vm5693_vm2 = vmmov %vm5690_vm0 }
 0xc92   : > { %3779 = vmatpush3.bf16.msra.mxu1 %v3213_v49  ;;  %vm5694_vm10 = vmmov %vm5690_vm0 }
 0xc93   : > { %3780 = vmatprep.subr.bf16.mxu1 %v3942_v1  ;;  %vm5695_vm4 = vmmov %vm5690_vm0 }
 0xc94   : > { %vm5696_vm12 = vmmov %vm5690_vm0 }
 0xc96   : > { %v5257_v53 = vpop.f32.mrb[24].mxu0 }
 0xc97   : > { %v3774_v0 = vpop.f32.mrb[25].mxu0 }
 0xc98   : > { %v5259_v2 = vpop.f32.mrb[26].mxu0 }
 0xc99   : > { %v3775_v54 = vpop.f32.mrb[27].mxu0 }
 0xd58   : > { %v2633_v23 = vpop.f32.mrb[20].mxu1 }
 0xd59   : > { %v3748_v11 = vpop.f32.mrb[21].mxu1  ;;  %v2691_v32 = vcombine.high %v2633_v23, %v2633_v23  ;;  %v2698_v27 = vrot.slane %v2633_v23, %v4873_v10 }
 0xd5a   : > { %v2636_v15 = vpop.f32.mrb[22].mxu1 }
 0xd5b   : > { %v3749_v25 = vpop.f32.mrb[23].mxu1  ;;  %v2705_v29 = vrot.slane %v2691_v32, %v4873_v10  ;;  %v2706_v30 = vcombine.high %v2698_v27, %v2698_v27  ;;  %v2714_v40 = vrot.slane %v2698_v27, %v4873_v10 }
 0xd5d   : > { %v2707_v58 = vcombine.high %v2705_v29, %v2705_v29  ;;  %v2721_v26 = vrot.slane %v2705_v29, %v4873_v10  ;;  %v2728_v47 = vrot.slane %v2706_v30, %v4873_v10  ;;  %v2736_v4 = vcombine.high %v2714_v40, %v2714_v40 }
 0xd5f   : > { %v2735_v54 = vrot.slane %v2707_v58, %v4873_v10  ;;  %v2737_v5 = vcombine.high %v2721_v26, %v2721_v26  ;;  %v2738_v20 = vcombine.high %v2728_v47, %v2728_v47 }
 0xd60   : > { %v2684_v12 = vpop.f32.mrb[24].mxu1 }
 0xd61   : > { %v2749_v56 = vcombine.high %v2684_v12, %v2684_v12  ;;  %v2756_v37 = vrot.slane %v2684_v12, %v4873_v10  ;;  %v3756_v38 = vpop.f32.mrb[25].mxu1  ;;  %v2739_v32 = vcombine.high %v2735_v54, %v2735_v54 }
 0xd62   : > { %v2687_v18 = vpop.f32.mrb[26].mxu1 }
 0xd63   : > { %v2763_v17 = vrot.slane %v2749_v56, %v4873_v10  ;;  %v2764_v61 = vcombine.high %v2756_v37, %v2756_v37  ;;  %v2772_v43 = vrot.slane %v2756_v37, %v4873_v10  ;;  %v3757_v46 = vpop.f32.mrb[27].mxu1 }
 0xd65   : > { %v2765_v57 = vcombine.high %v2763_v17, %v2763_v17  ;;  %v2779_v60 = vrot.slane %v2763_v17, %v4873_v10  ;;  %v2786_v62 = vrot.slane %v2764_v61, %v4873_v10  ;;  %v2794_v0 = vcombine.high %v2772_v43, %v2772_v43 }
 0xd66   : > { %v2801_v6 = vrot.slane %v2772_v43, %v4185_v52 }
 0xd67   : > { %v2793_v8 = vrot.slane %v2765_v57, %v4873_v10  ;;  %v2795_v9 = vcombine.high %v2779_v60, %v2779_v60  ;;  %v2796_v16 = vcombine.high %v2786_v62, %v2786_v62  ;;  %v2805_v13 = vrot.slane %v2786_v62, %v4185_v52 }
 0xd68   : > { %v2809_v21 = vrot.slane %v2794_v0, %v4185_v52  ;;  %v2817_v22 = vrot.slane %v2779_v60, %v4185_v52  ;;  %v2838_v14 = vsel %vm5689_vm9, %v2714_v40, %v2801_v6  ;;  %vm5702_vm9 = vcmask 244736  }
 0xd69   : > { %v2797_v49 = vcombine.high %v2793_v8, %v2793_v8  ;;  %v2813_v23 = vrot.slane %v2796_v16, %v4185_v52  ;;  %v2821_v24 = vrot.slane %v2793_v8, %v4185_v52  ;;  %v2825_v11 = vrot.slane %v2795_v9, %v4185_v52  ;;  %v2557_v9 = vld [vmem:[%s5538_s12 + $0x68] sm:$0xff] }
 0xd6a   : > { %v2839_v10 = vsel %vm5690_vm0, %v2728_v47, %v2805_v13  ;;  %v2840_v15 = vsel %vm5691_vm1, %v2736_v4, %v2809_v21  ;;  %v2842_v25 = vsel %vm5692_vm6, %v2721_v26, %v2817_v22  ;;  %v2872_v12 = vadd.f32 %v2858_v31, %v2838_v14 }
 0xd6b   : > { %v2829_v27 = vrot.slane %v2797_v49, %v4185_v52  ;;  %v2841_v28 = vsel %vm5693_vm2, %v2738_v20, %v2813_v23  ;;  %v2843_v29 = vsel %vm5694_vm10, %v2735_v54, %v2821_v24  ;;  %v2844_v30 = vsel %vm5695_vm4, %v2737_v5, %v2825_v11  ;;  %v2560_v11 = vld [vmem:[%s5538_s12 + $0x80] sm:$0xff]  ;;  %vm5708_vm4 = vmmov %vm5687_vm14 }
 0xd6c   : > { %v2873_v56 = vadd.f32 %v2866_v48, %v2839_v10  ;;  %v2874_v37 = vadd.f32 %v2865_v33, %v2840_v15  ;;  %v2875_v38 = vadd.f32 %v2867_v7, %v2841_v28  ;;  %v2876_v40 = vadd.f32 %v2858_v31, %v2842_v25  ;;  %v2555_v31 = vld [vmem:[%s5538_s12 + $0x58] sm:$0xff] }
 0xd6d   : > { %v2845_v58 = vsel %vm5696_vm12, %v2739_v32, %v2829_v27  ;;  %v2877_v18 = vadd.f32 %v2866_v48, %v2843_v29  ;;  %v2878_v17 = vadd.f32 %v2865_v33, %v2844_v30  ;;  %v2556_v33 = vld [vmem:[%s5538_s12 + $0x60] sm:$0xff]  ;;  %vm5703_vm0 = vcmask 367616   ;;  %vm5709_vm12 = vmmov %vm5708_vm4 }
 0xd6e   : > { %v2879_v61 = vadd.f32 %v2867_v7, %v2845_v58  ;;  %v2888_v43 = vcombine.low %v2872_v12, %v2873_v56  ;;  %v2889_v26 = vcombine.low %v2874_v37, %v2875_v38  ;;  %v3077_v48 = vpack.c.bf16 %v2556_v33, %v2555_v31  ;;  %v2561_v38 = vld [vmem:[%s5538_s12 + $0x88] sm:$0xff] }
 0xd6f   : > { %v2905_v46 = vcombine.low %v2876_v40, %v2877_v18  ;;  %vm5704_vm1 = vcmask 490496   ;;  %vm5705_vm6 = vcmask 613376   ;;  %vm5706_vm2 = vcmask 736256  }
 0xd70   : > { %v2896_v47 = vrot.slane %v2888_v43, %v4293_v63  ;;  %v2903_v57 = vrot.slane %v2889_v26, %v4293_v63  ;;  %v2906_v60 = vcombine.low %v2878_v17, %v2879_v61  ;;  %v3214_v5 = vrot.slane %v3077_v48, 2 }
 0xd71   : > { %v2913_v0 = vrot.slane %v2905_v46, %v4293_v63  ;;  %v3080_v46 = vpack.c.bf16 %v5139_v35, %v2561_v38  ;;  %vm5707_vm10 = vcmask 859136  }
 0xd72   : > { %v2904_v62 = vcombine.low %v2896_v47, %v2903_v57  ;;  %v2920_v54 = vrot.slane %v2906_v60, %v4293_v63  ;;  %v2558_v63 = vld [vmem:[%s5538_s12 + $0x70] sm:$0xff]  ;;  %v3215_v16 = vsel %vm512_vm5, %v5276_v3, %v3214_v5  ;;  %v2559_v3 = vld [vmem:[%s5538_s12 + $0x78] sm:$0xff] }
 0xd73   : > { %v3078_v13 = vpack.c.bf16 %v2558_v63, %v2557_v9  ;;  %3781 = vmatpush3.bf16.msra.mxu1 %v3215_v16  ;;  %v3079_v56 = vpack.c.bf16 %v2560_v11, %v2559_v3 }
 0xd74   : > { %v2921_v4 = vcombine.low %v2913_v0, %v2920_v54  ;;  %3782 = vmatprep.subr.bf16.mxu1 %v3942_v1  ;;  %v3220_v54 = vrot.slane %v3080_v46, 2 }
 0xd75   : > { %v3216_v22 = vrot.slane %v3078_v13, 2  ;;  %v3218_v26 = vrot.slane %v3079_v56, 2  ;;  %v2580_v56 = vld [vmem:[%s5538_s12 + $0x120] sm:$0xff] }
 0xd76   : > { %v2924_v7 = vpack.c.bf16 %v2921_v4, %v2904_v62  ;;  %v3231_v35 = vand.u32 %v3220_v54, %v4226_v45 }
 0xd77   : > { %v3217_v49 = vsel %vm512_vm5, %v3214_v5, %v3216_v22  ;;  %v3219_v57 = vsel %vm512_vm5, %v3216_v22, %v3218_v26 }
 0xd78   : > { %v2926_v6 = vshrl.u32 %v2924_v7, 16  ;;  %v2929_v8 = vshll.u32 %v2924_v7, 16  ;;  %3783 = vmatpush3.bf16.msra.mxu1 %v3217_v49  ;;  %v3221_v7 = vsel %vm512_vm5, %v3218_v26, %v3220_v54  ;;  %v3277_v54 = vrot.slane %v5286_v36, %v4195_v55 }
 0xd79   : > { %3784 = vmatprep.subr.bf16.mxu1 %v3942_v1 }
 0xd7a   : > { %v2928_v20 = vrot.slane %v2926_v6, 6  ;;  %v2931_v21 = vrot.slane %v2929_v8, 7 }
 0xd7c   : > { %v2932_v14 = vor.u32 %v2931_v21, %v2928_v20  ;;  %3785 = vmatpush3.bf16.msra.mxu1 %v3219_v57 }
 0xd7d   : > { %3786 = vmatprep.subr.bf16.mxu1 %v3942_v1 }
 0xd7e   : > { %v2934_v23 = vsel %vm4120_vm3, 0, %v2932_v14  ;;  %v2935_v24 = vsel %vm4120_vm3, %v2932_v14, 0 }
 0xd7f   : > { %v2952_v32 = vrot.slane %v2934_v23, 1  ;;  %v2953_v10 = vrot.slane %v2935_v24, 1  ;;  %v2968_v15 = vrot.slane %v2934_v23, 2  ;;  %v2969_v25 = vrot.slane %v2935_v24, 2 }
 0xd80   : > { %v2937_v27 = vshrl.u32 %v2934_v23, 16  ;;  %v2939_v28 = vshll.u32 %v2934_v23, 16  ;;  %v2944_v30 = vshll.u32 %v2935_v24, 16  ;;  %v2960_v12 = vshrl.u32 %v2935_v24, 16  ;;  %3787 = vmatpush3.bf16.msra.mxu1 %v3221_v7 }
 0xd81   : > { %v2954_v29 = vsel %vm5697_vm13, %v2952_v32, %v2953_v10  ;;  %v2970_v58 = vsel %vm512_vm5, %v2968_v15, %v2969_v25  ;;  %3788 = vmatprep.subr.bf16.mxu1 %v3942_v1  ;;  %v2982_v63 = vrot.slane %v2934_v23, 3  ;;  %v2983_v16 = vrot.slane %v2935_v24, 3  ;;  %vm5710_vm13 = vmmov %vm5708_vm4 }
 0xd82   : > { %2955 = vrot.lane.b32.xlu0 %v2954_v29, %s5667_s22  ;;  %v2941_v37 = vrot.slane %v2939_v28, 1  ;;  %v2957_v40 = vrot.slane %v2937_v27, 1  ;;  %v2958_v18 = vrot.slane %v2939_v28, 2  ;;  %v2962_v61 = vrot.slane %v2960_v12, 1 }
 0xd83   : > { %v2963_v43 = vrot.slane %v2944_v30, 2  ;;  %v2946_v47 = vrot.slane %v2944_v30, 1  ;;  %v2973_v62 = vrot.slane %v2937_v27, 2  ;;  %v2974_v0 = vrot.slane %v2939_v28, 3  ;;  %v2578_v28 = vld [vmem:[%s5538_s12 + $0x110] sm:$0xff] }
 0xd84   : > { %v2942_v17 = vor.u32 %v2941_v37, %v2937_v27  ;;  %v2959_v60 = vor.u32 %v2958_v18, %v2957_v40  ;;  %v2976_v33 = vrot.slane %v2960_v12, 2  ;;  %v2977_v48 = vrot.slane %v2944_v30, 3  ;;  %3789 = vmatpush3.bf16.msra.mxu1 %v3231_v35  ;;  %v2576_v27 = vld [vmem:[%s5538_s12 + $0x100] sm:$0xff]  ;;  %v2579_v12 = vld [vmem:[%s5538_s12 + $0x118] sm:$0xff]  ;;  %v2581_v37 = vld [vmem:[%s5538_s12 + $0x128] sm:$0xff] }
 0xd85   : > { %v2964_v31 = vor.u32 %v2963_v43, %v2962_v61  ;;  %v2975_v6 = vor.u32 %v2974_v0, %v2973_v62  ;;  %v2984_v13 = vsel %vm5687_vm14, %v2982_v63, %v2983_v16  ;;  %v3369_v29 = vpack.c.bf16 %v2576_v27, %v5190_v42  ;;  %v2583_v61 = vld [vmem:[%s5538_s12 + $0x138] sm:$0xff]  ;;  %v2584_v43 = vld [vmem:[%s5538_s12 + $0x140] sm:$0xff] }
 0xd86   : > { %2971 = vrot.lane.b32.xlu0 %v2970_v58, %s5669_s15  ;;  %v2947_v4 = vsel %vm5698_vm8, %v2942_v17, %v2946_v47  ;;  %v2978_v8 = vor.u32 %v2977_v48, %v2976_v33  ;;  %v3371_v38 = vpack.c.bf16 %v2580_v56, %v2579_v12  ;;  %v2582_v58 = vld [vmem:[%s5538_s12 + $0x130] sm:$0xff]  ;;  %v3373_v57 = vpack.c.bf16 %v2584_v43, %v2583_v61  ;;  %vm5711_vm8 = vmmov %vm5708_vm4 }
 0xd87   : > { %v2965_v5 = vsel %vm5699_vm11, %v2959_v60, %v2964_v31  ;;  %v3387_v40 = vrot.slane %v3369_v29, 3  ;;  %v3372_v18 = vpack.c.bf16 %v2582_v58, %v2581_v37  ;;  %v3285_v35 = vrot.slane %v5286_v36, %v4200_v59  ;;  %v2586_v59 = vld [vmem:[%s5538_s12 + $0x150] sm:$0xff]  ;;  %vm5712_vm11 = vmmov %vm5708_vm4 }
 0xd88   : > { %v2979_v9 = vsel %vm5700_vm7, %v2975_v6, %v2978_v8  ;;  %v3390_v17 = vrot.slane %v3371_v38, 3  ;;  %v3394_v62 = vrot.slane %v3373_v57, 3  ;;  %v3291_v16 = vrot.slane %v5286_v36, %v4278_v39 }
 0xd89   : > { %v3392_v47 = vrot.slane %v3372_v18, 3  ;;  %vm5713_vm7 = vcmask 1046528   ;;  %vm5715_vm14 = vsmask.f32 7424 }
 0xd8a   : > { %2948 = vrot.lane.b32.xlu0 %v2947_v4, %s5665_s21 }
 0xd8b   : > { %v3393_v60 = vsel %vm5710_vm13, %v3390_v17, %v3392_v47  ;;  %v3395_v0 = vsel %vm5711_vm8, %v3392_v47, %v3394_v62 }
 0xd8e   : > { %2966 = vrot.lane.b32.xlu0 %v2965_v5, %s5603_s25 }
 0xd92   : > { %2980 = vrot.lane.b32.xlu0 %v2979_v9, %s5604_s26 }
 0xd96   : > { %2985 = vrot.lane.b32.xlu0 %v2984_v13, %s5672_s24 }
 0xdf4   : > { %v2956_v20 = vpop.permute.xlu0 %2955 }
 0xdf8   : > { %v2972_v21 = vpop.permute.xlu0 %2971 }
 0xdfc   : > { %v2949_v22 = vpop.permute.xlu0 %2948 }
 0xdfd   : > { %v2988_v14 = vsel %vm5701_vm15, %v2934_v23, %v2949_v22  ;;  %v2577_v23 = vld [vmem:[%s5538_s12 + $0x108] sm:$0xff]  ;;  %vm5717_vm15 = vsmask.f32 6400 }
 0xdfe   : > { %v2990_v3 = vsel %vm5702_vm9, %v2988_v14, %v2956_v20  ;;  %v3370_v30 = vpack.c.bf16 %v2578_v28, %v2577_v23  ;;  %vm5718_vm9 = vsmask.f32 5376 }
 0xe00   : > { %v2967_v49 = vpop.permute.xlu0 %2966  ;;  %v3388_v42 = vrot.slane %v3370_v30, 3 }
 0xe01   : > { %v2992_v11 = vsel %vm5703_vm0, %v2990_v3, %v2967_v49  ;;  %vm5719_vm0 = vcmask 121856  }
 0xe02   : > { %v2994_v10 = vsel %vm5704_vm1, %v2992_v11, %v2972_v21  ;;  %v3389_v26 = vsel %vm5708_vm4, %v3387_v40, %v3388_v42  ;;  %v3391_v46 = vsel %vm5709_vm12, %v3388_v42, %v3390_v17  ;;  %vm5720_vm1 = vcmask 244736   ;;  %vm5726_vm13 = vmmov %vm5719_vm0 }
 0xe03   : > { %3795 = vmatpush3.bf16.msra.mxu0 %v3389_v26  ;;  %vm5725_vm12 = vcmask 859136   ;;  %vm5727_vm8 = vmmov %vm5719_vm0 }
 0xe04   : > { %v2981_v32 = vpop.permute.xlu0 %2980  ;;  %3796 = vmatprep.subr.bf16.mxu0 %v3942_v1 }
 0xe05   : > { %v2996_v24 = vsel %vm5705_vm6, %v2994_v10, %v2981_v32  ;;  %v2587_v10 = vld [vmem:[%s5538_s12 + $0x158] sm:$0xff]  ;;  %vm5721_vm6 = vcmask 367616  }
 0xe07   : > { %3797 = vmatpush3.bf16.msra.mxu0 %v3391_v46 }
 0xe08   : > { %v2986_v15 = vpop.permute.xlu0 %2985  ;;  %3798 = vmatprep.subr.bf16.mxu0 %v3942_v1 }
 0xe09   : > { %v2998_v25 = vsel %vm5706_vm2, %v2996_v24, %v2986_v15  ;;  %v2588_v24 = vld [vmem:[%s5538_s12 + $0x160] sm:$0x7f]  ;;  %vm5722_vm2 = vcmask 490496  }
 0xe0a   : > { %3791 = vmatmul.mubr.msk.bf16.vlgmr.msra.gmra.mrb[28].mxu1 %vm5707_vm10, %v2998_v25  ;;  %v3375_v25 = vpack.c.bf16 %v2588_v24, %v2587_v10  ;;  %vm5723_vm10 = vcmask 613376  }
 0xe0b   : > { %3799 = vmatpush3.bf16.msra.mxu0 %v3393_v60 }
 0xe0c   : > { %3800 = vmatprep.subr.bf16.mxu0 %v3942_v1  ;;  %v3398_v42 = vrot.slane %v3375_v25, 3 }
 0xe0f   : > { %3801 = vmatpush3.bf16.msra.mxu0 %v3395_v0 }
 0xe10   : > { %3802 = vmatprep.subr.bf16.mxu0 %v3942_v1 }
 0xedd   : > { %v3267_v4 = vpop.f32.mrb[28].mxu1 }
 0xede   : > { %v3268_v31 = vadd.f32 %v3267_v4, %v5257_v53  ;;  %v3792_v33 = vpop.f32.mrb[29].mxu1  ;;  %v2585_v53 = vld [vmem:[%s5538_s12 + $0x148] sm:$0xff] }
 0xedf   : > { %v3270_v48 = vpop.f32.mrb[30].mxu1 }
 0xee0   : > { %v3278_v7 = vadd.f32 %v3277_v54, %v3268_v31  ;;  %v3271_v5 = vadd.f32 %v3270_v48, %v5259_v2  ;;  %v3793_v6 = vpop.f32.mrb[31].mxu1  ;;  %v3374_v2 = vpack.c.bf16 %v2586_v59, %v2585_v53 }
 0xee2   : > { %v3280_v8 = vmax.f32 %v3278_v7, 0.0  ;;  %v3279_v9 = vadd.f32 %v3277_v54, %v3271_v5  ;;  %v3396_v14 = vrot.slane %v3374_v2, 3 }
 0xee4   : > { %v3286_v63 = vmul.f32 %v3285_v35, %v3280_v8  ;;  %v3281_v13 = vmax.f32 %v3279_v9, 0.0  ;;  %v3397_v11 = vsel %vm5712_vm11, %v3394_v62, %v3396_v14  ;;  %vm3506_vm11 = vcmask 130112  }
 0xee5   : > { %3803 = vmatpush3.bf16.msra.mxu0 %v3397_v11 }
 0xee6   : > { %v3287_v55 = vmul.f32 %v3285_v35, %v3281_v13  ;;  %v3292_v20 = vadd.f32 %v3291_v16, %v3286_v63  ;;  %3804 = vmatprep.subr.bf16.mxu0 %v3942_v1  ;;  %v3409_v35 = vand.u32 %v3398_v42, %v4226_v45 }
 0xee8   : > { %v3293_v21 = vadd.f32 %v3291_v16, %v3287_v55 }
 0xeea   : > { %v3294_v22 = vpack.c.bf16 %v3293_v21, %v3292_v20 }
 0xeec   : > { %v3296_v49 = vshrl.u32 %v3294_v22, 16  ;;  %v3299_v3 = vshll.u32 %v3294_v22, 16 }
 0xeee   : > { %v3298_v39 = vrot.slane %v3296_v49, 6  ;;  %v3301_v32 = vrot.slane %v3299_v3, 7  ;;  %v3379_v49 = vrot.slane %v5286_v36, %v4283_v41  ;;  %v3613_v41 = vld [vmem:[%s5528_s2] ss:$0 sm:$0xff] }
 0xef0   : > { %v3302_v15 = vor.u32 %v3301_v32, %v3298_v39  ;;  %v3457_v39 = vrot.slane %v5286_v36, %v4286_v44 }
 0xef2   : > { %v3304_v27 = vsel %vm4120_vm3, 0, %v3302_v15  ;;  %v3305_v23 = vsel %vm4120_vm3, %v3302_v15, 0  ;;  %vm5714_vm3 = vmmov %vm5708_vm4  ;;  %vm5724_vm4 = vcmask 736256  }
 0xef3   : > { %v3322_v28 = vrot.slane %v3304_v27, 1  ;;  %v3323_v29 = vrot.slane %v3305_v23, 1  ;;  %v3338_v30 = vrot.slane %v3304_v27, 2  ;;  %v3339_v12 = vrot.slane %v3305_v23, 2 }
 0xef4   : > { %v3307_v56 = vshrl.u32 %v3304_v27, 16  ;;  %v3309_v37 = vshll.u32 %v3304_v27, 16  ;;  %v3314_v38 = vshll.u32 %v3305_v23, 16  ;;  %v3330_v40 = vshrl.u32 %v3305_v23, 16 }
 0xef5   : > { %v3324_v58 = vsel %vm5713_vm7, %v3322_v28, %v3323_v29  ;;  %v3340_v43 = vsel %vm512_vm5, %v3338_v30, %v3339_v12  ;;  %v3352_v19 = vrot.slane %v3304_v27, 3  ;;  %v3353_v60 = vrot.slane %v3305_v23, 3  ;;  %vm5716_vm5 = vmmov %vm5714_vm3 }
 0xef6   : > { %3325 = vrot.lane.b32.xlu1 %v3324_v58, %s5667_s22  ;;  %v3311_v18 = vrot.slane %v3309_v37, 1  ;;  %v3327_v17 = vrot.slane %v3307_v56, 1  ;;  %v3328_v61 = vrot.slane %v3309_v37, 2  ;;  %v3332_v26 = vrot.slane %v3330_v40, 1  ;;  %s3614_s22 = sshll.u32 %s4063_s1, 4 }
 0xef7   : > { %v3333_v46 = vrot.slane %v3314_v38, 2  ;;  %v3316_v57 = vrot.slane %v3314_v38, 1  ;;  %v3343_v62 = vrot.slane %v3307_v56, 2  ;;  %v3344_v54 = vrot.slane %v3309_v37, 3  ;;  %s5484_s23 = scalar_lea.hbm %s5539_s13, %s3614_s22 }
 0xef8   : > { %v3312_v47 = vor.u32 %v3311_v18, %v3307_v56  ;;  %v3329_v0 = vor.u32 %v3328_v61, %v3327_v17  ;;  %v3346_v4 = vrot.slane %v3330_v40, 2  ;;  %v3399_v31 = vsel %vm5714_vm3, %v3396_v14, %v3398_v42 }
 0xef9   : > { %v3334_v48 = vor.u32 %v3333_v46, %v3332_v26  ;;  %v3347_v7 = vrot.slane %v3314_v38, 3  ;;  %3805 = vmatpush3.bf16.msra.mxu0 %v3399_v31  ;;  %v3354_v5 = vsel %vm5716_vm5, %v3352_v19, %v3353_v60  ;;  %v3345_v8 = vor.u32 %v3344_v54, %v3343_v62 }
 0xefa   : > { %3341 = vrot.lane.b32.xlu1 %v3340_v43, %s5669_s15  ;;  %v3317_v33 = vsel %vm5715_vm14, %v3312_v47, %v3316_v57  ;;  %3806 = vmatprep.subr.bf16.mxu0 %v3942_v1  ;;  %vm3509_vm7 = vcmask 122880  }
 0xefb   : > { %3318 = vrot.lane.b32.xlu0 %v3317_v33, %s5665_s21  ;;  %v3335_v6 = vsel %vm5717_vm15, %v3329_v0, %v3334_v48  ;;  %v3348_v9 = vor.u32 %v3347_v7, %v3346_v4  ;;  %s433_s21 = sand.u32 1, %s3932_s28  }
 0xefc   : > { %s434_s15 = scalar_lea.vmem [#allocation3], %s433_s21  ;;  %s3512_s14 = scalar_lea.sflag [#allocation4], %s433_s21 }
 0xefd   : > { %3807 = vmatpush3.bf16.msra.mxu0 %v3409_v35  ;;  %v3349_v63 = vsel %vm5718_vm9, %v3345_v8, %v3348_v9 }
 0xefe   : > { %3355 = vrot.lane.b32.xlu1 %v3354_v5, %s5672_s24  ;;  %s3524_s24 = sshll.u32 %s434_s15, 4  ;;  %s5486_s24 = int_to_ptr.vmem [resolvable:$true] %s3524_s24 }
 0xeff   : > { %3336 = vrot.lane.b32.xlu0 %v3335_v6, %s5603_s25  ;;  %s3878_s1 = scalar_lea.vmem %s5486_s24, 16  ;;  %p3885_p0 = scmp.lt.s32.totalorder %s5486_s24, %s3883_s4 }
 0xf00   : > { %p3879_p11 = scmp.ne.s32.totalorder %s5486_s24, %s3878_s1  ;;  %p3886_p1 = scmp.lt.s32.totalorder %s3884_s0, %s3878_s1 }
 0xf02   : > { %p3880_p12 = pnand %p3879_p11, %p4080_p5  ;;  %p3887_p2 = por %p3886_p1, %p3885_p0 }
 0xf03   : > { %3350 = vrot.lane.b32.xlu0 %v3349_v63, %s5604_s26 }
 0xf04   : > { %p3881_p13 = pneg %p3880_p12 }
 0xf06   : > { %p3888_p3 = pnand %p3887_p2, %p3881_p13 }
 0xf68   : > { %v3326_v45 = vpop.permute.xlu1 %3325 }
 0xf6c   : > { %v3342_v1 = vpop.permute.xlu1 %3341 }
 0xf6d   : > { %v3319_v16 = vpop.permute.xlu0 %3318 }
 0xf6e   : > { %v3358_v13 = vsel %vm5719_vm0, %v3304_v27, %v3319_v16  ;;  %v3463_v27 = vrot.slane %v5286_v36, %v2541_v34  ;;  %v3467_v34 = vld [vmem:[#allocation2] sm:$0x1]  ;;  %v3496_v36 = vand.u32 127, %v555_v50 }
 0xf6f   : > { %v3360_v55 = vsel %vm5720_vm1, %v3358_v13, %v3326_v45 }
 0xf70   : > { %v3356_v2 = vpop.permute.xlu1 %3355  ;;  %v3501_v40 = vadd.s32 4294967288, %v3496_v36  ;;  %v3499_v18 = vsub.s32 %v3496_v36, %v4182_v51 }
 0xf71   : > { %v3337_v20 = vpop.permute.xlu0 %3336 }
 0xf72   : > { %v3362_v21 = vsel %vm5721_vm6, %v3360_v55, %v3337_v20  ;;  %v3504_v17 = vsub.s32 %v3501_v40, %v4182_v51 }
 0xf73   : > { %v3364_v53 = vsel %vm5722_vm2, %v3362_v21, %v3342_v1 }
 0xf75   : > { %v3351_v59 = vpop.permute.xlu0 %3350 }
 0xf76   : > { %v3366_v22 = vsel %vm5723_vm10, %v3364_v53, %v3351_v59 }
 0xf77   : > { %v3368_v14 = vsel %vm5724_vm4, %v3366_v22, %v3356_v2 }
 0xf78   : > { %3809 = vmatmul.mubr.msk.bf16.vlgmr.msra.gmra.mrb[28].mxu0 %vm5725_vm12, %v3368_v14 }
0x104b   : > { %v3445_v3 = vpop.f32.mrb[28].mxu0 }
0x104c   : > { %v3446_v11 = vadd.f32 %v3445_v3, %v3379_v49  ;;  %v3810_v32 = vpop.f32.mrb[29].mxu0 }
0x104d   : > { %v3448_v10 = vpop.f32.mrb[30].mxu0 }
0x104e   : > { %v3452_v24 = vmax.f32 %v3446_v11, 0.0  ;;  %v3449_v15 = vadd.f32 %v3448_v10, %v3379_v49  ;;  %v3811_v25 = vpop.f32.mrb[31].mxu0 }
0x1050   : > { %v3458_v23 = vmul.f32 %v3457_v39, %v3452_v24  ;;  %v3453_v28 = vmax.f32 %v3449_v15, 0.0 }
0x1052   : > { %v3459_v29 = vmul.f32 %v3457_v39, %v3453_v28  ;;  %v3464_v30 = vadd.f32 %v3463_v27, %v3458_v23 }
0x1054   : > { %v3474_v12 = vmul.f32 %v3613_v41, %v3464_v30  ;;  %v3465_v44 = vadd.f32 %v3463_v27, %v3459_v29 }
0x1056   : > { %v3476_v56 = vsel %vm5726_vm13, %v3474_v12, 0.0  ;;  %v3475_v37 = vmul.f32 %v3613_v41, %v3465_v44 }
0x1057   : > { %3477 = vadd.xlane.f32.xlu0 %v3476_v56 }
0x1058   : > { %v3479_v38 = vsel %vm5727_vm8, %v3475_v37, 0.0 }
0x1059   : > { %3480 = vadd.xlane.f32.xlu1 %v3479_v38 }
0x106d   : > { %3484 = vperm.xlu0 %3877, %v3467_v34  }
0x10e4   : > { %v3478_v58 = vpop.xlane.xlu0 %3477 }
0x10e6   : > { %v3481_v43 = vpop.xlane.xlu1 %3480 }
0x10ec   : > { %v3485_v42 = vpop.permute.xlu0 %3484 }
0x10ed   : > { %v3490_v61 = vrot.slane %v3485_v42, %v4185_v52 }
0x10ef   : > { %v3491_v19 = vadd.f32 %v3490_v61, %v3478_v58  ;;  %v3492_v26 = vadd.f32 %v3490_v61, %v3481_v43 }
0x10f1   : > { %v3500_v46 = vrot.slane %v3491_v19, %v3499_v18  ;;  %v3505_v50 = vrot.slane %v3492_v26, %v3504_v17 }
0x10f3   : > { %v3507_v51 = vsel %vm3506_vm11, %v3505_v50, %v3500_v46 }
0x10f4   : > { %3510 = vst.msk [vmem:[%s434_s15] sm:$0x1] %vm3509_vm7, %v3507_v51 }
0x10f5   : > { %3891 = shalt.err (!%p3888_p3)
}
0x10f6   : > { %s3892_s18 = scalar_lea.hbm %s5484_s23, 16  ;;  %s3896_s17 = scalar_lea.hbm %s5539_s13, 32 }
0x10f7   : > { %p3893_p4 = scmp.ne.s32.totalorder %s5484_s23, %s3892_s18  ;;  %p3897_p9 = scmp.lt.u32.totalorder %s5484_s23, %s5539_s13 }
0x10f8   : > { %p3898_p10 = scmp.lt.u32.totalorder %s3896_s17, %s3892_s18  ;;  %p3900_p12 = scmp.lt.u32.totalorder %s3892_s18, %s5484_s23 }
0x10f9   : > { %p3894_p7 = pnand %p3893_p4, %p4080_p5 }
0x10fa   : > { %p3899_p11 = por %p3898_p10, %p3897_p9 }
0x10fb   : > { %p3895_p8 = pneg %p3894_p7 }
0x10fc   : > { %p3901_p13 = por %p3900_p12, %p3899_p11 }
0x10fe   : > { %p3902_p0 = pnand %p3901_p13, %p3895_p8 }
0x1100   : > { %3905 = shalt.err (!%p3902_p0)
}
0x1101   : > { %3812 = dma.vmem_to_hbm [thread:$0]  (%p4080_p5), %s5486_s24, 16, %s5484_s23, %s3512_s14  }
0x1102 PF: > { %p3818_p1 = scmp.ge.s32.totalorder %s3940_s30, 2  ;;  %s3536_s21 = sand.u32 1, %s3928_s27  }
0x1103   : > { %s3537_s22 = scalar_lea.sflag [#allocation4], %s3536_s21 }
0x1104   : > { %p3815_p2 = pnand %p3818_p1, %p4084_p6 }
0x1106   : > { %3923 = dma.done.wait (!%p3815_p2), %s3537_s22, 16  }
0x1107   : > { %3925 = vsyncadd (!%p3815_p2), %s3537_s22, 4294967280  ;;  %s5729_s30 = sld [smem:[#allocation7_spill]]  ;;  %s5730_s15 = sld [smem:[#allocation6_spill]] }
0x1108   : > { %s5731_s29 = sld [smem:[#allocation8_spill]]  ;;  %s5732_s27 = smov %s3932_s28 }
0x110d   : > { %p25_p3 = scmp.ge.s32.totalorder %s5729_s30, 4   ;;  %s5733_s28 = smov %s5730_s15 }
0x110f   :  { %27 = sbr.rel (!%p25_p3) target bundleno = 9 (0x9), region = 107 }
0x1116   :  { %3541 = vsyncpa [#allocation4], 1 }
0x1117   :  { %3543 = vsyncpa [#allocation4 + $0x1], 1 }

</bundles_post_ra>
